<compile_context>
chip_gen: v5e
topology: v5e:2x2
jax: 0.10.0
libtpu: 0.0.40
codegen_flags: <defaults>
</compile_context>

<pallas_src>
import jax
import jax.numpy as jnp
from jax.experimental import pallas as pl
from jax.experimental.pallas import tpu as pltpu

NEG_SLOPE = 0.01  # nn.LeakyReLU() default
D_IN, H, N_OUT = 512, 1024, 6144


def _leaky_relu(x):
    return jnp.where(x > 0, x, NEG_SLOPE * x)


# ---------------------------------------------------------------------------
# Stage 1: h2 = LeakyReLU(LeakyReLU(x @ W1 + b1) @ W2 + b2)   (single step)
# ---------------------------------------------------------------------------
def _hidden_kernel(x_ref, w1_ref, b1_ref, w2_ref, b2_ref, h2_ref):
    x_bf = x_ref[...].astype(jnp.bfloat16)
    h1 = jnp.dot(x_bf, w1_ref[...],
                 preferred_element_type=jnp.float32) + b1_ref[...]
    h1 = _leaky_relu(h1)
    h2 = jnp.dot(h1.astype(jnp.bfloat16), w2_ref[...],
                 preferred_element_type=jnp.float32) + b2_ref[...]
    h2_ref[...] = _leaky_relu(h2)


# ---------------------------------------------------------------------------
# Stage 2: y[:, j*tn:(j+1)*tn] = (h2 @ dequant(W3_int8 tile)) * scale + b3
# ---------------------------------------------------------------------------
def _out_kernel(h2_ref, w3q_ref, scale_ref, b3_ref, o_ref):
    h2_bf = h2_ref[...].astype(jnp.bfloat16)
    # int8 -> bf16 is exact (|q| <= 127 fits bf16's mantissa) and keeps the
    # matmul generation-agnostic: bf16 x bf16 -> f32 accumulate on the MXU.
    w3_bf = w3q_ref[...].astype(jnp.bfloat16)
    acc = jnp.dot(h2_bf, w3_bf, preferred_element_type=jnp.float32)
    # Dequant + bias in the f32 epilogue (per-output-column scale broadcasts).
    o_ref[...] = acc * scale_ref[...] + b3_ref[...]


def decoder_s_forward(x, params, *, tn=3072):
    """x: (B, 512) float32 -> (B, 3, 2048) float32.

    params: (w1_bf16, b1_f32, w2_bf16, b2_f32, w3_int8, w3_scale_f32, b3_f32)
    with weights in (in, out) layout, biases/scale shaped (1, out).
    """
    w1, b1, w2, b2, w3q, w3_scale, b3 = params
    B = x.shape[0]
    assert x.shape == (B, D_IN)
    assert B % 8 == 0, "B must be a multiple of 8 (f32 sublane tiling)"
    assert N_OUT % tn == 0 and tn % 128 == 0

    # ---- stage 1: hidden activations (computed exactly once) ----
    h2 = pl.pallas_call(
        _hidden_kernel,
        out_shape=jax.ShapeDtypeStruct((B, H), jnp.float32),
        grid=(1,),
        in_specs=[
            pl.BlockSpec((B, D_IN), lambda i: (0, 0)),   # x
            pl.BlockSpec((D_IN, H), lambda i: (0, 0)),   # W1 (bf16)
            pl.BlockSpec((1, H),    lambda i: (0, 0)),   # b1
            pl.BlockSpec((H, H),    lambda i: (0, 0)),   # W2 (bf16)
            pl.BlockSpec((1, H),    lambda i: (0, 0)),   # b2
        ],
        out_specs=pl.BlockSpec((B, H), lambda i: (0, 0)),
        compiler_params=pltpu.CompilerParams(
            dimension_semantics=("arbitrary",),
            vmem_limit_bytes=32 << 20,
        ),
    )(x, w1, b1, w2, b2)

    # ---- stage 2: stream int8 W3 tiles, dequantize in the epilogue ----
    out = pl.pallas_call(
        _out_kernel,
        out_shape=jax.ShapeDtypeStruct((B, N_OUT), jnp.float32),
        grid=(N_OUT // tn,),
        in_specs=[
            # h2 is tiny (B x 1024 f32) and constant across steps: single buffer.
            pl.BlockSpec((B, H), lambda j: (0, 0),
                         pipeline_mode=pl.Buffered(1)),
            pl.BlockSpec((H, tn), lambda j: (0, j)),     # W3 int8 tile (streamed, Buffered(2))
            pl.BlockSpec((1, tn), lambda j: (0, j)),     # per-column scale (f32)
            pl.BlockSpec((1, tn), lambda j: (0, j)),     # b3 tile (f32)
        ],
        out_specs=pl.BlockSpec((B, tn), lambda j: (0, j)),
        compiler_params=pltpu.CompilerParams(
            # Steps are fully independent; with grid=2 the 6144 output columns
            # split 1:1 across v7x's two TensorCores.
            # TODO(synk): if an xprof profile on v7x shows one idle TensorCore,
            # switch this axis to pltpu.CORE_PARALLEL (or an explicit core_map).
            dimension_semantics=("parallel",),
            vmem_limit_bytes=32 << 20,
        ),
    )(h2, w3q, w3_scale, b3)

    return out.reshape(-1, 3, 2048)


# ---------------------------------------------------------------------------
# Parameter construction / packing
# ---------------------------------------------------------------------------
def init_params_f32(key):
    """f32 params mirroring PyTorch nn.Linear defaults:
    W, b ~ U(-1/sqrt(fan_in), 1/sqrt(fan_in)); the final bias is then
    overwritten with U(-1, 1) as in DecoderS.__init__."""
    def linear_init(k, fan_in, fan_out):
        kw, kb = jax.random.split(k)
        bound = 1.0 / jnp.sqrt(fan_in)
        w = jax.random.uniform(kw, (fan_in, fan_out), jnp.float32, -bound, bound)
        b = jax.random.uniform(kb, (1, fan_out), jnp.float32, -bound, bound)
        return w, b

    k1, k2, k3, k3b = jax.random.split(key, 4)
    w1, b1 = linear_init(k1, D_IN, H)
    w2, b2 = linear_init(k2, H, H)
    w3, _ = linear_init(k3, H, N_OUT)
    b3 = jax.random.uniform(k3b, (1, N_OUT), jnp.float32, -1.0, 1.0)
    return (w1, b1, w2, b2, w3, b3)


def pack_params(f32_params):
    """Kernel storage: W1/W2 bf16; W3 per-output-column symmetric int8 + f32
    scale; biases stay f32."""
    w1, b1, w2, b2, w3, b3 = f32_params
    amax = jnp.max(jnp.abs(w3), axis=0, keepdims=True)          # (1, N_OUT)
    scale = jnp.maximum(amax, 1e-30) / 127.0
    w3q = jnp.clip(jnp.round(w3 / scale), -127, 127).astype(jnp.int8)
    return (w1.astype(jnp.bfloat16), b1,
            w2.astype(jnp.bfloat16), b2,
            w3q, scale, b3)


# ---------------------------------------------------------------------------
# References
# ---------------------------------------------------------------------------
def reference_forward_f32(x, f32_params):
    """True DecoderS semantics in plain f32 JAX (bounds the numerics drift)."""
    w1, b1, w2, b2, w3, b3 = f32_params
    h1 = _leaky_relu(jnp.dot(x, w1) + b1)
    h2 = _leaky_relu(jnp.dot(h1, w2) + b2)
    return (jnp.dot(h2, w3) + b3).reshape(-1, 3, 2048)


def reference_forward_packed(x, params):
    """Pure-JAX reference using the exact bf16/int8 recipe the kernels use."""
    w1, b1, w2, b2, w3q, scale, b3 = params
    h1 = _leaky_relu(jnp.dot(x.astype(jnp.bfloat16), w1,
                             preferred_element_type=jnp.float32) + b1)
    h2 = _leaky_relu(jnp.dot(h1.astype(jnp.bfloat16), w2,
                             preferred_element_type=jnp.float32) + b2)
    acc = jnp.dot(h2.astype(jnp.bfloat16), w3q.astype(jnp.bfloat16),
                  preferred_element_type=jnp.float32)
    return (acc * scale + b3).reshape(-1, 3, 2048)


if __name__ == "__main__":
    key = jax.random.PRNGKey(0)
    kx, kp = jax.random.split(key)

    B = 8  # small batch (sublane-aligned)
    x = jax.random.normal(kx, (B, D_IN), jnp.float32)
    f32_params = init_params_f32(kp)
    params = pack_params(f32_params)

    y = decoder_s_forward(x, params)
    y = jax.block_until_ready(y)
    assert y.shape == (B, 3, 2048), y.shape

    # 1) Kernel vs identical-recipe pure-JAX reference (implementation check).
    y_packed = reference_forward_packed(x, params)
    assert jnp.allclose(y, y_packed, atol=5e-3, rtol=5e-3), \
        float(jnp.max(jnp.abs(y - y_packed)))

    # 2) Kernel vs the true f32 DecoderS math (bounds bf16 + int8-W3 drift).
    y_f32 = reference_forward_f32(x, f32_params)
    assert jnp.allclose(y, y_f32, atol=5e-2, rtol=1e-2), \
        float(jnp.max(jnp.abs(y - y_f32)))

    print("KERNEL_OK")
</pallas_src>

<mosaic_0001>
module attributes {stable_mosaic.version = 11 : i64} {
  func.func @_hidden_kernel(%arg0: i32, %arg1: memref<8x512xf32, #tpu.memory_space<vmem>>, %arg2: memref<512x1024xbf16, #tpu.memory_space<vmem>>, %arg3: memref<1x1024xf32, #tpu.memory_space<vmem>>, %arg4: memref<1024x1024xbf16, #tpu.memory_space<vmem>>, %arg5: memref<1x1024xf32, #tpu.memory_space<vmem>>, %arg6: memref<8x1024xf32, #tpu.memory_space<vmem>>) attributes {dimension_semantics = [#tpu.dimension_semantics<arbitrary>], iteration_bounds = array<i64: 1>, scalar_prefetch = 0 : i64, scratch_operands = 0 : i64, tpu.core_type = #tpu.core_type<tc>, window_params = [{pipeline_mode = #tpu.pipeline_mode<synchronous>, transform_indices = @transform_0, window_bounds = array<i64: 8, 512>}, {pipeline_mode = #tpu.pipeline_mode<synchronous>, transform_indices = @transform_1, window_bounds = array<i64: 512, 1024>}, {pipeline_mode = #tpu.pipeline_mode<synchronous>, transform_indices = @transform_2, window_bounds = array<i64: 1, 1024>}, {pipeline_mode = #tpu.pipeline_mode<synchronous>, transform_indices = @transform_3, window_bounds = array<i64: 1024, 1024>}, {pipeline_mode = #tpu.pipeline_mode<synchronous>, transform_indices = @transform_4, window_bounds = array<i64: 1, 1024>}, {pipeline_mode = #tpu.pipeline_mode<synchronous>, transform_indices = @transform_5, window_bounds = array<i64: 8, 1024>}]} {
    %c0 = arith.constant 0 : index
    %c0_0 = arith.constant 0 : index
    %0 = vector.load %arg1[%c0, %c0_0] : memref<8x512xf32, #tpu.memory_space<vmem>>, vector<8x512xf32>
    %1 = arith.truncf %0 : vector<8x512xf32> to vector<8x512xbf16>
    %c0_1 = arith.constant 0 : index
    %c0_2 = arith.constant 0 : index
    %2 = vector.load %arg2[%c0_1, %c0_2] : memref<512x1024xbf16, #tpu.memory_space<vmem>>, vector<512x1024xbf16>
    %cst = arith.constant dense<0.000000e+00> : vector<8x1024xf32>
    %3 = tpu.matmul %1, %2, %cst {dimension_numbers = #tpu.dot_dimension_numbers<[1], [0], [0], [1], [0, 0, 1, 1], [], []>} : vector<8x512xbf16>, vector<512x1024xbf16>, vector<8x1024xf32> -> vector<8x1024xf32>
    %c0_3 = arith.constant 0 : index
    %c0_4 = arith.constant 0 : index
    %4 = vector.load %arg3[%c0_3, %c0_4] : memref<1x1024xf32, #tpu.memory_space<vmem>>, vector<1x1024xf32>
    %5 = vector.broadcast %4 : vector<1x1024xf32> to vector<8x1024xf32>
    %6 = arith.addf %3, %5 : vector<8x1024xf32>
    %cst_5 = arith.constant 0.000000e+00 : f32
    %7 = vector.broadcast %cst_5 : f32 to vector<8x1024xf32>
    %8 = arith.cmpf ogt, %6, %7 : vector<8x1024xf32>
    %cst_6 = arith.constant 0.00999999977 : f32
    %9 = vector.broadcast %cst_6 : f32 to vector<8x1024xf32>
    %10 = arith.mulf %9, %6 : vector<8x1024xf32>
    %11 = arith.select %8, %6, %10 : vector<8x1024xi1>, vector<8x1024xf32>
    %12 = arith.truncf %11 : vector<8x1024xf32> to vector<8x1024xbf16>
    %c0_7 = arith.constant 0 : index
    %c0_8 = arith.constant 0 : index
    %13 = vector.load %arg4[%c0_7, %c0_8] : memref<1024x1024xbf16, #tpu.memory_space<vmem>>, vector<1024x1024xbf16>
    %cst_9 = arith.constant dense<0.000000e+00> : vector<8x1024xf32>
    %14 = tpu.matmul %12, %13, %cst_9 {dimension_numbers = #tpu.dot_dimension_numbers<[1], [0], [0], [1], [0, 0, 1, 1], [], []>} : vector<8x1024xbf16>, vector<1024x1024xbf16>, vector<8x1024xf32> -> vector<8x1024xf32>
    %c0_10 = arith.constant 0 : index
    %c0_11 = arith.constant 0 : index
    %15 = vector.load %arg5[%c0_10, %c0_11] : memref<1x1024xf32, #tpu.memory_space<vmem>>, vector<1x1024xf32>
    %16 = vector.broadcast %15 : vector<1x1024xf32> to vector<8x1024xf32>
    %17 = arith.addf %14, %16 : vector<8x1024xf32>
    %cst_12 = arith.constant 0.000000e+00 : f32
    %18 = vector.broadcast %cst_12 : f32 to vector<8x1024xf32>
    %19 = arith.cmpf ogt, %17, %18 : vector<8x1024xf32>
    %cst_13 = arith.constant 0.00999999977 : f32
    %20 = vector.broadcast %cst_13 : f32 to vector<8x1024xf32>
    %21 = arith.mulf %20, %17 : vector<8x1024xf32>
    %22 = arith.select %19, %17, %21 : vector<8x1024xi1>, vector<8x1024xf32>
    %c0_14 = arith.constant 0 : index
    %c0_15 = arith.constant 0 : index
    %23 = vector.load %arg6[%c0_14, %c0_15] : memref<8x1024xf32, #tpu.memory_space<vmem>>, vector<8x1024xf32>
    tpu.vector_store %arg6[%c0_14, %c0_15], %22 {strides = array<i32>} : memref<8x1024xf32, #tpu.memory_space<vmem>>, vector<8x1024xf32>,
    return
  }
  func.func @transform_0(%arg0: i32) -> (i32, i32) {
    %c0_i32 = arith.constant 0 : i32
    %c0_i32_0 = arith.constant 0 : i32
    %c0_i32_1 = arith.constant 0 : i32
    return %c0_i32, %c0_i32_0 : i32, i32
  }
  func.func @transform_1(%arg0: i32) -> (i32, i32) {
    %c0_i32 = arith.constant 0 : i32
    %c0_i32_0 = arith.constant 0 : i32
    %c0_i32_1 = arith.constant 0 : i32
    return %c0_i32, %c0_i32_0 : i32, i32
  }
  func.func @transform_2(%arg0: i32) -> (i32, i32) {
    %c0_i32 = arith.constant 0 : i32
    %c0_i32_0 = arith.constant 0 : i32
    %c0_i32_1 = arith.constant 0 : i32
    return %c0_i32, %c0_i32_0 : i32, i32
  }
  func.func @transform_3(%arg0: i32) -> (i32, i32) {
    %c0_i32 = arith.constant 0 : i32
    %c0_i32_0 = arith.constant 0 : i32
    %c0_i32_1 = arith.constant 0 : i32
    return %c0_i32, %c0_i32_0 : i32, i32
  }
  func.func @transform_4(%arg0: i32) -> (i32, i32) {
    %c0_i32 = arith.constant 0 : i32
    %c0_i32_0 = arith.constant 0 : i32
    %c0_i32_1 = arith.constant 0 : i32
    return %c0_i32, %c0_i32_0 : i32, i32
  }
  func.func @transform_5(%arg0: i32) -> (i32, i32) {
    %c0_i32 = arith.constant 0 : i32
    %c0_i32_0 = arith.constant 0 : i32
    %c0_i32_1 = arith.constant 0 : i32
    return %c0_i32, %c0_i32_0 : i32, i32
  }
}

</mosaic_0001>

<bundles_post_ra>
// kernel: tpu_custom_call.1
= control target key start
LH: loop header
LB: loop body
LE: loop exit
PB: predicated region body
PF: predicated region fallthrough
CT: control target
= control target key end

     0   :  { %10 = vsyncpa [#allocation3], 0  ;;  %s10410_s0 = inlined_call_operand.hbm [shape: f32[8,512], index: 0, kind: input, shape index: {}]   ;;  %s10411_s1 = inlined_call_operand.hbm [shape: bf16[512,1024], index: 1, kind: input, shape index: {}]   ;;  %s10412_s2 = inlined_call_operand.hbm [shape: f32[1,1024], index: 2, kind: input, shape index: {}]   ;;  %s10413_s3 = inlined_call_operand.hbm [shape: bf16[1024,1024], index: 3, kind: input, shape index: {}]   ;;  %s10414_s4 = inlined_call_operand.hbm [shape: f32[1,1024], index: 4, kind: input, shape index: {}]   ;;  %s10415_s5 = inlined_call_operand.hbm [shape: f32[8,1024], index: 5, kind: output, shape index: {}]  }
   0x1   :  { %11 = vsyncpa [#allocation6], 0 }
   0x2   :  { %12 = vsyncpa [#allocation9], 0  ;;  %s29_s20 = sshll.u32 %s10411_s1, 4  ;;  %s30_s20 = int_to_ptr.hbm [resolvable:$true] %s29_s20 }
   0x3   :  { %13 = vsyncpa [#allocation4], 0  ;;  %s10080_s21 = smov [#allocation5]   ;;  %s53_s25 = sshll.u32 %s10413_s3, 4  ;;  %s54_s25 = int_to_ptr.hbm [resolvable:$true] %s53_s25 }
   0x4   :  { %s31_s22 = sshll.u32 %s10080_s21, 4  ;;  %s10081_s26 = smov 512   ;;  %s32_s22 = int_to_ptr.vmem [resolvable:$true] %s31_s22 }
   0x5   :  { %s10082_s27 = smov 32   ;;  %s10083_s28 = smov [#allocation8]  }
   0x6   :  { %37 = dma.hbm_to_vmem [thread:$0]  %s30_s20, 32768, %s32_s22, [#allocation6], %s10081_s26, %s10081_s26, %s10082_s27  }
   0x7   :  { %s55_s29 = sshll.u32 %s10083_s28, 4  ;;  %s19_s7 = sshll.u32 %s10410_s0, 4  ;;  %s56_s29 = int_to_ptr.vmem [resolvable:$true] %s55_s29  ;;  %s20_s7 = int_to_ptr.hbm [resolvable:$true] %s19_s7 }
   0x8   :  { %61 = dma.hbm_to_vmem [thread:$0]  %s54_s25, 65536, %s56_s29, [#allocation9], %s10081_s26, %s10081_s26, %s10082_s27  }
   0x9   :  { %s43_s9 = sshll.u32 %s10412_s2, 4  ;;  %s10084_s10 = smov [#allocation2]   ;;  %s44_s9 = int_to_ptr.hbm [resolvable:$true] %s43_s9 }
   0xa   :  { %s21_s11 = sshll.u32 %s10084_s10, 4  ;;  %s10085_s3 = smov [#allocation7]   ;;  %s22_s11 = int_to_ptr.vmem [resolvable:$true] %s21_s11 }
   0xb   :  { %24 = dma.hbm_to_vmem [thread:$0]  %s20_s7, 512, %s22_s11, [#allocation3]  }
   0xc   :  { %s45_s12 = sshll.u32 %s10085_s3, 4  ;;  %s67_s15 = sshll.u32 %s10414_s4, 4  ;;  %s46_s12 = int_to_ptr.vmem [resolvable:$true] %s45_s12  ;;  %s68_s15 = int_to_ptr.hbm [resolvable:$true] %s67_s15 }
   0xd   :  { %48 = dma.hbm_to_vmem [thread:$0]  %s44_s9, 128, %s46_s12, [#allocation6]  }
   0xe   :  { %s10086_s0 = smov [#allocation10]  }
   0xf   :  { %s69_s16 = sshll.u32 %s10086_s0, 4  ;;  %s70_s16 = int_to_ptr.vmem [resolvable:$true] %s69_s16 }
  0x10   :  { %72 = dma.hbm_to_vmem [thread:$0]  %s68_s15, 128, %s70_s16, [#allocation9]  }
  0x11   :  { %10072 = dma.done.wait [#allocation3], 512  }
  0x12   :  { %10073 = vsyncadd [#allocation3], 4294966784 }
  0x13   :  { %10074 = dma.done.wait [#allocation6], 32896  }
  0x14   :  { %10075 = vsyncadd [#allocation6], 4294934400 }
  0x15   :  { %10076 = dma.done.wait [#allocation9], 65664  }
  0x16   :  { %10077 = vsyncadd [#allocation9], 4294901632  ;;  %v6302_v0 = vld [vmem:[#allocation5 + $0x1c0] sm:$0xf]  ;;  %s10087_s2 = smov [#allocation11]   ;;  %s6064_s19 = sshll.u32 %s10415_s5, 4  ;;  %s6065_s19 = int_to_ptr.hbm [resolvable:$true] %s6064_s19 }
  0x17   :  { %v9208_v1 = vld [vmem:[#allocation5 + $0x1dc] sm:$0xf0]  ;;  %s6062_s4 = sshll.u32 %s10087_s2, 4  ;;  %s6063_s4 = int_to_ptr.vmem [resolvable:$true] %s6062_s4 }
  0x18   :  { %v6558_v2 = vld [vmem:[#allocation5 + $0x3c0] sm:$0xf]  ;;  %v6303_v3 = vor.u32 %v9208_v1, %v6302_v0 }
  0x19   :  { %v9272_v4 = vld [vmem:[#allocation5 + $0x3dc] sm:$0xf0] }
  0x1a   :  { %v6814_v5 = vld [vmem:[#allocation5 + $0x5c0] sm:$0xf]  ;;  %v6559_v7 = vor.u32 %v9272_v4, %v6558_v2  ;;  %1655 = vmatpush.bf16.msra.mxu0 %v6303_v3 }
  0x1b   :  { %v9336_v6 = vld [vmem:[#allocation5 + $0x5dc] sm:$0xf0] }
  0x1c   :  { %v6815_v8 = vor.u32 %v9336_v6, %v6814_v5  ;;  %v7070_v9 = vld [vmem:[#allocation5 + $0x7c0] sm:$0xf]  ;;  %1668 = vmatpush.bf16.msra.mxu1 %v6559_v7 }
  0x1d   :  { %v9400_v10 = vld [vmem:[#allocation5 + $0x7dc] sm:$0xf0] }
  0x1e   :  { %v6270_v11 = vld [vmem:[#allocation5 + $0x180] sm:$0xf]  ;;  %v7071_v12 = vor.u32 %v9400_v10, %v7070_v9  ;;  %1681 = vmatpush.bf16.msra.mxu2 %v6815_v8 }
  0x1f   :  { %v9200_v13 = vld [vmem:[#allocation5 + $0x19c] sm:$0xf0] }
  0x20   :  { %v6526_v14 = vld [vmem:[#allocation5 + $0x380] sm:$0xf]  ;;  %v6271_v16 = vor.u32 %v9200_v13, %v6270_v11  ;;  %1694 = vmatpush.bf16.msra.mxu3 %v7071_v12 }
  0x21   :  { %v9264_v15 = vld [vmem:[#allocation5 + $0x39c] sm:$0xf0] }
  0x22   :  { %v6527_v17 = vor.u32 %v9264_v15, %v6526_v14  ;;  %v6782_v18 = vld [vmem:[#allocation5 + $0x580] sm:$0xf]  ;;  %1656 = vmatpush.bf16.msra.mxu0 %v6271_v16 }
  0x23   :  { %v9328_v19 = vld [vmem:[#allocation5 + $0x59c] sm:$0xf0] }
  0x24   :  { %v7038_v20 = vld [vmem:[#allocation5 + $0x780] sm:$0xf]  ;;  %v6783_v21 = vor.u32 %v9328_v19, %v6782_v18  ;;  %1669 = vmatpush.bf16.msra.mxu1 %v6527_v17 }
  0x25   :  { %v9392_v22 = vld [vmem:[#allocation5 + $0x79c] sm:$0xf0] }
  0x26   :  { %v6238_v23 = vld [vmem:[#allocation5 + $0x140] sm:$0xf]  ;;  %v7039_v25 = vor.u32 %v9392_v22, %v7038_v20  ;;  %1682 = vmatpush.bf16.msra.mxu2 %v6783_v21 }
  0x27   :  { %v9192_v24 = vld [vmem:[#allocation5 + $0x15c] sm:$0xf0] }
  0x28   :  { %v6494_v26 = vld [vmem:[#allocation5 + $0x340] sm:$0xf]  ;;  %v6239_v29 = vor.u32 %v9192_v24, %v6238_v23  ;;  %1695 = vmatpush.bf16.msra.mxu3 %v7039_v25 }
  0x29   :  { %v9256_v27 = vld [vmem:[#allocation5 + $0x35c] sm:$0xf0] }
  0x2a   :  { %v6750_v28 = vld [vmem:[#allocation5 + $0x540] sm:$0xf]  ;;  %v6495_v33 = vor.u32 %v9256_v27, %v6494_v26  ;;  %1657 = vmatpush.bf16.msra.mxu0 %v6239_v29  ;;  %v6304_v29 = vld [vmem:[#allocation5 + $0x1e0] sm:$0xf0] }
  0x2b   :  { %v9320_v30 = vld [vmem:[#allocation5 + $0x55c] sm:$0xf0] }
  0x2c   :  { %v7006_v31 = vld [vmem:[#allocation5 + $0x740] sm:$0xf]  ;;  %v6751_v34 = vor.u32 %v9320_v30, %v6750_v28  ;;  %1670 = vmatpush.bf16.msra.mxu1 %v6495_v33  ;;  %v9204_v28 = vld [vmem:[#allocation5 + $0x1c4] sm:$0xf] }
  0x2d   :  { %v9384_v32 = vld [vmem:[#allocation5 + $0x75c] sm:$0xf0]  ;;  %v9268_v30 = vld [vmem:[#allocation5 + $0x3c4] sm:$0xf] }
  0x2e   :  { %v6206_v35 = vld [vmem:[#allocation5 + $0x100] sm:$0xf]  ;;  %v7007_v38 = vor.u32 %v9384_v32, %v7006_v31  ;;  %1683 = vmatpush.bf16.msra.mxu2 %v6751_v34  ;;  %v6560_v32 = vld [vmem:[#allocation5 + $0x3e0] sm:$0xf0] }
  0x2f   :  { %v9184_v36 = vld [vmem:[#allocation5 + $0x11c] sm:$0xf0]  ;;  %v9332_v33 = vld [vmem:[#allocation5 + $0x5c4] sm:$0xf] }
  0x30   :  { %v6462_v37 = vld [vmem:[#allocation5 + $0x300] sm:$0xf]  ;;  %v6207_v44 = vor.u32 %v9184_v36, %v6206_v35  ;;  %1696 = vmatpush.bf16.msra.mxu3 %v7007_v38  ;;  %v6816_v34 = vld [vmem:[#allocation5 + $0x5e0] sm:$0xf0] }
  0x31   :  { %v9248_v39 = vld [vmem:[#allocation5 + $0x31c] sm:$0xf0]  ;;  %v7072_v38 = vld [vmem:[#allocation5 + $0x7e0] sm:$0xf0] }
  0x32   :  { %v6718_v40 = vld [vmem:[#allocation5 + $0x500] sm:$0xf]  ;;  %v6463_v45 = vor.u32 %v9248_v39, %v6462_v37  ;;  %1658 = vmatpush.bf16.msra.mxu0 %v6207_v44  ;;  %v9396_v37 = vld [vmem:[#allocation5 + $0x7c4] sm:$0xf] }
  0x33   :  { %v9312_v41 = vld [vmem:[#allocation5 + $0x51c] sm:$0xf0]  ;;  %v6272_v44 = vld [vmem:[#allocation5 + $0x1a0] sm:$0xf0] }
  0x34   :  { %v6974_v42 = vld [vmem:[#allocation5 + $0x700] sm:$0xf]  ;;  %v6719_v46 = vor.u32 %v9312_v41, %v6718_v40  ;;  %1671 = vmatpush.bf16.msra.mxu1 %v6463_v45  ;;  %v6307_v40 = vor.u32 %v9204_v28, %v6304_v29  ;;  %v6563_v41 = vor.u32 %v9268_v30, %v6560_v32  ;;  %v9260_v45 = vld [vmem:[#allocation5 + $0x384] sm:$0xf] }
  0x35   :  { %v9376_v43 = vld [vmem:[#allocation5 + $0x71c] sm:$0xf0]  ;;  %v9300_v28 = vld [vmem:[#allocation5 + $0x4c4] sm:$0xf] }
  0x36   :  { %v6174_v47 = vld [vmem:[#allocation5 + $0xc0] sm:$0xf]  ;;  %v6975_v50 = vor.u32 %v9376_v43, %v6974_v42  ;;  %1684 = vmatpush.bf16.msra.mxu2 %v6719_v46  ;;  %v6819_v42 = vor.u32 %v9332_v33, %v6816_v34  ;;  %v9196_v43 = vld [vmem:[#allocation5 + $0x184] sm:$0xf]  ;;  %v7075_v46 = vor.u32 %v9396_v37, %v7072_v38 }
  0x37   :  { %v9176_v48 = vld [vmem:[#allocation5 + $0xdc] sm:$0xf0]  ;;  %v6688_v29 = vld [vmem:[#allocation5 + $0x4e0] sm:$0xf0] }
  0x38   :  { %v6430_v49 = vld [vmem:[#allocation5 + $0x2c0] sm:$0xf]  ;;  %v6175_v56 = vor.u32 %v9176_v48, %v6174_v47  ;;  %1697 = vmatpush.bf16.msra.mxu3 %v6975_v50  ;;  %v6528_v47 = vld [vmem:[#allocation5 + $0x3a0] sm:$0xf0]  ;;  %v6691_v34 = vor.u32 %v9300_v28, %v6688_v29  ;;  %v6790_v28 = vld [vmem:[#allocation5 + $0x588] sm:$0xf] }
  0x39   :  { %v9240_v51 = vld [vmem:[#allocation5 + $0x2dc] sm:$0xf0]  ;;  %v9324_v48 = vld [vmem:[#allocation5 + $0x584] sm:$0xf]  ;;  %v9329_v29 = vld [vmem:[#allocation5 + $0x5a4] sm:$0xf0] }
  0x3a   :  { %v6686_v52 = vld [vmem:[#allocation5 + $0x4c0] sm:$0xf]  ;;  %v6431_v57 = vor.u32 %v9240_v51, %v6430_v49  ;;  %1659 = vmatpush.bf16.msra.mxu0 %v6175_v56  ;;  %v6784_v49 = vld [vmem:[#allocation5 + $0x5a0] sm:$0xf0] }
  0x3b   :  { %v9304_v53 = vld [vmem:[#allocation5 + $0x4dc] sm:$0xf0]  ;;  %v9388_v50 = vld [vmem:[#allocation5 + $0x784] sm:$0xf] }
  0x3c   :  { %v6942_v54 = vld [vmem:[#allocation5 + $0x6c0] sm:$0xf]  ;;  %v6687_v58 = vor.u32 %v9304_v53, %v6686_v52  ;;  %1672 = vmatpush.bf16.msra.mxu1 %v6431_v57  ;;  %v7040_v51 = vld [vmem:[#allocation5 + $0x7a0] sm:$0xf0]  ;;  %v6275_v52 = vor.u32 %v9196_v43, %v6272_v44 }
  0x3d   :  { %v9368_v55 = vld [vmem:[#allocation5 + $0x6dc] sm:$0xf0]  ;;  %v9188_v53 = vld [vmem:[#allocation5 + $0x144] sm:$0xf] }
  0x3e   :  { %v6142_v59 = vld [vmem:[#allocation5 + $0x80] sm:$0xf]  ;;  %v6943_v62 = vor.u32 %v9368_v55, %v6942_v54  ;;  %1685 = vmatpush.bf16.msra.mxu2 %v6687_v58  ;;  %v6531_v54 = vor.u32 %v9260_v45, %v6528_v47  ;;  %v6787_v55 = vor.u32 %v9324_v48, %v6784_v49  ;;  %v6240_v56 = vld [vmem:[#allocation5 + $0x160] sm:$0xf0] }
  0x3f   :  { %v9168_v60 = vld [vmem:[#allocation5 + $0x9c] sm:$0xf0]  ;;  %v9252_v57 = vld [vmem:[#allocation5 + $0x344] sm:$0xf] }
  0x40   :  { %v6398_v61 = vld [vmem:[#allocation5 + $0x280] sm:$0xf]  ;;  %v6143_v4 = vor.u32 %v9168_v60, %v6142_v59  ;;  %1698 = vmatpush.bf16.msra.mxu3 %v6943_v62  ;;  %v6496_v58 = vld [vmem:[#allocation5 + $0x360] sm:$0xf0]  ;;  %v7043_v59 = vor.u32 %v9388_v50, %v7040_v51 }
  0x41   :  { %v9232_v63 = vld [vmem:[#allocation5 + $0x29c] sm:$0xf0]  ;;  %v9316_v60 = vld [vmem:[#allocation5 + $0x544] sm:$0xf] }
  0x42   :  { %v6654_v0 = vld [vmem:[#allocation5 + $0x480] sm:$0xf]  ;;  %v6399_v5 = vor.u32 %v9232_v63, %v6398_v61  ;;  %1660 = vmatpush.bf16.msra.mxu0 %v6143_v4  ;;  %v6752_v61 = vld [vmem:[#allocation5 + $0x560] sm:$0xf0] }
  0x43   :  { %v9296_v1 = vld [vmem:[#allocation5 + $0x49c] sm:$0xf0]  ;;  %v9380_v62 = vld [vmem:[#allocation5 + $0x744] sm:$0xf] }
  0x44   :  { %v6910_v2 = vld [vmem:[#allocation5 + $0x680] sm:$0xf]  ;;  %v6655_v6 = vor.u32 %v9296_v1, %v6654_v0  ;;  %1673 = vmatpush.bf16.msra.mxu1 %v6399_v5  ;;  %v7008_v63 = vld [vmem:[#allocation5 + $0x760] sm:$0xf0]  ;;  %v6243_v0 = vor.u32 %v9188_v53, %v6240_v56  ;;  %v6499_v1 = vor.u32 %v9252_v57, %v6496_v58  ;;  %v6755_v5 = vor.u32 %v9316_v60, %v6752_v61 }
  0x45   :  { %v9360_v3 = vld [vmem:[#allocation5 + $0x69c] sm:$0xf0]  ;;  %v9364_v30 = vld [vmem:[#allocation5 + $0x6c4] sm:$0xf] }
  0x46   :  { %v6110_v7 = vld [vmem:[#allocation5 + $0x40] sm:$0xf]  ;;  %v6911_v10 = vor.u32 %v9360_v3, %v6910_v2  ;;  %1686 = vmatpush.bf16.msra.mxu2 %v6655_v6  ;;  %v9180_v2 = vld [vmem:[#allocation5 + $0x104] sm:$0xf]  ;;  %v95_v3 = vld [vmem:[#allocation2 + $0x10] sm:$0xff] }
  0x47   :  { %v9160_v8 = vld [vmem:[#allocation5 + $0x5c] sm:$0xf0]  ;;  %v6208_v6 = vld [vmem:[#allocation5 + $0x120] sm:$0xf0] }
  0x48   :  { %v6366_v9 = vld [vmem:[#allocation5 + $0x240] sm:$0xf]  ;;  %v6111_v16 = vor.u32 %v9160_v8, %v6110_v7  ;;  %1699 = vmatpush.bf16.msra.mxu3 %v6911_v10  ;;  %v9244_v7 = vld [vmem:[#allocation5 + $0x304] sm:$0xf]  ;;  %v10133_v8 = vpack.c.bf16 %v95_v3, %v95_v3  ;;  %v96_v10 = vld [vmem:[#allocation2 + $0x18] sm:$0xff] }
  0x49   :  { %v9224_v11 = vld [vmem:[#allocation5 + $0x25c] sm:$0xf0]  ;;  %v9228_v37 = vld [vmem:[#allocation5 + $0x284] sm:$0xf] }
  0x4a   :  { %v6622_v12 = vld [vmem:[#allocation5 + $0x440] sm:$0xf]  ;;  %v6367_v19 = vor.u32 %v9224_v11, %v6366_v9  ;;  %1661 = vmatpush.bf16.msra.mxu0 %v6111_v16  ;;  %v7011_v11 = vor.u32 %v9380_v62, %v7008_v63  ;;  %v9372_v16 = vld [vmem:[#allocation5 + $0x704] sm:$0xf] }
  0x4b   :  { %v9288_v13 = vld [vmem:[#allocation5 + $0x45c] sm:$0xf0]  ;;  %v6912_v43 = vld [vmem:[#allocation5 + $0x6a0] sm:$0xf0] }
  0x4c   :  { %v6878_v14 = vld [vmem:[#allocation5 + $0x640] sm:$0xf]  ;;  %v6623_v20 = vor.u32 %v9288_v13, %v6622_v12  ;;  %1674 = vmatpush.bf16.msra.mxu1 %v6367_v19  ;;  %v6464_v12 = vld [vmem:[#allocation5 + $0x320] sm:$0xf0]  ;;  %v94_v19 = vld [vmem:[#allocation2 + $0x8] sm:$0xff] }
  0x4d   :  { %v9352_v15 = vld [vmem:[#allocation5 + $0x65c] sm:$0xf0]  ;;  %v9308_v13 = vld [vmem:[#allocation5 + $0x504] sm:$0xf] }
  0x4e   :  { %v6078_v17 = vld [vmem:[#allocation5] sm:$0xf]  ;;  %v6879_v24 = vor.u32 %v9352_v15, %v6878_v14  ;;  %1687 = vmatpush.bf16.msra.mxu2 %v6623_v20  ;;  %v6720_v14 = vld [vmem:[#allocation5 + $0x520] sm:$0xf0]  ;;  %v10137_v15 = vpack.c.bf16 %v96_v10, %v96_v10  ;;  %v6467_v20 = vor.u32 %v9244_v7, %v6464_v12  ;;  %v9273_v10 = vld [vmem:[#allocation5 + $0x3e4] sm:$0xf0] }
  0x4f   :  { %v9152_v18 = vld [vmem:[#allocation5 + $0x1c] sm:$0xf0]  ;;  %v9156_v47 = vld [vmem:[#allocation5 + $0x44] sm:$0xf]  ;;  %v9337_v12 = vld [vmem:[#allocation5 + $0x5e4] sm:$0xf0] }
  0x50   :  { %v6334_v21 = vld [vmem:[#allocation5 + $0x200] sm:$0xf]  ;;  %v6079_v31 = vor.u32 %v9152_v18, %v6078_v17  ;;  %1700 = vmatpush.bf16.msra.mxu3 %v6879_v24  ;;  %v6976_v17 = vld [vmem:[#allocation5 + $0x720] sm:$0xf0]  ;;  %v6211_v18 = vor.u32 %v9180_v2, %v6208_v6  ;;  %v6566_v6 = vld [vmem:[#allocation5 + $0x3c8] sm:$0xf] }
  0x51   :  { %v9216_v22 = vld [vmem:[#allocation5 + $0x21c] sm:$0xf0]  ;;  %v9236_v24 = vld [vmem:[#allocation5 + $0x2c4] sm:$0xf] }
  0x52   :  { %v6590_v23 = vld [vmem:[#allocation5 + $0x400] sm:$0xf]  ;;  %v6335_v35 = vor.u32 %v9216_v22, %v6334_v21  ;;  %1662 = vmatpush.bf16.msra.mxu0 %v6079_v31  ;;  %v6723_v21 = vor.u32 %v9308_v13, %v6720_v14  ;;  %v9172_v22 = vld [vmem:[#allocation5 + $0xc4] sm:$0xf] }
  0x53   :  { %v9280_v25 = vld [vmem:[#allocation5 + $0x41c] sm:$0xf0]  ;;  %v6944_v31 = vld [vmem:[#allocation5 + $0x6e0] sm:$0xf0] }
  0x54   :  { %v6846_v26 = vld [vmem:[#allocation5 + $0x600] sm:$0xf]  ;;  %v6591_v36 = vor.u32 %v9280_v25, %v6590_v23  ;;  %1675 = vmatpush.bf16.msra.mxu1 %v6335_v35  ;;  %v6176_v23 = vld [vmem:[#allocation5 + $0xe0] sm:$0xf0]  ;;  %v10142_v25 = vpack.c.bf16 %v94_v19, %v94_v19  ;;  %v6947_v38 = vor.u32 %v9364_v30, %v6944_v31  ;;  %v7046_v30 = vld [vmem:[#allocation5 + $0x788] sm:$0xf] }
  0x55   :  { %v9344_v27 = vld [vmem:[#allocation5 + $0x61c] sm:$0xf0]  ;;  %v6179_v32 = vor.u32 %v9172_v22, %v6176_v23  ;;  %v9164_v35 = vld [vmem:[#allocation5 + $0x84] sm:$0xf]  ;;  %v6278_v22 = vld [vmem:[#allocation5 + $0x188] sm:$0xf] }
  0x56   :  { %v6847_v39 = vor.u32 %v9344_v27, %v6846_v26  ;;  %1688 = vmatpush.bf16.msra.mxu2 %v6591_v36  ;;  %1707 = vmatpush.bf16.msrb.mxu0 %v6307_v40  ;;  %v93_v4 = vld [vmem:[#allocation2] sm:$0xff]  ;;  %v6979_v26 = vor.u32 %v9372_v16, %v6976_v17  ;;  %v7078_v16 = vld [vmem:[#allocation5 + $0x7c8] sm:$0xf] }
  0x57   :  { %v10135_v9 = vpack.c.bf16 %v93_v4, %v93_v4  ;;  %v6432_v27 = vld [vmem:[#allocation5 + $0x2e0] sm:$0xf0]  ;;  %1676 = vmatmul.bf16.vlgmr.msra.gmra.mxu1 %v10142_v25  ;;  %v6310_v4 = vld [vmem:[#allocation5 + $0x1c8] sm:$0xf] }
  0x58   :  { %1701 = vmatpush.bf16.msra.mxu3 %v6847_v39  ;;  %1720 = vmatpush.bf16.msrb.mxu1 %v6563_v41  ;;  %v6435_v33 = vor.u32 %v9236_v24, %v6432_v27  ;;  %v6144_v36 = vld [vmem:[#allocation5 + $0xa0] sm:$0xf0]  ;;  %v9401_v17 = vld [vmem:[#allocation5 + $0x7e4] sm:$0xf0] }
  0x59   :  { %1689 = vmatmul.bf16.vlgmr.msra.gmra.mxu2 %v10133_v8  ;;  %1663 = vmatmul.bf16.vlgmr.msra.gmra.mxu0 %v10135_v9  ;;  %v6400_v39 = vld [vmem:[#allocation5 + $0x2a0] sm:$0xf0]  ;;  %v6147_v44 = vor.u32 %v9164_v35, %v6144_v36  ;;  %v9201_v23 = vld [vmem:[#allocation5 + $0x1a4] sm:$0xf0] }
  0x5a   :  { %1733 = vmatpush.bf16.msrb.mxu2 %v6819_v42  ;;  %1708 = vmatpush.bf16.msrb.mxu0 %v6275_v52  ;;  %v9292_v40 = vld [vmem:[#allocation5 + $0x484] sm:$0xf]  ;;  %v6403_v45 = vor.u32 %v9228_v37, %v6400_v39  ;;  %v6534_v24 = vld [vmem:[#allocation5 + $0x388] sm:$0xf] }
  0x5b   :  { %1702 = vmatmul.bf16.vlgmr.msra.gmra.mxu3 %v10137_v15  ;;  %v6656_v41 = vld [vmem:[#allocation5 + $0x4a0] sm:$0xf0]  ;;  %v9265_v27 = vld [vmem:[#allocation5 + $0x3a4] sm:$0xf0] }
  0x5c   :  { %1746 = vmatpush.bf16.msrb.mxu3 %v7075_v46  ;;  %1721 = vmatpush.bf16.msrb.mxu1 %v6531_v54  ;;  %v9356_v42 = vld [vmem:[#allocation5 + $0x684] sm:$0xf]  ;;  %v6659_v46 = vor.u32 %v9292_v40, %v6656_v41  ;;  %v9393_v31 = vld [vmem:[#allocation5 + $0x7a4] sm:$0xf0] }
  0x5d   :  { %v6112_v48 = vld [vmem:[#allocation5 + $0x60] sm:$0xf0]  ;;  %v6915_v50 = vor.u32 %v9356_v42, %v6912_v43  ;;  %v6246_v35 = vld [vmem:[#allocation5 + $0x148] sm:$0xf] }
  0x5e   :  { %1734 = vmatpush.bf16.msrb.mxu2 %v6787_v55  ;;  %1709 = vmatpush.bf16.msrb.mxu0 %v6243_v0  ;;  %v9220_v49 = vld [vmem:[#allocation5 + $0x244] sm:$0xf]  ;;  %v6115_v56 = vor.u32 %v9156_v47, %v6112_v48  ;;  %v9193_v36 = vld [vmem:[#allocation5 + $0x164] sm:$0xf0] }
  0x5f   :  { %v6368_v51 = vld [vmem:[#allocation5 + $0x260] sm:$0xf0]  ;;  %v6502_v37 = vld [vmem:[#allocation5 + $0x348] sm:$0xf] }
  0x60   :  { %1747 = vmatpush.bf16.msrb.mxu3 %v7043_v59  ;;  %1722 = vmatpush.bf16.msrb.mxu1 %v6499_v1  ;;  %v9284_v52 = vld [vmem:[#allocation5 + $0x444] sm:$0xf]  ;;  %v6371_v59 = vor.u32 %v9220_v49, %v6368_v51  ;;  %v9257_v39 = vld [vmem:[#allocation5 + $0x364] sm:$0xf0] }
  0x61   :  { %v6624_v53 = vld [vmem:[#allocation5 + $0x460] sm:$0xf0]  ;;  %v6758_v40 = vld [vmem:[#allocation5 + $0x548] sm:$0xf] }
  0x62   :  { %1735 = vmatpush.bf16.msrb.mxu2 %v6755_v5  ;;  %1710 = vmatpush.bf16.msrb.mxu0 %v6211_v18  ;;  %v9348_v54 = vld [vmem:[#allocation5 + $0x644] sm:$0xf]  ;;  %v6627_v60 = vor.u32 %v9284_v52, %v6624_v53  ;;  %v9209_v5 = vld [vmem:[#allocation5 + $0x1e4] sm:$0xf0] }
  0x63   :  { %v6880_v55 = vld [vmem:[#allocation5 + $0x660] sm:$0xf0]  ;;  %v6311_v19 = vor.u32 %v9209_v5, %v6310_v4  ;;  %v9321_v41 = vld [vmem:[#allocation5 + $0x564] sm:$0xf0] }
  0x64   :  { %1748 = vmatpush.bf16.msrb.mxu3 %v7011_v11  ;;  %1723 = vmatpush.bf16.msrb.mxu1 %v6467_v20  ;;  %v9148_v57 = vld [vmem:[#allocation5 + $0x4] sm:$0xf]  ;;  %v6883_v0 = vor.u32 %v9348_v54, %v6880_v55  ;;  %v6822_v11 = vld [vmem:[#allocation5 + $0x5c8] sm:$0xf]  ;;  %v6567_v20 = vor.u32 %v9273_v10, %v6566_v6 }
  0x65   :  { %v6080_v58 = vld [vmem:[#allocation5 + $0x20] sm:$0xf0]  ;;  %v7014_v42 = vld [vmem:[#allocation5 + $0x748] sm:$0xf] }
  0x66   :  { %1736 = vmatpush.bf16.msrb.mxu2 %v6723_v21  ;;  %1711 = vmatpush.bf16.msrb.mxu0 %v6179_v32  ;;  %v9212_v61 = vld [vmem:[#allocation5 + $0x204] sm:$0xf]  ;;  %v6083_v7 = vor.u32 %v9148_v57, %v6080_v58  ;;  %v6823_v21 = vor.u32 %v9337_v12, %v6822_v11  ;;  %v6279_v32 = vor.u32 %v9201_v23, %v6278_v22  ;;  %v9385_v43 = vld [vmem:[#allocation5 + $0x764] sm:$0xf0] }
  0x67   :  { %v6336_v62 = vld [vmem:[#allocation5 + $0x220] sm:$0xf0]  ;;  %v6214_v47 = vld [vmem:[#allocation5 + $0x108] sm:$0xf] }
  0x68   :  { %1749 = vmatpush.bf16.msrb.mxu3 %v6979_v26  ;;  %1724 = vmatpush.bf16.msrb.mxu1 %v6435_v33  ;;  %v9276_v63 = vld [vmem:[#allocation5 + $0x404] sm:$0xf]  ;;  %v6339_v13 = vor.u32 %v9212_v61, %v6336_v62  ;;  %v7079_v26 = vor.u32 %v9401_v17, %v7078_v16  ;;  %v6535_v33 = vor.u32 %v9265_v27, %v6534_v24  ;;  %v9185_v48 = vld [vmem:[#allocation5 + $0x124] sm:$0xf0] }
  0x69   :  { %v6592_v1 = vld [vmem:[#allocation5 + $0x420] sm:$0xf0]  ;;  %v6470_v49 = vld [vmem:[#allocation5 + $0x308] sm:$0xf] }
  0x6a   :  { %1737 = vmatpush.bf16.msrb.mxu2 %v6691_v34  ;;  %1712 = vmatpush.bf16.msrb.mxu0 %v6147_v44  ;;  %v9340_v2 = vld [vmem:[#allocation5 + $0x604] sm:$0xf]  ;;  %v6595_v14 = vor.u32 %v9276_v63, %v6592_v1  ;;  %v6791_v34 = vor.u32 %v9329_v29, %v6790_v28  ;;  %v6247_v44 = vor.u32 %v9193_v36, %v6246_v35  ;;  %v9249_v51 = vld [vmem:[#allocation5 + $0x324] sm:$0xf0] }
  0x6b   :  { %v6848_v3 = vld [vmem:[#allocation5 + $0x620] sm:$0xf0]  ;;  %v6726_v52 = vld [vmem:[#allocation5 + $0x508] sm:$0xf]  ;;  %v6471_v57 = vor.u32 %v9249_v51, %v6470_v49  ;;  %v9333_v49 = vld [vmem:[#allocation5 + $0x5cc] sm:$0xf] }
  0x6c   :  { %1750 = vmatpush.bf16.msrb.mxu3 %v6947_v38  ;;  %1725 = vmatpush.bf16.msrb.mxu1 %v6403_v45  ;;  %v6851_v18 = vor.u32 %v9340_v2, %v6848_v3  ;;  %v7047_v38 = vor.u32 %v9393_v31, %v7046_v30  ;;  %v6503_v45 = vor.u32 %v9257_v39, %v6502_v37  ;;  %v9313_v53 = vld [vmem:[#allocation5 + $0x524] sm:$0xf0] }
  0x6d   :  { %v6982_v54 = vld [vmem:[#allocation5 + $0x708] sm:$0xf]  ;;  %v6727_v58 = vor.u32 %v9313_v53, %v6726_v52  ;;  %v9397_v53 = vld [vmem:[#allocation5 + $0x7cc] sm:$0xf] }
  0x6e   :  { %1738 = vmatpush.bf16.msrb.mxu2 %v6659_v46  ;;  %1713 = vmatpush.bf16.msrb.mxu0 %v6115_v56  ;;  %v6759_v46 = vor.u32 %v9321_v41, %v6758_v40  ;;  %v9377_v55 = vld [vmem:[#allocation5 + $0x724] sm:$0xf0]  ;;  %v6215_v56 = vor.u32 %v9185_v48, %v6214_v47  ;;  %v6568_v48 = vld [vmem:[#allocation5 + $0x3e8] sm:$0xf0] }
  0x6f   :  { %v6438_v61 = vld [vmem:[#allocation5 + $0x2c8] sm:$0xf]  ;;  %v6983_v62 = vor.u32 %v9377_v55, %v6982_v54  ;;  %v7080_v54 = vld [vmem:[#allocation5 + $0x7e8] sm:$0xf0] }
  0x70   :  { %1751 = vmatpush.bf16.msrb.mxu3 %v6915_v50  ;;  %1726 = vmatpush.bf16.msrb.mxu1 %v6371_v59  ;;  %v7015_v50 = vor.u32 %v9385_v43, %v7014_v42  ;;  %v6182_v59 = vld [vmem:[#allocation5 + $0xc8] sm:$0xf] }
  0x71   :  { %v9241_v63 = vld [vmem:[#allocation5 + $0x2e4] sm:$0xf0] }
  0x72   :  { %1739 = vmatpush.bf16.msrb.mxu2 %v6627_v60  ;;  %1714 = vmatpush.bf16.msrb.mxu0 %v6083_v7  ;;  %v9177_v60 = vld [vmem:[#allocation5 + $0xe4] sm:$0xf0]  ;;  %v6439_v5 = vor.u32 %v9241_v63, %v6438_v61  ;;  %v9261_v61 = vld [vmem:[#allocation5 + $0x38c] sm:$0xf] }
  0x73   :  { %v9305_v1 = vld [vmem:[#allocation5 + $0x4e4] sm:$0xf0]  ;;  %v6183_v4 = vor.u32 %v9177_v60, %v6182_v59  ;;  %v9197_v59 = vld [vmem:[#allocation5 + $0x18c] sm:$0xf] }
  0x74   :  { %1752 = vmatpush.bf16.msrb.mxu3 %v6883_v0  ;;  %1727 = vmatpush.bf16.msrb.mxu1 %v6339_v13  ;;  %v6694_v0 = vld [vmem:[#allocation5 + $0x4c8] sm:$0xf]  ;;  %v6280_v60 = vld [vmem:[#allocation5 + $0x1a8] sm:$0xf0] }
  0x75   :  { %1715 = vmatmul.bf16.vlgmr.msrb.gmra.mxu0 %v10135_v9  ;;  %v6950_v2 = vld [vmem:[#allocation5 + $0x6c8] sm:$0xf]  ;;  %v6695_v6 = vor.u32 %v9305_v1, %v6694_v0  ;;  %v6536_v63 = vld [vmem:[#allocation5 + $0x3a8] sm:$0xf0] }
  0x76   :  { %1740 = vmatpush.bf16.msrb.mxu2 %v6595_v14  ;;  %1759 = vmatpush.bf16.msra.mxu0 %v6311_v19  ;;  %v9369_v3 = vld [vmem:[#allocation5 + $0x6e4] sm:$0xf0]  ;;  %v9325_v0 = vld [vmem:[#allocation5 + $0x58c] sm:$0xf] }
  0x77   :  { %1728 = vmatmul.bf16.vlgmr.msrb.gmra.mxu1 %v10142_v25  ;;  %v6150_v7 = vld [vmem:[#allocation5 + $0x88] sm:$0xf]  ;;  %v6951_v12 = vor.u32 %v9369_v3, %v6950_v2  ;;  %v6792_v1 = vld [vmem:[#allocation5 + $0x5a8] sm:$0xf0] }
  0x78   :  { %1753 = vmatpush.bf16.msrb.mxu3 %v6851_v18  ;;  %1772 = vmatpush.bf16.msra.mxu1 %v6567_v20  ;;  %v9169_v10 = vld [vmem:[#allocation5 + $0xa4] sm:$0xf0]  ;;  %v9389_v2 = vld [vmem:[#allocation5 + $0x78c] sm:$0xf] }
  0x79   :  { %1741 = vmatmul.bf16.vlgmr.msrb.gmra.mxu2 %v10133_v8  ;;  %v6406_v11 = vld [vmem:[#allocation5 + $0x288] sm:$0xf]  ;;  %v6151_v19 = vor.u32 %v9169_v10, %v6150_v7  ;;  %v7048_v3 = vld [vmem:[#allocation5 + $0x7a8] sm:$0xf0] }
  0x7a   :  { %1785 = vmatpush.bf16.msra.mxu2 %v6823_v21  ;;  %1760 = vmatpush.bf16.msra.mxu0 %v6279_v32  ;;  %v9233_v13 = vld [vmem:[#allocation5 + $0x2a4] sm:$0xf0]  ;;  %v9189_v7 = vld [vmem:[#allocation5 + $0x14c] sm:$0xf] }
  0x7b   :  { %1754 = vmatmul.bf16.vlgmr.msrb.gmra.mxu3 %v10137_v15  ;;  %v6662_v14 = vld [vmem:[#allocation5 + $0x488] sm:$0xf]  ;;  %v6407_v20 = vor.u32 %v9233_v13, %v6406_v11  ;;  %v6248_v10 = vld [vmem:[#allocation5 + $0x168] sm:$0xf0] }
  0x7c   :  { %1798 = vmatpush.bf16.msra.mxu3 %v7079_v26  ;;  %1773 = vmatpush.bf16.msra.mxu1 %v6535_v33  ;;  %v9297_v16 = vld [vmem:[#allocation5 + $0x4a4] sm:$0xf0]  ;;  %v9253_v11 = vld [vmem:[#allocation5 + $0x34c] sm:$0xf] }
  0x7d   :  { %v6918_v17 = vld [vmem:[#allocation5 + $0x688] sm:$0xf]  ;;  %v6663_v21 = vor.u32 %v9297_v16, %v6662_v14  ;;  %v6504_v13 = vld [vmem:[#allocation5 + $0x368] sm:$0xf0] }
  0x7e   :  { %1786 = vmatpush.bf16.msra.mxu2 %v6791_v34  ;;  %1761 = vmatpush.bf16.msra.mxu0 %v6247_v44  ;;  %v9361_v18 = vld [vmem:[#allocation5 + $0x6a4] sm:$0xf0]  ;;  %v9205_v44 = vld [vmem:[#allocation5 + $0x1cc] sm:$0xf] }
  0x7f   :  { %v6118_v22 = vld [vmem:[#allocation5 + $0x48] sm:$0xf]  ;;  %v6919_v26 = vor.u32 %v9361_v18, %v6918_v17  ;;  %v9317_v14 = vld [vmem:[#allocation5 + $0x54c] sm:$0xf] }
  0x80   :  { %1799 = vmatpush.bf16.msra.mxu3 %v7047_v38  ;;  %1774 = vmatpush.bf16.msra.mxu1 %v6503_v45  ;;  %v9161_v23 = vld [vmem:[#allocation5 + $0x64] sm:$0xf0]  ;;  %v6312_v45 = vld [vmem:[#allocation5 + $0x1e8] sm:$0xf0] }
  0x81   :  { %v6374_v24 = vld [vmem:[#allocation5 + $0x248] sm:$0xf]  ;;  %v6119_v32 = vor.u32 %v9161_v23, %v6118_v22  ;;  %v6760_v16 = vld [vmem:[#allocation5 + $0x568] sm:$0xf0] }
  0x82   :  { %1787 = vmatpush.bf16.msra.mxu2 %v6759_v46  ;;  %1762 = vmatpush.bf16.msra.mxu0 %v6215_v56  ;;  %v9225_v27 = vld [vmem:[#allocation5 + $0x264] sm:$0xf0]  ;;  %v9269_v46 = vld [vmem:[#allocation5 + $0x3cc] sm:$0xf]  ;;  %v6315_v56 = vor.u32 %v9205_v44, %v6312_v45 }
  0x83   :  { %v6630_v28 = vld [vmem:[#allocation5 + $0x448] sm:$0xf]  ;;  %v6375_v35 = vor.u32 %v9225_v27, %v6374_v24  ;;  %v9381_v17 = vld [vmem:[#allocation5 + $0x74c] sm:$0xf] }
  0x84   :  { %1800 = vmatpush.bf16.msra.mxu3 %v7015_v50  ;;  %1775 = vmatpush.bf16.msra.mxu1 %v6471_v57  ;;  %v9289_v29 = vld [vmem:[#allocation5 + $0x464] sm:$0xf0]  ;;  %v6824_v50 = vld [vmem:[#allocation5 + $0x5e8] sm:$0xf0]  ;;  %v6571_v57 = vor.u32 %v9269_v46, %v6568_v48 }
  0x85   :  { %v6886_v30 = vld [vmem:[#allocation5 + $0x648] sm:$0xf]  ;;  %v6631_v36 = vor.u32 %v9289_v29, %v6630_v28  ;;  %v7016_v18 = vld [vmem:[#allocation5 + $0x768] sm:$0xf0] }
  0x86   :  { %1788 = vmatpush.bf16.msra.mxu2 %v6727_v58  ;;  %1763 = vmatpush.bf16.msra.mxu0 %v6183_v4  ;;  %v9353_v31 = vld [vmem:[#allocation5 + $0x664] sm:$0xf0]  ;;  %v6827_v58 = vor.u32 %v9333_v49, %v6824_v50  ;;  %v6283_v4 = vor.u32 %v9197_v59, %v6280_v60  ;;  %v9181_v22 = vld [vmem:[#allocation5 + $0x10c] sm:$0xf] }
  0x87   :  { %v6086_v33 = vld [vmem:[#allocation5 + $0x8] sm:$0xf]  ;;  %v6887_v40 = vor.u32 %v9353_v31, %v6886_v30  ;;  %v6216_v23 = vld [vmem:[#allocation5 + $0x128] sm:$0xf0] }
  0x88   :  { %1801 = vmatpush.bf16.msra.mxu3 %v6983_v62  ;;  %1776 = vmatpush.bf16.msra.mxu1 %v6439_v5  ;;  %v9153_v34 = vld [vmem:[#allocation5 + $0x24] sm:$0xf0]  ;;  %v7083_v62 = vor.u32 %v9397_v53, %v7080_v54  ;;  %v6539_v5 = vor.u32 %v9261_v61, %v6536_v63  ;;  %v9245_v24 = vld [vmem:[#allocation5 + $0x30c] sm:$0xf] }
  0x89   :  { %v6342_v37 = vld [vmem:[#allocation5 + $0x208] sm:$0xf]  ;;  %v6087_v47 = vor.u32 %v9153_v34, %v6086_v33  ;;  %v6472_v27 = vld [vmem:[#allocation5 + $0x328] sm:$0xf0] }
  0x8a   :  { %1789 = vmatpush.bf16.msra.mxu2 %v6695_v6  ;;  %1764 = vmatpush.bf16.msra.mxu0 %v6151_v19  ;;  %v9217_v38 = vld [vmem:[#allocation5 + $0x224] sm:$0xf0]  ;;  %v6795_v6 = vor.u32 %v9325_v0, %v6792_v1  ;;  %v6251_v19 = vor.u32 %v9189_v7, %v6248_v10  ;;  %v9309_v28 = vld [vmem:[#allocation5 + $0x50c] sm:$0xf]  ;;  %v6475_v33 = vor.u32 %v9245_v24, %v6472_v27  ;;  %v6830_v24 = vld [vmem:[#allocation5 + $0x5d0] sm:$0xf] }
  0x8b   :  { %v6598_v39 = vld [vmem:[#allocation5 + $0x408] sm:$0xf]  ;;  %v6343_v51 = vor.u32 %v9217_v38, %v6342_v37  ;;  %v6728_v29 = vld [vmem:[#allocation5 + $0x528] sm:$0xf0] }
  0x8c   :  { %1802 = vmatpush.bf16.msra.mxu3 %v6951_v12  ;;  %1777 = vmatpush.bf16.msra.mxu1 %v6407_v20  ;;  %v9281_v41 = vld [vmem:[#allocation5 + $0x424] sm:$0xf0]  ;;  %v7051_v12 = vor.u32 %v9389_v2, %v7048_v3  ;;  %v6507_v20 = vor.u32 %v9253_v11, %v6504_v13  ;;  %v9373_v30 = vld [vmem:[#allocation5 + $0x70c] sm:$0xf]  ;;  %v6731_v34 = vor.u32 %v9309_v28, %v6728_v29  ;;  %v7086_v29 = vld [vmem:[#allocation5 + $0x7d0] sm:$0xf] }
  0x8d   :  { %v6854_v42 = vld [vmem:[#allocation5 + $0x608] sm:$0xf]  ;;  %v6599_v52 = vor.u32 %v9281_v41, %v6598_v39  ;;  %v6984_v31 = vld [vmem:[#allocation5 + $0x728] sm:$0xf0] }
  0x8e   :  { %1790 = vmatpush.bf16.msra.mxu2 %v6663_v21  ;;  %v9345_v43 = vld [vmem:[#allocation5 + $0x624] sm:$0xf0]  ;;  %1765 = vmatpush.bf16.msra.mxu0 %v6119_v32  ;;  %v6763_v21 = vor.u32 %v9317_v14, %v6760_v16  ;;  %v6219_v32 = vor.u32 %v9181_v22, %v6216_v23  ;;  %v9237_v37 = vld [vmem:[#allocation5 + $0x2cc] sm:$0xf]  ;;  %v6987_v38 = vor.u32 %v9373_v30, %v6984_v31  ;;  %v9274_v23 = vld [vmem:[#allocation5 + $0x3ec] sm:$0xf0] }
  0x8f   :  { %v6855_v55 = vor.u32 %v9345_v43, %v6854_v42  ;;  %v6440_v39 = vld [vmem:[#allocation5 + $0x2e8] sm:$0xf0]  ;;  %v9402_v30 = vld [vmem:[#allocation5 + $0x7ec] sm:$0xf0] }
  0x90   :  { %1803 = vmatpush.bf16.msra.mxu3 %v6919_v26  ;;  %1778 = vmatpush.bf16.msra.mxu1 %v6375_v35  ;;  %v7019_v26 = vor.u32 %v9381_v17, %v7016_v18  ;;  %v9173_v35 = vld [vmem:[#allocation5 + $0xcc] sm:$0xf]  ;;  %v6443_v45 = vor.u32 %v9237_v37, %v6440_v39  ;;  %v6542_v37 = vld [vmem:[#allocation5 + $0x390] sm:$0xf] }
  0x91   :  { %v6696_v41 = vld [vmem:[#allocation5 + $0x4e8] sm:$0xf0]  ;;  %v9266_v39 = vld [vmem:[#allocation5 + $0x3ac] sm:$0xf0] }
  0x92   :  { %1791 = vmatpush.bf16.msra.mxu2 %v6631_v36  ;;  %1766 = vmatpush.bf16.msra.mxu0 %v6087_v47  ;;  %v6184_v36 = vld [vmem:[#allocation5 + $0xe8] sm:$0xf0] }
  0x93   :  { %v9365_v42 = vld [vmem:[#allocation5 + $0x6cc] sm:$0xf]  ;;  %v6187_v44 = vor.u32 %v9173_v35, %v6184_v36  ;;  %v6286_v35 = vld [vmem:[#allocation5 + $0x190] sm:$0xf] }
  0x94   :  { %1804 = vmatpush.bf16.msra.mxu3 %v6887_v40  ;;  %1779 = vmatpush.bf16.msra.mxu1 %v6343_v51  ;;  %v9301_v40 = vld [vmem:[#allocation5 + $0x4cc] sm:$0xf]  ;;  %v9202_v36 = vld [vmem:[#allocation5 + $0x1ac] sm:$0xf0] }
  0x95   :  { %1767 = vmatmul.bf16.vlgmr.msra.gmra.mxu0 %v10135_v9  ;;  %v6952_v43 = vld [vmem:[#allocation5 + $0x6e8] sm:$0xf0]  ;;  %v6699_v46 = vor.u32 %v9301_v40, %v6696_v41  ;;  %v6798_v40 = vld [vmem:[#allocation5 + $0x590] sm:$0xf] }
  0x96   :  { %1792 = vmatpush.bf16.msra.mxu2 %v6599_v52  ;;  %1811 = vmatpush.bf16.msrb.mxu0 %v6315_v56  ;;  %v9165_v47 = vld [vmem:[#allocation5 + $0x8c] sm:$0xf]  ;;  %v6955_v50 = vor.u32 %v9365_v42, %v6952_v43  ;;  %v9330_v41 = vld [vmem:[#allocation5 + $0x5ac] sm:$0xf0] }
  0x97   :  { %1780 = vmatmul.bf16.vlgmr.msra.gmra.mxu1 %v10142_v25  ;;  %v6152_v48 = vld [vmem:[#allocation5 + $0xa8] sm:$0xf0]  ;;  %v7054_v42 = vld [vmem:[#allocation5 + $0x790] sm:$0xf] }
  0x98   :  { %1805 = vmatpush.bf16.msra.mxu3 %v6855_v55  ;;  %1824 = vmatpush.bf16.msrb.mxu1 %v6571_v57  ;;  %v9229_v49 = vld [vmem:[#allocation5 + $0x28c] sm:$0xf]  ;;  %v6155_v56 = vor.u32 %v9165_v47, %v6152_v48  ;;  %v9394_v43 = vld [vmem:[#allocation5 + $0x7ac] sm:$0xf0] }
  0x99   :  { %1793 = vmatmul.bf16.vlgmr.msra.gmra.mxu2 %v10133_v8  ;;  %v6408_v51 = vld [vmem:[#allocation5 + $0x2a8] sm:$0xf0]  ;;  %v6254_v47 = vld [vmem:[#allocation5 + $0x150] sm:$0xf] }
  0x9a   :  { %1837 = vmatpush.bf16.msrb.mxu2 %v6827_v58  ;;  %1812 = vmatpush.bf16.msrb.mxu0 %v6283_v4  ;;  %v9293_v52 = vld [vmem:[#allocation5 + $0x48c] sm:$0xf]  ;;  %v6411_v57 = vor.u32 %v9229_v49, %v6408_v51  ;;  %v9194_v48 = vld [vmem:[#allocation5 + $0x16c] sm:$0xf0] }
  0x9b   :  { %1806 = vmatmul.bf16.vlgmr.msra.gmra.mxu3 %v10137_v15  ;;  %v6664_v53 = vld [vmem:[#allocation5 + $0x4a8] sm:$0xf0]  ;;  %v6510_v49 = vld [vmem:[#allocation5 + $0x350] sm:$0xf] }
  0x9c   :  { %1850 = vmatpush.bf16.msrb.mxu3 %v7083_v62  ;;  %1825 = vmatpush.bf16.msrb.mxu1 %v6539_v5  ;;  %v9357_v54 = vld [vmem:[#allocation5 + $0x68c] sm:$0xf]  ;;  %v6667_v58 = vor.u32 %v9293_v52, %v6664_v53  ;;  %v9258_v51 = vld [vmem:[#allocation5 + $0x36c] sm:$0xf0] }
  0x9d   :  { %v6920_v55 = vld [vmem:[#allocation5 + $0x6a8] sm:$0xf0]  ;;  %v6766_v52 = vld [vmem:[#allocation5 + $0x550] sm:$0xf] }
  0x9e   :  { %1838 = vmatpush.bf16.msrb.mxu2 %v6795_v6  ;;  %1813 = vmatpush.bf16.msrb.mxu0 %v6251_v19  ;;  %v9157_v59 = vld [vmem:[#allocation5 + $0x4c] sm:$0xf]  ;;  %v6923_v62 = vor.u32 %v9357_v54, %v6920_v55  ;;  %v6318_v19 = vld [vmem:[#allocation5 + $0x1d0] sm:$0xf] }
  0x9f   :  { %v6120_v60 = vld [vmem:[#allocation5 + $0x68] sm:$0xf0]  ;;  %v9322_v53 = vld [vmem:[#allocation5 + $0x56c] sm:$0xf0] }
  0xa0   :  { %1851 = vmatpush.bf16.msrb.mxu3 %v7051_v12  ;;  %1826 = vmatpush.bf16.msrb.mxu1 %v6507_v20  ;;  %v9221_v61 = vld [vmem:[#allocation5 + $0x24c] sm:$0xf]  ;;  %v6123_v4 = vor.u32 %v9157_v59, %v6120_v60  ;;  %v9210_v20 = vld [vmem:[#allocation5 + $0x1ec] sm:$0xf0] }
  0xa1   :  { %v6376_v63 = vld [vmem:[#allocation5 + $0x268] sm:$0xf0]  ;;  %v7022_v54 = vld [vmem:[#allocation5 + $0x750] sm:$0xf] }
  0xa2   :  { %1839 = vmatpush.bf16.msrb.mxu2 %v6763_v21  ;;  %1814 = vmatpush.bf16.msrb.mxu0 %v6219_v32  ;;  %v9285_v0 = vld [vmem:[#allocation5 + $0x44c] sm:$0xf]  ;;  %v6379_v7 = vor.u32 %v9221_v61, %v6376_v63  ;;  %v6574_v21 = vld [vmem:[#allocation5 + $0x3d0] sm:$0xf]  ;;  %v6319_v32 = vor.u32 %v9210_v20, %v6318_v19 }
  0xa3   :  { %v6632_v1 = vld [vmem:[#allocation5 + $0x468] sm:$0xf0]  ;;  %v9386_v55 = vld [vmem:[#allocation5 + $0x76c] sm:$0xf0] }
  0xa4   :  { %1852 = vmatpush.bf16.msrb.mxu3 %v7019_v26  ;;  %1827 = vmatpush.bf16.msrb.mxu1 %v6475_v33  ;;  %v9349_v2 = vld [vmem:[#allocation5 + $0x64c] sm:$0xf]  ;;  %v6635_v10 = vor.u32 %v9285_v0, %v6632_v1  ;;  %v9338_v26 = vld [vmem:[#allocation5 + $0x5ec] sm:$0xf0]  ;;  %v6575_v33 = vor.u32 %v9274_v23, %v6574_v21 }
  0xa5   :  { %v6888_v3 = vld [vmem:[#allocation5 + $0x668] sm:$0xf0]  ;;  %v6222_v59 = vld [vmem:[#allocation5 + $0x110] sm:$0xf] }
  0xa6   :  { %1840 = vmatpush.bf16.msrb.mxu2 %v6731_v34  ;;  %1815 = vmatpush.bf16.msrb.mxu0 %v6187_v44  ;;  %v9149_v5 = vld [vmem:[#allocation5 + $0xc] sm:$0xf]  ;;  %v6891_v14 = vor.u32 %v9349_v2, %v6888_v3  ;;  %v6831_v34 = vor.u32 %v9338_v26, %v6830_v24  ;;  %v6287_v44 = vor.u32 %v9202_v36, %v6286_v35  ;;  %v9186_v60 = vld [vmem:[#allocation5 + $0x12c] sm:$0xf0] }
  0xa7   :  { %v6088_v6 = vld [vmem:[#allocation5 + $0x28] sm:$0xf0]  ;;  %v6478_v61 = vld [vmem:[#allocation5 + $0x310] sm:$0xf] }
  0xa8   :  { %1853 = vmatpush.bf16.msrb.mxu3 %v6987_v38  ;;  %1828 = vmatpush.bf16.msrb.mxu1 %v6443_v45  ;;  %v9213_v11 = vld [vmem:[#allocation5 + $0x20c] sm:$0xf]  ;;  %v6091_v22 = vor.u32 %v9149_v5, %v6088_v6  ;;  %v7087_v38 = vor.u32 %v9402_v30, %v7086_v29  ;;  %v6543_v45 = vor.u32 %v9266_v39, %v6542_v37  ;;  %v9250_v63 = vld [vmem:[#allocation5 + $0x32c] sm:$0xf0] }
  0xa9   :  { %v6344_v12 = vld [vmem:[#allocation5 + $0x228] sm:$0xf0]  ;;  %v6734_v0 = vld [vmem:[#allocation5 + $0x510] sm:$0xf]  ;;  %v6479_v5 = vor.u32 %v9250_v63, %v6478_v61  ;;  %v9334_v61 = vld [vmem:[#allocation5 + $0x5d4] sm:$0xf] }
  0xaa   :  { %1841 = vmatpush.bf16.msrb.mxu2 %v6699_v46  ;;  %1816 = vmatpush.bf16.msrb.mxu0 %v6155_v56  ;;  %v9277_v13 = vld [vmem:[#allocation5 + $0x40c] sm:$0xf]  ;;  %v6347_v27 = vor.u32 %v9213_v11, %v6344_v12  ;;  %v6799_v46 = vor.u32 %v9330_v41, %v6798_v40  ;;  %v6255_v56 = vor.u32 %v9194_v48, %v6254_v47  ;;  %v9314_v1 = vld [vmem:[#allocation5 + $0x52c] sm:$0xf0] }
  0xab   :  { %v6600_v16 = vld [vmem:[#allocation5 + $0x428] sm:$0xf0]  ;;  %v6990_v2 = vld [vmem:[#allocation5 + $0x710] sm:$0xf]  ;;  %v6735_v6 = vor.u32 %v9314_v1, %v6734_v0  ;;  %v9398_v1 = vld [vmem:[#allocation5 + $0x7d4] sm:$0xf] }
  0xac   :  { %1854 = vmatpush.bf16.msrb.mxu3 %v6955_v50  ;;  %1829 = vmatpush.bf16.msrb.mxu1 %v6411_v57  ;;  %v9341_v17 = vld [vmem:[#allocation5 + $0x60c] sm:$0xf]  ;;  %v6603_v28 = vor.u32 %v9277_v13, %v6600_v16  ;;  %v7055_v50 = vor.u32 %v9394_v43, %v7054_v42  ;;  %v6511_v57 = vor.u32 %v9258_v51, %v6510_v49  ;;  %v9378_v3 = vld [vmem:[#allocation5 + $0x72c] sm:$0xf0] }
  0xad   :  { %v6856_v18 = vld [vmem:[#allocation5 + $0x628] sm:$0xf0]  ;;  %v6446_v11 = vld [vmem:[#allocation5 + $0x2d0] sm:$0xf]  ;;  %v6991_v12 = vor.u32 %v9378_v3, %v6990_v2  ;;  %v7088_v2 = vld [vmem:[#allocation5 + $0x7f0] sm:$0xf0] }
  0xae   :  { %1842 = vmatpush.bf16.msrb.mxu2 %v6667_v58  ;;  %1817 = vmatpush.bf16.msrb.mxu0 %v6123_v4  ;;  %v6859_v31 = vor.u32 %v9341_v17, %v6856_v18  ;;  %v6767_v58 = vor.u32 %v9322_v53, %v6766_v52  ;;  %v6223_v4 = vor.u32 %v9186_v60, %v6222_v59  ;;  %v9242_v13 = vld [vmem:[#allocation5 + $0x2ec] sm:$0xf0]  ;;  %v6576_v60 = vld [vmem:[#allocation5 + $0x3f0] sm:$0xf0] }
  0xaf   :  { %v9306_v16 = vld [vmem:[#allocation5 + $0x4ec] sm:$0xf0]  ;;  %v6447_v20 = vor.u32 %v9242_v13, %v6446_v11  ;;  %v9262_v11 = vld [vmem:[#allocation5 + $0x394] sm:$0xf] }
  0xb0   :  { %1855 = vmatpush.bf16.msrb.mxu3 %v6923_v62  ;;  %1830 = vmatpush.bf16.msrb.mxu1 %v6379_v7  ;;  %v7023_v62 = vor.u32 %v9386_v55, %v7022_v54  ;;  %v6190_v7 = vld [vmem:[#allocation5 + $0xd0] sm:$0xf]  ;;  %v6544_v13 = vld [vmem:[#allocation5 + $0x3b0] sm:$0xf0] }
  0xb1   :  { %v6958_v17 = vld [vmem:[#allocation5 + $0x6d0] sm:$0xf] }
  0xb2   :  { %1843 = vmatpush.bf16.msrb.mxu2 %v6635_v10  ;;  %1818 = vmatpush.bf16.msrb.mxu0 %v6091_v22  ;;  %v9178_v10 = vld [vmem:[#allocation5 + $0xec] sm:$0xf0] }
  0xb3   :  { %v9370_v18 = vld [vmem:[#allocation5 + $0x6ec] sm:$0xf0]  ;;  %v6191_v19 = vor.u32 %v9178_v10, %v6190_v7  ;;  %v9198_v7 = vld [vmem:[#allocation5 + $0x194] sm:$0xf] }
  0xb4   :  { %1856 = vmatpush.bf16.msrb.mxu3 %v6891_v14  ;;  %1831 = vmatpush.bf16.msrb.mxu1 %v6347_v27  ;;  %v6702_v14 = vld [vmem:[#allocation5 + $0x4d0] sm:$0xf]  ;;  %v6959_v26 = vor.u32 %v9370_v18, %v6958_v17  ;;  %v6288_v10 = vld [vmem:[#allocation5 + $0x1b0] sm:$0xf0] }
  0xb5   :  { %1819 = vmatmul.bf16.vlgmr.msrb.gmra.mxu0 %v10135_v9  ;;  %v6703_v21 = vor.u32 %v9306_v16, %v6702_v14  ;;  %v6158_v22 = vld [vmem:[#allocation5 + $0x90] sm:$0xf]  ;;  %v9326_v14 = vld [vmem:[#allocation5 + $0x594] sm:$0xf] }
  0xb6   :  { %1844 = vmatpush.bf16.msrb.mxu2 %v6603_v28  ;;  %1863 = vmatpush.bf16.msra.mxu0 %v6319_v32  ;;  %v9170_v23 = vld [vmem:[#allocation5 + $0xac] sm:$0xf0]  ;;  %v6800_v16 = vld [vmem:[#allocation5 + $0x5b0] sm:$0xf0] }
  0xb7   :  { %1832 = vmatmul.bf16.vlgmr.msrb.gmra.mxu1 %v10142_v25  ;;  %v6414_v24 = vld [vmem:[#allocation5 + $0x290] sm:$0xf]  ;;  %v6159_v32 = vor.u32 %v9170_v23, %v6158_v22  ;;  %v9390_v17 = vld [vmem:[#allocation5 + $0x794] sm:$0xf] }
  0xb8   :  { %1857 = vmatpush.bf16.msrb.mxu3 %v6859_v31  ;;  %1876 = vmatpush.bf16.msra.mxu1 %v6575_v33  ;;  %v9234_v27 = vld [vmem:[#allocation5 + $0x2ac] sm:$0xf0]  ;;  %v7056_v18 = vld [vmem:[#allocation5 + $0x7b0] sm:$0xf0] }
  0xb9   :  { %1845 = vmatmul.bf16.vlgmr.msrb.gmra.mxu2 %v10133_v8  ;;  %v6670_v28 = vld [vmem:[#allocation5 + $0x490] sm:$0xf]  ;;  %v6415_v33 = vor.u32 %v9234_v27, %v6414_v24  ;;  %v9190_v22 = vld [vmem:[#allocation5 + $0x154] sm:$0xf] }
  0xba   :  { %1889 = vmatpush.bf16.msra.mxu2 %v6831_v34  ;;  %1864 = vmatpush.bf16.msra.mxu0 %v6287_v44  ;;  %v9298_v29 = vld [vmem:[#allocation5 + $0x4ac] sm:$0xf0]  ;;  %v6256_v23 = vld [vmem:[#allocation5 + $0x170] sm:$0xf0] }
  0xbb   :  { %1858 = vmatmul.bf16.vlgmr.msrb.gmra.mxu3 %v10137_v15  ;;  %v6926_v30 = vld [vmem:[#allocation5 + $0x690] sm:$0xf]  ;;  %v6671_v34 = vor.u32 %v9298_v29, %v6670_v28  ;;  %v9254_v24 = vld [vmem:[#allocation5 + $0x354] sm:$0xf] }
  0xbc   :  { %1902 = vmatpush.bf16.msra.mxu3 %v7087_v38  ;;  %1877 = vmatpush.bf16.msra.mxu1 %v6543_v45  ;;  %v9362_v31 = vld [vmem:[#allocation5 + $0x6ac] sm:$0xf0]  ;;  %v6512_v27 = vld [vmem:[#allocation5 + $0x370] sm:$0xf0] }
  0xbd   :  { %v6126_v35 = vld [vmem:[#allocation5 + $0x50] sm:$0xf]  ;;  %v6927_v38 = vor.u32 %v9362_v31, %v6926_v30  ;;  %v9318_v28 = vld [vmem:[#allocation5 + $0x554] sm:$0xf] }
  0xbe   :  { %1890 = vmatpush.bf16.msra.mxu2 %v6799_v46  ;;  %1865 = vmatpush.bf16.msra.mxu0 %v6255_v56  ;;  %v9162_v36 = vld [vmem:[#allocation5 + $0x6c] sm:$0xf0]  ;;  %v9206_v56 = vld [vmem:[#allocation5 + $0x1d4] sm:$0xf] }
  0xbf   :  { %v6382_v37 = vld [vmem:[#allocation5 + $0x250] sm:$0xf]  ;;  %v6127_v44 = vor.u32 %v9162_v36, %v6126_v35  ;;  %v6768_v29 = vld [vmem:[#allocation5 + $0x570] sm:$0xf0] }
  0xc0   :  { %1903 = vmatpush.bf16.msra.mxu3 %v7055_v50  ;;  %1878 = vmatpush.bf16.msra.mxu1 %v6511_v57  ;;  %v9226_v39 = vld [vmem:[#allocation5 + $0x26c] sm:$0xf0]  ;;  %v6320_v57 = vld [vmem:[#allocation5 + $0x1f0] sm:$0xf0]  ;;  %v6771_v35 = vor.u32 %v9318_v28, %v6768_v29 }
  0xc1   :  { %v6638_v40 = vld [vmem:[#allocation5 + $0x450] sm:$0xf]  ;;  %v6383_v47 = vor.u32 %v9226_v39, %v6382_v37  ;;  %v9382_v30 = vld [vmem:[#allocation5 + $0x754] sm:$0xf] }
  0xc2   :  { %1891 = vmatpush.bf16.msra.mxu2 %v6767_v58  ;;  %1866 = vmatpush.bf16.msra.mxu0 %v6223_v4  ;;  %v9290_v41 = vld [vmem:[#allocation5 + $0x46c] sm:$0xf0]  ;;  %v9270_v58 = vld [vmem:[#allocation5 + $0x3d4] sm:$0xf]  ;;  %v6323_v4 = vor.u32 %v9206_v56, %v6320_v57 }
  0xc3   :  { %v6894_v42 = vld [vmem:[#allocation5 + $0x650] sm:$0xf]  ;;  %v6639_v48 = vor.u32 %v9290_v41, %v6638_v40  ;;  %v7024_v31 = vld [vmem:[#allocation5 + $0x770] sm:$0xf0] }
  0xc4   :  { %1904 = vmatpush.bf16.msra.mxu3 %v7023_v62  ;;  %1879 = vmatpush.bf16.msra.mxu1 %v6479_v5  ;;  %v9354_v43 = vld [vmem:[#allocation5 + $0x66c] sm:$0xf0]  ;;  %v6832_v62 = vld [vmem:[#allocation5 + $0x5f0] sm:$0xf0]  ;;  %v6579_v5 = vor.u32 %v9270_v58, %v6576_v60  ;;  %v7027_v39 = vor.u32 %v9382_v30, %v7024_v31 }
  0xc5   :  { %v6094_v45 = vld [vmem:[#allocation5 + $0x10] sm:$0xf]  ;;  %v6895_v52 = vor.u32 %v9354_v43, %v6894_v42  ;;  %v6224_v36 = vld [vmem:[#allocation5 + $0x130] sm:$0xf0]  ;;  %v10161_v42 = vld [vmem:[#allocation7] sm:$0xff] }
  0xc6   :  { %1892 = vmatpush.bf16.msra.mxu2 %v6735_v6  ;;  %1867 = vmatpush.bf16.msra.mxu0 %v6191_v19  ;;  %v9154_v46 = vld [vmem:[#allocation5 + $0x2c] sm:$0xf0]  ;;  %v6835_v6 = vor.u32 %v9334_v61, %v6832_v62  ;;  %v6291_v19 = vor.u32 %v9198_v7, %v6288_v10  ;;  %v9246_v37 = vld [vmem:[#allocation5 + $0x314] sm:$0xf] }
  0xc7   :  { %v6350_v49 = vld [vmem:[#allocation5 + $0x210] sm:$0xf]  ;;  %v6095_v59 = vor.u32 %v9154_v46, %v6094_v45  ;;  %v9310_v40 = vld [vmem:[#allocation5 + $0x514] sm:$0xf] }
  0xc8   :  { %1905 = vmatpush.bf16.msra.mxu3 %v6991_v12  ;;  %1880 = vmatpush.bf16.msra.mxu1 %v6447_v20  ;;  %v9218_v50 = vld [vmem:[#allocation5 + $0x22c] sm:$0xf0]  ;;  %v7091_v12 = vor.u32 %v9398_v1, %v7088_v2  ;;  %v6547_v20 = vor.u32 %v9262_v11, %v6544_v13  ;;  %v6736_v41 = vld [vmem:[#allocation5 + $0x530] sm:$0xf0] }
  0xc9   :  { %v6606_v51 = vld [vmem:[#allocation5 + $0x410] sm:$0xf]  ;;  %v6351_v63 = vor.u32 %v9218_v50, %v6350_v49  ;;  %v9374_v43 = vld [vmem:[#allocation5 + $0x714] sm:$0xf] }
  0xca   :  { %1893 = vmatpush.bf16.msra.mxu2 %v6703_v21  ;;  %1868 = vmatpush.bf16.msra.mxu0 %v6159_v32  ;;  %v9282_v53 = vld [vmem:[#allocation5 + $0x42c] sm:$0xf0]  ;;  %v6803_v21 = vor.u32 %v9326_v14, %v6800_v16  ;;  %v6259_v32 = vor.u32 %v9190_v22, %v6256_v23  ;;  %v9174_v46 = vld [vmem:[#allocation5 + $0xd4] sm:$0xf] }
  0xcb   :  { %v6862_v54 = vld [vmem:[#allocation5 + $0x610] sm:$0xf]  ;;  %v6607_v0 = vor.u32 %v9282_v53, %v6606_v51  ;;  %v6192_v49 = vld [vmem:[#allocation5 + $0xf0] sm:$0xf0]  ;;  %v359_v51 = vperm.slane %v10161_v42, 0 }
  0xcc   :  { %1906 = vmatpush.bf16.msra.mxu3 %v6959_v26  ;;  %1881 = vmatpush.bf16.msra.mxu1 %v6415_v33  ;;  %v9346_v55 = vld [vmem:[#allocation5 + $0x62c] sm:$0xf0]  ;;  %v7059_v26 = vor.u32 %v9390_v17, %v7056_v18  ;;  %v9182_v33 = vld [vmem:[#allocation5 + $0x114] sm:$0xf]  ;;  %v6195_v58 = vor.u32 %v9174_v46, %v6192_v49  ;;  %v6582_v46 = vld [vmem:[#allocation5 + $0x3d8] sm:$0xf] }
  0xcd   :  { %v6863_v3 = vor.u32 %v9346_v55, %v6862_v54  ;;  %v6227_v45 = vor.u32 %v9182_v33, %v6224_v36  ;;  %v9238_v50 = vld [vmem:[#allocation5 + $0x2d4] sm:$0xf]  ;;  %v6838_v49 = vld [vmem:[#allocation5 + $0x5d8] sm:$0xf] }
  0xce   :  { %1894 = vmatpush.bf16.msra.mxu2 %v6671_v34  ;;  %1869 = vmatpush.bf16.msra.mxu0 %v6127_v44  ;;  %v6515_v34 = vor.u32 %v9254_v24, %v6512_v27  ;;  %v6992_v44 = vld [vmem:[#allocation5 + $0x730] sm:$0xf0] }
  0xcf   :  { %v6448_v53 = vld [vmem:[#allocation5 + $0x2f0] sm:$0xf0] }
  0xd0   :  { %1907 = vmatpush.bf16.msra.mxu3 %v6927_v38  ;;  %1882 = vmatpush.bf16.msra.mxu1 %v6383_v47  ;;  %v6480_v38 = vld [vmem:[#allocation5 + $0x330] sm:$0xf0]  ;;  %v6451_v60 = vor.u32 %v9238_v50, %v6448_v53  ;;  %v9339_v50 = vld [vmem:[#allocation5 + $0x5f4] sm:$0xf0] }
  0xd1   :  { %v6483_v47 = vor.u32 %v9246_v37, %v6480_v38  ;;  %v9302_v54 = vld [vmem:[#allocation5 + $0x4d4] sm:$0xf] }
  0xd2   :  { %1895 = vmatpush.bf16.msra.mxu2 %v6639_v48  ;;  %1870 = vmatpush.bf16.msra.mxu0 %v6095_v59  ;;  %v6739_v48 = vor.u32 %v9310_v40, %v6736_v41  ;;  %v6704_v55 = vld [vmem:[#allocation5 + $0x4f0] sm:$0xf0] }
  0xd3   :  { %v9366_v56 = vld [vmem:[#allocation5 + $0x6d4] sm:$0xf]  ;;  %v6707_v61 = vor.u32 %v9302_v54, %v6704_v55  ;;  %v7094_v54 = vld [vmem:[#allocation5 + $0x7d8] sm:$0xf] }
  0xd4   :  { %1908 = vmatpush.bf16.msra.mxu3 %v6895_v52  ;;  %1883 = vmatpush.bf16.msra.mxu1 %v6351_v63  ;;  %v6995_v52 = vor.u32 %v9374_v43, %v6992_v44  ;;  %v6960_v57 = vld [vmem:[#allocation5 + $0x6f0] sm:$0xf0]  ;;  %v1677_v11 = vpop.f32.mrf.mxu1  ;;  %v6326_v44 = vld [vmem:[#allocation5 + $0x1d8] sm:$0xf] }
  0xd5   :  { %1871 = vmatmul.bf16.vlgmr.msra.gmra.mxu0 %v10135_v9  ;;  %v9166_v62 = vld [vmem:[#allocation5 + $0x94] sm:$0xf]  ;;  %v6963_v2 = vor.u32 %v9366_v56, %v6960_v57  ;;  %v9403_v55 = vld [vmem:[#allocation5 + $0x7f4] sm:$0xf0] }
  0xd6   :  { %1896 = vmatpush.bf16.msra.mxu2 %v6607_v0  ;;  %1915 = vmatpush.bf16.msrb.mxu0 %v6323_v4  ;;  %v1664_v59 = vpop.f32.mrf.mxu0  ;;  %v6160_v63 = vld [vmem:[#allocation5 + $0xb0] sm:$0xf0] }
  0xd7   :  { %1884 = vmatmul.bf16.vlgmr.msra.gmra.mxu1 %v10142_v25  ;;  %v9230_v0 = vld [vmem:[#allocation5 + $0x294] sm:$0xf]  ;;  %v1665_v1 = vadd.f32 %v1664_v59, %v359_v51  ;;  %v6163_v10 = vor.u32 %v9166_v62, %v6160_v63  ;;  %v9203_v62 = vld [vmem:[#allocation5 + $0x1b4] sm:$0xf0] }
  0xd8   :  { %1909 = vmatpush.bf16.msra.mxu3 %v6863_v3  ;;  %1928 = vmatpush.bf16.msrb.mxu1 %v6579_v5  ;;  %v6416_v3 = vld [vmem:[#allocation5 + $0x2b0] sm:$0xf0]  ;;  %v6550_v63 = vld [vmem:[#allocation5 + $0x398] sm:$0xf] }
  0xd9   :  { %1897 = vmatmul.bf16.vlgmr.msra.gmra.mxu2 %v10133_v8  ;;  %v9294_v4 = vld [vmem:[#allocation5 + $0x494] sm:$0xf]  ;;  %v1678_v18 = vadd.f32 %v1677_v11, %v1665_v1  ;;  %v7095_v1 = vor.u32 %v9403_v55, %v7094_v54 }
  0xda   :  { %1941 = vmatpush.bf16.msrb.mxu2 %v6835_v6  ;;  %1916 = vmatpush.bf16.msrb.mxu0 %v6291_v19  ;;  %v6672_v5 = vld [vmem:[#allocation5 + $0x4b0] sm:$0xf0] }
  0xdb   :  { %1910 = vmatmul.bf16.vlgmr.msra.gmra.mxu3 %v10137_v15  ;;  %v9358_v6 = vld [vmem:[#allocation5 + $0x694] sm:$0xf]  ;;  %v6675_v13 = vor.u32 %v9294_v4, %v6672_v5  ;;  %v9331_v4 = vld [vmem:[#allocation5 + $0x5b4] sm:$0xf0] }
  0xdc   :  { %1954 = vmatpush.bf16.msrb.mxu3 %v7091_v12  ;;  %1929 = vmatpush.bf16.msrb.mxu1 %v6547_v20  ;;  %v6928_v7 = vld [vmem:[#allocation5 + $0x6b0] sm:$0xf0]  ;;  %v6419_v12 = vor.u32 %v9230_v0, %v6416_v3  ;;  %v1690_v23 = vpop.f32.mrf.mxu2  ;;  %v1679_v51 = vpop.f32.mrf.mxu1  ;;  %v6806_v3 = vld [vmem:[#allocation5 + $0x598] sm:$0xf] }
  0xdd   :  { %v9158_v14 = vld [vmem:[#allocation5 + $0x54] sm:$0xf]  ;;  %v6931_v19 = vor.u32 %v9358_v6, %v6928_v7  ;;  %v1691_v27 = vadd.f32 %v1690_v23, %v1678_v18  ;;  %v7062_v5 = vld [vmem:[#allocation5 + $0x798] sm:$0xf]  ;;  %v6807_v11 = vor.u32 %v9331_v4, %v6806_v3 }
  0xde   :  { %1942 = vmatpush.bf16.msrb.mxu2 %v6803_v21  ;;  %1917 = vmatpush.bf16.msrb.mxu0 %v6259_v32  ;;  %v6128_v16 = vld [vmem:[#allocation5 + $0x70] sm:$0xf0]  ;;  %v1703_v28 = vpop.f32.mrf.mxu3  ;;  %v1666_v32 = vpop.f32.mrf.mxu0  ;;  %v9395_v6 = vld [vmem:[#allocation5 + $0x7b4] sm:$0xf0] }
  0xdf   :  { %v9222_v17 = vld [vmem:[#allocation5 + $0x254] sm:$0xf]  ;;  %v6131_v29 = vor.u32 %v9158_v14, %v6128_v16  ;;  %v10164_v38 = vadd.f32 %v1703_v28, %v1691_v27  ;;  %v6518_v14 = vld [vmem:[#allocation5 + $0x358] sm:$0xf]  ;;  %v7063_v16 = vor.u32 %v9395_v6, %v7062_v5 }
  0xe0   :  { %1955 = vmatpush.bf16.msrb.mxu3 %v7059_v26  ;;  %1930 = vmatpush.bf16.msrb.mxu1 %v6515_v34  ;;  %v6384_v20 = vld [vmem:[#allocation5 + $0x270] sm:$0xf0]  ;;  %v6774_v18 = vld [vmem:[#allocation5 + $0x558] sm:$0xf] }
  0xe1   :  { %v9286_v21 = vld [vmem:[#allocation5 + $0x454] sm:$0xf]  ;;  %v6387_v33 = vor.u32 %v9222_v17, %v6384_v20  ;;  %v9259_v17 = vld [vmem:[#allocation5 + $0x374] sm:$0xf0]  ;;  %vm2071_vm0 = vcmp.gt.f32.partialorder %v10164_v38, 0.0 }
  0xe2   :  { %1943 = vmatpush.bf16.msrb.mxu2 %v6771_v35  ;;  %1918 = vmatpush.bf16.msrb.mxu0 %v6227_v45  ;;  %v6640_v22 = vld [vmem:[#allocation5 + $0x470] sm:$0xf0]  ;;  %v9211_v45 = vld [vmem:[#allocation5 + $0x1f4] sm:$0xf0] }
  0xe3   :  { %v9350_v24 = vld [vmem:[#allocation5 + $0x654] sm:$0xf]  ;;  %v6643_v34 = vor.u32 %v9286_v21, %v6640_v22  ;;  %v6327_v57 = vor.u32 %v9211_v45, %v6326_v44  ;;  %v7030_v20 = vld [vmem:[#allocation5 + $0x758] sm:$0xf] }
  0xe4   :  { %1956 = vmatpush.bf16.msrb.mxu3 %v7027_v39  ;;  %1931 = vmatpush.bf16.msrb.mxu1 %v6483_v47  ;;  %v6896_v26 = vld [vmem:[#allocation5 + $0x670] sm:$0xf0]  ;;  %v9387_v21 = vld [vmem:[#allocation5 + $0x774] sm:$0xf0] }
  0xe5   :  { %v9150_v30 = vld [vmem:[#allocation5 + $0x14] sm:$0xf]  ;;  %v6899_v39 = vor.u32 %v9350_v24, %v6896_v26  ;;  %v6230_v23 = vld [vmem:[#allocation5 + $0x118] sm:$0xf]  ;;  %v6519_v24 = vor.u32 %v9259_v17, %v6518_v14 }
  0xe6   :  { %1944 = vmatpush.bf16.msrb.mxu2 %v6739_v48  ;;  %1919 = vmatpush.bf16.msrb.mxu0 %v6195_v58  ;;  %v6096_v31 = vld [vmem:[#allocation5 + $0x30] sm:$0xf0]  ;;  %v9275_v48 = vld [vmem:[#allocation5 + $0x3f4] sm:$0xf0]  ;;  %v1692_v58 = vpop.f32.mrf.mxu2  ;;  %v1705_v0 = vpop.f32.mrf.mxu3 }
  0xe7   :  { %v9214_v35 = vld [vmem:[#allocation5 + $0x214] sm:$0xf]  ;;  %v6099_v47 = vor.u32 %v9150_v30, %v6096_v31  ;;  %v6583_v59 = vor.u32 %v9275_v48, %v6582_v46  ;;  %v9187_v27 = vld [vmem:[#allocation5 + $0x134] sm:$0xf0]  ;;  %v7031_v30 = vor.u32 %v9387_v21, %v7030_v20 }
  0xe8   :  { %1957 = vmatpush.bf16.msrb.mxu3 %v6995_v52  ;;  %1932 = vmatpush.bf16.msrb.mxu1 %v6451_v60  ;;  %v6352_v36 = vld [vmem:[#allocation5 + $0x230] sm:$0xf0]  ;;  %v6839_v60 = vor.u32 %v9339_v50, %v6838_v49  ;;  %v6486_v28 = vld [vmem:[#allocation5 + $0x318] sm:$0xf] }
  0xe9   :  { %v9278_v37 = vld [vmem:[#allocation5 + $0x414] sm:$0xf]  ;;  %v6355_v52 = vor.u32 %v9214_v35, %v6352_v36  ;;  %v9251_v31 = vld [vmem:[#allocation5 + $0x334] sm:$0xf0]  ;;  %v6231_v36 = vor.u32 %v9187_v27, %v6230_v23 }
  0xea   :  { %1945 = vmatpush.bf16.msrb.mxu2 %v6707_v61  ;;  %1920 = vmatpush.bf16.msrb.mxu0 %v6163_v10  ;;  %v6608_v40 = vld [vmem:[#allocation5 + $0x430] sm:$0xf0]  ;;  %v6294_v61 = vld [vmem:[#allocation5 + $0x198] sm:$0xf] }
  0xeb   :  { %v9342_v41 = vld [vmem:[#allocation5 + $0x614] sm:$0xf]  ;;  %v6611_v53 = vor.u32 %v9278_v37, %v6608_v40  ;;  %v6295_v7 = vor.u32 %v9203_v62, %v6294_v61  ;;  %v6742_v32 = vld [vmem:[#allocation5 + $0x518] sm:$0xf] }
  0xec   :  { %1958 = vmatpush.bf16.msrb.mxu3 %v6963_v2  ;;  %1933 = vmatpush.bf16.msrb.mxu1 %v6419_v12  ;;  %v6864_v43 = vld [vmem:[#allocation5 + $0x630] sm:$0xf0]  ;;  %v9267_v2 = vld [vmem:[#allocation5 + $0x3b4] sm:$0xf0] }
  0xed   :  { %v6867_v56 = vor.u32 %v9342_v41, %v6864_v43  ;;  %v6551_v10 = vor.u32 %v9267_v2, %v6550_v63  ;;  %v6262_v12 = vld [vmem:[#allocation5 + $0x158] sm:$0xf] }
  0xee   :  { %1946 = vmatpush.bf16.msrb.mxu2 %v6675_v13  ;;  %1921 = vmatpush.bf16.msrb.mxu0 %v6131_v29  ;;  %v9195_v13 = vld [vmem:[#allocation5 + $0x174] sm:$0xf0]  ;;  %v360_v29 = vperm.slane %v10161_v42, 1 }
  0xef   :  { %v6263_v22 = vor.u32 %v9195_v13, %v6262_v12  ;;  %v9379_v35 = vld [vmem:[#allocation5 + $0x734] sm:$0xf0] }
  0xf0   :  { %1959 = vmatpush.bf16.msrb.mxu3 %v6931_v19  ;;  %1934 = vmatpush.bf16.msrb.mxu1 %v6387_v33  ;;  %v9323_v19 = vld [vmem:[#allocation5 + $0x574] sm:$0xf0] }
  0xf1   :  { %v6775_v26 = vor.u32 %v9323_v19, %v6774_v18  ;;  %v9315_v33 = vld [vmem:[#allocation5 + $0x534] sm:$0xf0] }
  0xf2   :  { %1947 = vmatpush.bf16.msrb.mxu2 %v6643_v34  ;;  %1922 = vmatpush.bf16.msrb.mxu0 %v6099_v47  ;;  %v6998_v34 = vld [vmem:[#allocation5 + $0x718] sm:$0xf]  ;;  %v1716_v37 = vpop.f32.mrf.mxu0  ;;  %v6743_v40 = vor.u32 %v9315_v33, %v6742_v32 }
  0xf3   :  { %v6198_v41 = vld [vmem:[#allocation5 + $0xd8] sm:$0xf]  ;;  %v1717_v45 = vadd.f32 %v1716_v37, %v360_v29  ;;  %v6999_v47 = vor.u32 %v9379_v35, %v6998_v34 }
  0xf4   :  { %1960 = vmatpush.bf16.msrb.mxu3 %v6899_v39  ;;  %1935 = vmatpush.bf16.msrb.mxu1 %v6355_v52  ;;  %v6487_v39 = vor.u32 %v9251_v31, %v6486_v28  ;;  %v9179_v43 = vld [vmem:[#allocation5 + $0xf4] sm:$0xf0]  ;;  %v1729_v46 = vpop.f32.mrf.mxu1 }
  0xf5   :  { %1923 = vmatmul.bf16.vlgmr.msrb.gmra.mxu0 %v10135_v9  ;;  %v6454_v44 = vld [vmem:[#allocation5 + $0x2d8] sm:$0xf]  ;;  %v6199_v54 = vor.u32 %v9179_v43, %v6198_v41  ;;  %v9271_v41 = vld [vmem:[#allocation5 + $0x3dc] sm:$0xf] }
  0xf6   :  { %1948 = vmatpush.bf16.msrb.mxu2 %v6611_v53  ;;  %1967 = vmatpush.bf16.msra.mxu0 %v6327_v57  ;;  %v9243_v48 = vld [vmem:[#allocation5 + $0x2f4] sm:$0xf0]  ;;  %v1730_v53 = vadd.f32 %v1729_v46, %v1717_v45  ;;  %v9335_v45 = vld [vmem:[#allocation5 + $0x5dc] sm:$0xf] }
  0xf7   :  { %1936 = vmatmul.bf16.vlgmr.msrb.gmra.mxu1 %v10142_v25  ;;  %v6710_v49 = vld [vmem:[#allocation5 + $0x4d8] sm:$0xf]  ;;  %v6455_v55 = vor.u32 %v9243_v48, %v6454_v44  ;;  %v6584_v44 = vld [vmem:[#allocation5 + $0x3f8] sm:$0xf0] }
  0xf8   :  { %1961 = vmatpush.bf16.msrb.mxu3 %v6867_v56  ;;  %1980 = vmatpush.bf16.msra.mxu1 %v6583_v59  ;;  %v9307_v50 = vld [vmem:[#allocation5 + $0x4f4] sm:$0xf0]  ;;  %v6840_v46 = vld [vmem:[#allocation5 + $0x5f8] sm:$0xf0] }
  0xf9   :  { %1949 = vmatmul.bf16.vlgmr.msrb.gmra.mxu2 %v10133_v8  ;;  %v6966_v51 = vld [vmem:[#allocation5 + $0x6d8] sm:$0xf]  ;;  %v6711_v56 = vor.u32 %v9307_v50, %v6710_v49  ;;  %v9399_v49 = vld [vmem:[#allocation5 + $0x7dc] sm:$0xf] }
  0xfa   :  { %1993 = vmatpush.bf16.msra.mxu2 %v6839_v60  ;;  %1968 = vmatpush.bf16.msra.mxu0 %v6295_v7  ;;  %v9371_v52 = vld [vmem:[#allocation5 + $0x6f4] sm:$0xf0]  ;;  %v1718_v7 = vpop.f32.mrf.mxu0  ;;  %v7096_v50 = vld [vmem:[#allocation5 + $0x7f8] sm:$0xf0] }
  0xfb   :  { %1962 = vmatmul.bf16.vlgmr.msrb.gmra.mxu3 %v10137_v15  ;;  %v6166_v57 = vld [vmem:[#allocation5 + $0x98] sm:$0xf]  ;;  %v6967_v61 = vor.u32 %v9371_v52, %v6966_v51 }
  0xfc   :  { %2006 = vmatpush.bf16.msra.mxu3 %v7095_v1  ;;  %1981 = vmatpush.bf16.msra.mxu1 %v6551_v10  ;;  %v9171_v58 = vld [vmem:[#allocation5 + $0xb4] sm:$0xf0]  ;;  %v1742_v60 = vpop.f32.mrf.mxu2 }
  0xfd   :  { %v6422_v59 = vld [vmem:[#allocation5 + $0x298] sm:$0xf]  ;;  %v1743_v1 = vadd.f32 %v1742_v60, %v1730_v53  ;;  %v6167_v5 = vor.u32 %v9171_v58, %v6166_v57  ;;  %v6587_v53 = vor.u32 %v9271_v41, %v6584_v44  ;;  %v9263_v57 = vld [vmem:[#allocation5 + $0x39c] sm:$0xf]  ;;  %v7099_v58 = vor.u32 %v9399_v49, %v7096_v50 }
  0xfe   :  { %1994 = vmatpush.bf16.msra.mxu2 %v6807_v11  ;;  %1969 = vmatpush.bf16.msra.mxu0 %v6263_v22  ;;  %v9235_v62 = vld [vmem:[#allocation5 + $0x2b4] sm:$0xf0]  ;;  %v1755_v2 = vpop.f32.mrf.mxu3  ;;  %v9327_v60 = vld [vmem:[#allocation5 + $0x59c] sm:$0xf] }
  0xff   :  { %v6678_v63 = vld [vmem:[#allocation5 + $0x498] sm:$0xf]  ;;  %v10171_v6 = vadd.f32 %v1755_v2, %v1743_v1  ;;  %v6423_v10 = vor.u32 %v9235_v62, %v6422_v59  ;;  %v6552_v59 = vld [vmem:[#allocation5 + $0x3b8] sm:$0xf0] }
 0x100   :  { %2007 = vmatpush.bf16.msra.mxu3 %v7063_v16  ;;  %1982 = vmatpush.bf16.msra.mxu1 %v6519_v24  ;;  %v9299_v0 = vld [vmem:[#allocation5 + $0x4b4] sm:$0xf0]  ;;  %v1731_v16 = vpop.f32.mrf.mxu1  ;;  %v9391_v62 = vld [vmem:[#allocation5 + $0x79c] sm:$0xf]  ;;  %v6555_v1 = vor.u32 %v9263_v57, %v6552_v59 }
 0x101   :  { %v6934_v3 = vld [vmem:[#allocation5 + $0x698] sm:$0xf]  ;;  %v6679_v11 = vor.u32 %v9299_v0, %v6678_v63  ;;  %v7064_v63 = vld [vmem:[#allocation5 + $0x7b8] sm:$0xf0]  ;;  %vm2072_vm1 = vcmp.gt.f32.partialorder %v10171_v6, 0.0 }
 0x102   :  { %1995 = vmatpush.bf16.msra.mxu2 %v6775_v26  ;;  %1970 = vmatpush.bf16.msra.mxu0 %v6231_v36  ;;  %v9363_v4 = vld [vmem:[#allocation5 + $0x6b4] sm:$0xf0]  ;;  %v7067_v7 = vor.u32 %v9391_v62, %v7064_v63  ;;  %v6712_v41 = vld [vmem:[#allocation5 + $0x4f8] sm:$0xf0] }
 0x103   :  { %v6134_v12 = vld [vmem:[#allocation5 + $0x58] sm:$0xf]  ;;  %v6935_v17 = vor.u32 %v9363_v4, %v6934_v3  ;;  %v9191_v3 = vld [vmem:[#allocation5 + $0x15c] sm:$0xf] }
 0x104   :  { %2008 = vmatpush.bf16.msra.mxu3 %v7031_v30  ;;  %1983 = vmatpush.bf16.msra.mxu1 %v6487_v39  ;;  %v9163_v13 = vld [vmem:[#allocation5 + $0x74] sm:$0xf0]  ;;  %v1744_v32 = vpop.f32.mrf.mxu2  ;;  %v9207_v39 = vld [vmem:[#allocation5 + $0x1dc] sm:$0xf] }
 0x105   :  { %v6390_v14 = vld [vmem:[#allocation5 + $0x258] sm:$0xf]  ;;  %v6135_v23 = vor.u32 %v9163_v13, %v6134_v12  ;;  %v6264_v4 = vld [vmem:[#allocation5 + $0x178] sm:$0xf0] }
 0x106   :  { %1996 = vmatpush.bf16.msra.mxu2 %v6743_v40  ;;  %1971 = vmatpush.bf16.msra.mxu0 %v6199_v54  ;;  %v9227_v18 = vld [vmem:[#allocation5 + $0x274] sm:$0xf0]  ;;  %v1757_v37 = vpop.f32.mrf.mxu3  ;;  %v6328_v40 = vld [vmem:[#allocation5 + $0x1f8] sm:$0xf0]  ;;  %v6843_v54 = vor.u32 %v9335_v45, %v6840_v46  ;;  %v6267_v16 = vor.u32 %v9191_v3, %v6264_v4 }
 0x107   :  { %v6646_v19 = vld [vmem:[#allocation5 + $0x458] sm:$0xf]  ;;  %v6391_v27 = vor.u32 %v9227_v18, %v6390_v14  ;;  %v6331_v52 = vor.u32 %v9207_v39, %v6328_v40  ;;  %v6776_v12 = vld [vmem:[#allocation5 + $0x578] sm:$0xf0] }
 0x108   :  { %2009 = vmatpush.bf16.msra.mxu3 %v6999_v47  ;;  %1984 = vmatpush.bf16.msra.mxu1 %v6455_v55  ;;  %v9291_v20 = vld [vmem:[#allocation5 + $0x474] sm:$0xf0]  ;;  %v9199_v55 = vld [vmem:[#allocation5 + $0x19c] sm:$0xf] }
 0x109   :  { %v6902_v21 = vld [vmem:[#allocation5 + $0x658] sm:$0xf]  ;;  %v6647_v28 = vor.u32 %v9291_v20, %v6646_v19  ;;  %v9383_v13 = vld [vmem:[#allocation5 + $0x75c] sm:$0xf] }
 0x10a   :  { %1997 = vmatpush.bf16.msra.mxu2 %v6711_v56  ;;  %v9355_v22 = vld [vmem:[#allocation5 + $0x674] sm:$0xf0]  ;;  %1972 = vmatpush.bf16.msra.mxu0 %v6167_v5  ;;  %v6296_v56 = vld [vmem:[#allocation5 + $0x1b8] sm:$0xf0] }
 0x10b   :  { %v6102_v24 = vld [vmem:[#allocation5 + $0x18] sm:$0xf]  ;;  %v6903_v33 = vor.u32 %v9355_v22, %v6902_v21  ;;  %v6299_v0 = vor.u32 %v9199_v55, %v6296_v56  ;;  %v9255_v5 = vld [vmem:[#allocation5 + $0x35c] sm:$0xf] }
 0x10c   :  { %2010 = vmatpush.bf16.msra.mxu3 %v6967_v61  ;;  %v9155_v26 = vld [vmem:[#allocation5 + $0x34] sm:$0xf0]  ;;  %1985 = vmatpush.bf16.msra.mxu1 %v6423_v10  ;;  %v6808_v61 = vld [vmem:[#allocation5 + $0x5b8] sm:$0xf0] }
 0x10d   :  { %v6358_v29 = vld [vmem:[#allocation5 + $0x218] sm:$0xf]  ;;  %v6103_v43 = vor.u32 %v9155_v26, %v6102_v24  ;;  %v6811_v2 = vor.u32 %v9327_v60, %v6808_v61  ;;  %v6520_v10 = vld [vmem:[#allocation5 + $0x378] sm:$0xf0] }
 0x10e   :  { %1998 = vmatpush.bf16.msra.mxu2 %v6679_v11  ;;  %v9219_v30 = vld [vmem:[#allocation5 + $0x234] sm:$0xf0]  ;;  %1973 = vmatpush.bf16.msra.mxu0 %v6135_v23  ;;  %v9319_v11 = vld [vmem:[#allocation5 + $0x55c] sm:$0xf] }
 0x10f   :  { %v6614_v31 = vld [vmem:[#allocation5 + $0x418] sm:$0xf]  ;;  %v6359_v47 = vor.u32 %v9219_v30, %v6358_v29  ;;  %v7032_v14 = vld [vmem:[#allocation5 + $0x778] sm:$0xf0]  ;;  %v6779_v18 = vor.u32 %v9319_v11, %v6776_v12 }
 0x110   :  { %2011 = vmatpush.bf16.msra.mxu3 %v6935_v17  ;;  %v9283_v34 = vld [vmem:[#allocation5 + $0x434] sm:$0xf0]  ;;  %1986 = vmatpush.bf16.msra.mxu1 %v6391_v27  ;;  %v6523_v17 = vor.u32 %v9255_v5, %v6520_v10  ;;  %v9183_v19 = vld [vmem:[#allocation5 + $0x11c] sm:$0xf]  ;;  %v7035_v22 = vor.u32 %v9383_v13, %v7032_v14 }
 0x111   :  { %v6870_v35 = vld [vmem:[#allocation5 + $0x618] sm:$0xf]  ;;  %v6615_v48 = vor.u32 %v9283_v34, %v6614_v31  ;;  %v6232_v20 = vld [vmem:[#allocation5 + $0x138] sm:$0xf0] }
 0x112   :  { %v9347_v36 = vld [vmem:[#allocation5 + $0x634] sm:$0xf0]  ;;  %1999 = vmatpush.bf16.msra.mxu2 %v6647_v28  ;;  %1974 = vmatpush.bf16.msra.mxu0 %v6103_v43  ;;  %v9247_v21 = vld [vmem:[#allocation5 + $0x31c] sm:$0xf]  ;;  %v6235_v29 = vor.u32 %v9183_v19, %v6232_v20  ;;  %v10177_v30 = vpop.f32.mrf.mxu0 }
 0x113   :  { %v6871_v51 = vor.u32 %v9347_v36, %v6870_v35  ;;  %v6488_v23 = vld [vmem:[#allocation5 + $0x338] sm:$0xf0] }
 0x114   :  { %2012 = vmatpush.bf16.msra.mxu3 %v6903_v33  ;;  %1987 = vmatpush.bf16.msra.mxu1 %v6359_v47  ;;  %v9311_v24 = vld [vmem:[#allocation5 + $0x51c] sm:$0xf]  ;;  %v6491_v31 = vor.u32 %v9247_v21, %v6488_v23  ;;  %v10179_v36 = vpop.f32.mrf.mxu1 }
 0x115   :  { %1975 = vmatmul.bf16.vlgmr.msra.gmra.mxu0 %v10135_v9  ;;  %v6744_v26 = vld [vmem:[#allocation5 + $0x538] sm:$0xf0] }
 0x116   :  { %2000 = vmatpush.bf16.msra.mxu2 %v6615_v48  ;;  %2019 = vmatpush.bf16.msrb.mxu0 %v6331_v52  ;;  %v9375_v27 = vld [vmem:[#allocation5 + $0x71c] sm:$0xf]  ;;  %v6747_v32 = vor.u32 %v9311_v24, %v6744_v26 }
 0x117   :  { %1988 = vmatmul.bf16.vlgmr.msra.gmra.mxu1 %v10142_v25  ;;  %v7000_v28 = vld [vmem:[#allocation5 + $0x738] sm:$0xf0] }
 0x118   :  { %2013 = vmatpush.bf16.msra.mxu3 %v6871_v51  ;;  %2032 = vmatpush.bf16.msrb.mxu1 %v6587_v53  ;;  %v9175_v33 = vld [vmem:[#allocation5 + $0xdc] sm:$0xf]  ;;  %v7003_v37 = vor.u32 %v9375_v27, %v7000_v28  ;;  %v7326_v28 = vld [vmem:[#allocation8 + $0x1c0] sm:$0xf] }
 0x119   :  { %2001 = vmatmul.bf16.vlgmr.msra.gmra.mxu2 %v10133_v8  ;;  %v6200_v34 = vld [vmem:[#allocation5 + $0xf8] sm:$0xf0] }
 0x11a   :  { %2045 = vmatpush.bf16.msrb.mxu2 %v6843_v54  ;;  %2020 = vmatpush.bf16.msrb.mxu0 %v6299_v0  ;;  %v9239_v35 = vld [vmem:[#allocation5 + $0x2dc] sm:$0xf]  ;;  %v6203_v45 = vor.u32 %v9175_v33, %v6200_v34  ;;  %v1770_v60 = vpop.f32.mrf.mxu0  ;;  %v9528_v33 = vld [vmem:[#allocation8 + $0x3dc] sm:$0xf0] }
 0x11b   :  { %2014 = vmatmul.bf16.vlgmr.msra.gmra.mxu3 %v10137_v15  ;;  %v6456_v39 = vld [vmem:[#allocation5 + $0x2f8] sm:$0xf0]  ;;  %v7838_v34 = vld [vmem:[#allocation8 + $0x5c0] sm:$0xf] }
 0x11c   :  { %2058 = vmatpush.bf16.msrb.mxu3 %v7099_v58  ;;  %2033 = vmatpush.bf16.msrb.mxu1 %v6555_v1  ;;  %v9303_v40 = vld [vmem:[#allocation5 + $0x4dc] sm:$0xf]  ;;  %v6459_v46 = vor.u32 %v9239_v35, %v6456_v39  ;;  %v10181_v51 = vpop.f32.mrf.mxu2  ;;  %v9592_v35 = vld [vmem:[#allocation8 + $0x5dc] sm:$0xf0] }
 0x11d   :  { %v9367_v43 = vld [vmem:[#allocation5 + $0x6dc] sm:$0xf]  ;;  %v6715_v47 = vor.u32 %v9303_v40, %v6712_v41 }
 0x11e   :  { %2046 = vmatpush.bf16.msrb.mxu2 %v6811_v2  ;;  %2021 = vmatpush.bf16.msrb.mxu0 %v6267_v16  ;;  %v6968_v44 = vld [vmem:[#allocation5 + $0x6f8] sm:$0xf0]  ;;  %v10183_v56 = vpop.f32.mrf.mxu3  ;;  %v1783_v2 = vpop.f32.mrf.mxu1 }
 0x11f   :  { %v9167_v48 = vld [vmem:[#allocation5 + $0x9c] sm:$0xf]  ;;  %v6971_v52 = vor.u32 %v9367_v43, %v6968_v44  ;;  %v8094_v43 = vld [vmem:[#allocation8 + $0x7c0] sm:$0xf] }
 0x120   :  { %2059 = vmatpush.bf16.msrb.mxu3 %v7067_v7  ;;  %2034 = vmatpush.bf16.msrb.mxu1 %v6523_v17  ;;  %v6168_v49 = vld [vmem:[#allocation5 + $0xb8] sm:$0xf0]  ;;  %v9656_v44 = vld [vmem:[#allocation8 + $0x7dc] sm:$0xf0] }
 0x121   :  { %v9231_v50 = vld [vmem:[#allocation5 + $0x29c] sm:$0xf]  ;;  %v6171_v59 = vor.u32 %v9167_v48, %v6168_v49  ;;  %v9456_v48 = vld [vmem:[#allocation8 + $0x19c] sm:$0xf0] }
 0x122   :  { %2047 = vmatpush.bf16.msrb.mxu2 %v6779_v18  ;;  %2022 = vmatpush.bf16.msrb.mxu0 %v6235_v29  ;;  %v6424_v53 = vld [vmem:[#allocation5 + $0x2b8] sm:$0xf0]  ;;  %v9464_v29 = vld [vmem:[#allocation8 + $0x1dc] sm:$0xf0] }
 0x123   :  { %v9295_v54 = vld [vmem:[#allocation5 + $0x49c] sm:$0xf]  ;;  %v6427_v61 = vor.u32 %v9231_v50, %v6424_v53  ;;  %v7327_v41 = vor.u32 %v9464_v29, %v7326_v28  ;;  %v7550_v49 = vld [vmem:[#allocation8 + $0x380] sm:$0xf] }
 0x124   :  { %2060 = vmatpush.bf16.msrb.mxu3 %v7035_v22  ;;  %2035 = vmatpush.bf16.msrb.mxu1 %v6491_v31  ;;  %v6680_v55 = vld [vmem:[#allocation5 + $0x4b8] sm:$0xf0]  ;;  %v1796_v21 = vpop.f32.mrf.mxu2  ;;  %v7582_v31 = vld [vmem:[#allocation8 + $0x3c0] sm:$0xf] }
 0x125   :  { %v9359_v57 = vld [vmem:[#allocation5 + $0x69c] sm:$0xf]  ;;  %v6683_v62 = vor.u32 %v9295_v54, %v6680_v55  ;;  %v9520_v50 = vld [vmem:[#allocation8 + $0x39c] sm:$0xf0]  ;;  %v361_v54 = vperm.slane %v10161_v42, 2  ;;  %v8095_v55 = vor.u32 %v9656_v44, %v8094_v43 }
 0x126   :  { %2048 = vmatpush.bf16.msrb.mxu2 %v6747_v32  ;;  %v6936_v58 = vld [vmem:[#allocation5 + $0x6b8] sm:$0xf0]  ;;  %2023 = vmatpush.bf16.msrb.mxu0 %v6203_v45  ;;  %v1809_v27 = vpop.f32.mrf.mxu3  ;;  %v7583_v45 = vor.u32 %v9528_v33, %v7582_v31  ;;  %v9584_v53 = vld [vmem:[#allocation8 + $0x59c] sm:$0xf0]  ;;  %v7551_v60 = vor.u32 %v9520_v50, %v7550_v49 }
 0x127   :  { %v9159_v63 = vld [vmem:[#allocation5 + $0x5c] sm:$0xf]  ;;  %v6939_v3 = vor.u32 %v9359_v57, %v6936_v58  ;;  %v8062_v58 = vld [vmem:[#allocation8 + $0x780] sm:$0xf] }
 0x128   :  { %2061 = vmatpush.bf16.msrb.mxu3 %v7003_v37  ;;  %2036 = vmatpush.bf16.msrb.mxu1 %v6459_v46  ;;  %v6136_v0 = vld [vmem:[#allocation5 + $0x78] sm:$0xf0]  ;;  %v7839_v46 = vor.u32 %v9592_v35, %v7838_v34  ;;  %v7774_v2 = vld [vmem:[#allocation8 + $0x540] sm:$0xf] }
 0x129   :  { %v9223_v1 = vld [vmem:[#allocation5 + $0x25c] sm:$0xf]  ;;  %v6139_v12 = vor.u32 %v9159_v63, %v6136_v0  ;;  %v9448_v63 = vld [vmem:[#allocation8 + $0x15c] sm:$0xf0] }
 0x12a   :  { %2049 = vmatpush.bf16.msrb.mxu2 %v6715_v47  ;;  %v6392_v4 = vld [vmem:[#allocation5 + $0x278] sm:$0xf0]  ;;  %2024 = vmatpush.bf16.msrb.mxu0 %v6171_v59  ;;  %v7294_v47 = vld [vmem:[#allocation8 + $0x180] sm:$0xf] }
 0x12b   :  { %v9287_v5 = vld [vmem:[#allocation5 + $0x45c] sm:$0xf]  ;;  %v6395_v16 = vor.u32 %v9223_v1, %v6392_v4  ;;  %v7295_v57 = vor.u32 %v9456_v48, %v7294_v47  ;;  %v9648_v59 = vld [vmem:[#allocation8 + $0x79c] sm:$0xf0]  ;;  %v1769_v4 = vadd.f32 %v10177_v30, %v361_v54 }
 0x12c   :  { %2062 = vmatpush.bf16.msrb.mxu3 %v6971_v52  ;;  %v6648_v7 = vld [vmem:[#allocation5 + $0x478] sm:$0xf0]  ;;  %2037 = vmatpush.bf16.msrb.mxu1 %v6427_v61  ;;  %v7806_v52 = vld [vmem:[#allocation8 + $0x580] sm:$0xf] }
 0x12d   :  { %v9351_v10 = vld [vmem:[#allocation5 + $0x65c] sm:$0xf]  ;;  %v6651_v17 = vor.u32 %v9287_v5, %v6648_v7  ;;  %v7807_v61 = vor.u32 %v9584_v53, %v7806_v52  ;;  %v7518_v0 = vld [vmem:[#allocation8 + $0x340] sm:$0xf]  ;;  %v8063_v5 = vor.u32 %v9648_v59, %v8062_v58  ;;  %v1782_v30 = vadd.f32 %v10179_v36, %v1769_v4 }
 0x12e   :  { %v6904_v11 = vld [vmem:[#allocation5 + $0x678] sm:$0xf0]  ;;  %2050 = vmatpush.bf16.msrb.mxu2 %v6683_v62  ;;  %2025 = vmatpush.bf16.msrb.mxu0 %v6139_v12  ;;  %v7262_v62 = vld [vmem:[#allocation8 + $0x140] sm:$0xf]  ;;  %v10198_v53 = vmul.f32 0.01, %v10164_v38 }
 0x12f   :  { %v9151_v13 = vld [vmem:[#allocation5 + $0x1c] sm:$0xf]  ;;  %v6907_v22 = vor.u32 %v9351_v10, %v6904_v11  ;;  %v9512_v1 = vld [vmem:[#allocation8 + $0x35c] sm:$0xf0]  ;;  %v7263_v7 = vor.u32 %v9448_v63, %v7262_v62  ;;  %v1795_v36 = vadd.f32 %v10181_v51, %v1782_v30 }
 0x130   :  { %v6104_v14 = vld [vmem:[#allocation5 + $0x38] sm:$0xf0]  ;;  %2063 = vmatpush.bf16.msrb.mxu3 %v6939_v3  ;;  %2038 = vmatpush.bf16.msrb.mxu1 %v6395_v16  ;;  %v9576_v3 = vld [vmem:[#allocation8 + $0x55c] sm:$0xf0]  ;;  %v362_v16 = vperm.slane %v10161_v42, 3 }
 0x131   :  { %v9215_v18 = vld [vmem:[#allocation5 + $0x21c] sm:$0xf]  ;;  %v6107_v32 = vor.u32 %v9151_v13, %v6104_v14  ;;  %v8030_v10 = vld [vmem:[#allocation8 + $0x740] sm:$0xf]  ;;  %v10195_v51 = vadd.f32 %v10183_v56, %v1795_v36 }
 0x132   :  { %v6360_v19 = vld [vmem:[#allocation5 + $0x238] sm:$0xf0]  ;;  %2051 = vmatpush.bf16.msrb.mxu2 %v6651_v17  ;;  %v9640_v11 = vld [vmem:[#allocation8 + $0x75c] sm:$0xf0] }
 0x133   :  { %v9279_v20 = vld [vmem:[#allocation5 + $0x41c] sm:$0xf]  ;;  %v6363_v37 = vor.u32 %v9215_v18, %v6360_v19  ;;  %2026 = vmatpush.bf16.msrb.mxu0 %v6107_v32  ;;  %v7230_v12 = vld [vmem:[#allocation8 + $0x100] sm:$0xf]  ;;  %v8031_v18 = vor.u32 %v9640_v11, %v8030_v10  ;;  %vm2073_vm2 = vcmp.gt.f32.partialorder %v10195_v51, 0.0 }
 0x134   :  { %v6616_v23 = vld [vmem:[#allocation5 + $0x438] sm:$0xf0]  ;;  %2064 = vmatpush.bf16.msrb.mxu3 %v6907_v22  ;;  %v9440_v13 = vld [vmem:[#allocation8 + $0x11c] sm:$0xf0]  ;;  %v1820_v22 = vpop.f32.mrf.mxu0  ;;  %v1833_v29 = vpop.f32.mrf.mxu1 }
 0x135   :  { %v9343_v24 = vld [vmem:[#allocation5 + $0x61c] sm:$0xf]  ;;  %v6619_v39 = vor.u32 %v9279_v20, %v6616_v23  ;;  %2039 = vmatpush.bf16.msrb.mxu1 %v6363_v37  ;;  %v7486_v14 = vld [vmem:[#allocation8 + $0x300] sm:$0xf]  ;;  %v7231_v19 = vor.u32 %v9440_v13, %v7230_v12  ;;  %v1821_v42 = vadd.f32 %v1820_v22, %v362_v16 }
 0x136   :  { %v6872_v26 = vld [vmem:[#allocation5 + $0x638] sm:$0xf0]  ;;  %2027 = vmatmul.bf16.vlgmr.msrb.gmra.mxu0 %v10135_v9  ;;  %v7519_v9 = vor.u32 %v9512_v1, %v7518_v0  ;;  %v7742_v17 = vld [vmem:[#allocation8 + $0x500] sm:$0xf] }
 0x137   :  { %v6875_v40 = vor.u32 %v9343_v24, %v6872_v26  ;;  %2052 = vmatpush.bf16.msrb.mxu2 %v6619_v39  ;;  %5193 = vmatpush.bf16.msra.mxu0 %v7327_v41  ;;  %v7998_v20 = vld [vmem:[#allocation8 + $0x700] sm:$0xf] }
 0x138   :  { %2040 = vmatmul.bf16.vlgmr.msrb.gmra.mxu1 %v10142_v25  ;;  %v7775_v25 = vor.u32 %v9576_v3, %v7774_v2  ;;  %v9632_v21 = vld [vmem:[#allocation8 + $0x71c] sm:$0xf0] }
 0x139   :  { %2065 = vmatpush.bf16.msrb.mxu3 %v6875_v40  ;;  %5206 = vmatpush.bf16.msra.mxu1 %v7583_v45  ;;  %v7198_v26 = vld [vmem:[#allocation8 + $0xc0] sm:$0xf]  ;;  %v7999_v34 = vor.u32 %v9632_v21, %v7998_v20  ;;  %v1834_v40 = vadd.f32 %v1833_v29, %v1821_v42 }
 0x13a   :  { %2053 = vmatmul.bf16.vlgmr.msrb.gmra.mxu2 %v10133_v8  ;;  %v9504_v8 = vld [vmem:[#allocation8 + $0x31c] sm:$0xf0] }
 0x13b   :  { %5219 = vmatpush.bf16.msra.mxu2 %v7839_v46  ;;  %5194 = vmatpush.bf16.msra.mxu0 %v7295_v57  ;;  %v7487_v23 = vor.u32 %v9504_v8, %v7486_v14  ;;  %v9432_v27 = vld [vmem:[#allocation8 + $0xdc] sm:$0xf0] }
 0x13c   :  { %2066 = vmatmul.bf16.vlgmr.msrb.gmra.mxu3 %v10137_v15  ;;  %v9568_v15 = vld [vmem:[#allocation8 + $0x51c] sm:$0xf0]  ;;  %v7199_v35 = vor.u32 %v9432_v27, %v7198_v26  ;;  %v1846_v47 = vpop.f32.mrf.mxu2  ;;  %v1835_v56 = vpop.f32.mrf.mxu1 }
 0x13d   :  { %5232 = vmatpush.bf16.msra.mxu3 %v8095_v55  ;;  %5207 = vmatpush.bf16.msra.mxu1 %v7551_v60  ;;  %v7743_v24 = vor.u32 %v9568_v15, %v7742_v17  ;;  %v7454_v28 = vld [vmem:[#allocation8 + $0x2c0] sm:$0xf]  ;;  %v1847_v59 = vadd.f32 %v1846_v47, %v1834_v40  ;;  %v1822_v60 = vpop.f32.mrf.mxu0 }
 0x13e   :  { %v9496_v31 = vld [vmem:[#allocation8 + $0x2dc] sm:$0xf0]  ;;  %v1859_v52 = vpop.f32.mrf.mxu3 }
 0x13f   :  { %5220 = vmatpush.bf16.msra.mxu2 %v7807_v61  ;;  %5195 = vmatpush.bf16.msra.mxu0 %v7263_v7  ;;  %v7710_v32 = vld [vmem:[#allocation8 + $0x4c0] sm:$0xf]  ;;  %v7455_v41 = vor.u32 %v9496_v31, %v7454_v28  ;;  %v2081_v7 = vmul.f32 0.01, %v10195_v51  ;;  %v1860_v12 = vadd.f32 %v1859_v52, %v1847_v59 }
 0x140   :  { %v9560_v33 = vld [vmem:[#allocation8 + $0x4dc] sm:$0xf0] }
 0x141   :  { %5233 = vmatpush.bf16.msra.mxu3 %v8063_v5  ;;  %5208 = vmatpush.bf16.msra.mxu1 %v7519_v9  ;;  %v7966_v37 = vld [vmem:[#allocation8 + $0x6c0] sm:$0xf]  ;;  %v7711_v43 = vor.u32 %v9560_v33, %v7710_v32  ;;  %v2080_v5 = vmul.f32 0.01, %v10171_v6  ;;  %v2082_v26 = vmul.f32 0.01, %v1860_v12 }
 0x142   :  { %v9624_v39 = vld [vmem:[#allocation8 + $0x6dc] sm:$0xf0]  ;;  %vm2074_vm3 = vcmp.gt.f32.partialorder %v1860_v12, 0.0 }
 0x143   :  { %5221 = vmatpush.bf16.msra.mxu2 %v7775_v25  ;;  %5196 = vmatpush.bf16.msra.mxu0 %v7231_v19  ;;  %v7166_v44 = vld [vmem:[#allocation8 + $0x80] sm:$0xf]  ;;  %v7967_v54 = vor.u32 %v9624_v39, %v7966_v37  ;;  %v2088_v40 = vsel %vm2072_vm1, %v10171_v6, %v2080_v5  ;;  %v2090_v47 = vsel %vm2074_vm3, %v1860_v12, %v2082_v26 }
 0x144   :  { %v9424_v45 = vld [vmem:[#allocation8 + $0x9c] sm:$0xf0]  ;;  %v1848_v30 = vpop.f32.mrf.mxu2  ;;  %v10217_v52 = vpack.c.bf16 %v2088_v40, %v2088_v40 }
 0x145   :  { %5234 = vmatpush.bf16.msra.mxu3 %v8031_v18  ;;  %5209 = vmatpush.bf16.msra.mxu1 %v7487_v23  ;;  %v7422_v46 = vld [vmem:[#allocation8 + $0x280] sm:$0xf]  ;;  %v7167_v55 = vor.u32 %v9424_v45, %v7166_v44 }
 0x146   :  { %v9488_v48 = vld [vmem:[#allocation8 + $0x29c] sm:$0xf0]  ;;  %v1861_v21 = vpop.f32.mrf.mxu3 }
 0x147   :  { %5222 = vmatpush.bf16.msra.mxu2 %v7743_v24  ;;  %v7678_v49 = vld [vmem:[#allocation8 + $0x480] sm:$0xf]  ;;  %5197 = vmatpush.bf16.msra.mxu0 %v7199_v35  ;;  %v7423_v61 = vor.u32 %v9488_v48, %v7422_v46  ;;  %v2089_v46 = vsel %vm2073_vm2, %v10195_v51, %v2081_v7  ;;  %v10221_v51 = vpack.c.bf16 %v2090_v47, %v2090_v47 }
 0x148   :  { %v9552_v50 = vld [vmem:[#allocation8 + $0x49c] sm:$0xf0] }
 0x149   :  { %5235 = vmatpush.bf16.msra.mxu3 %v7999_v34  ;;  %v7934_v57 = vld [vmem:[#allocation8 + $0x680] sm:$0xf]  ;;  %5210 = vmatpush.bf16.msra.mxu1 %v7455_v41  ;;  %v7679_v62 = vor.u32 %v9552_v50, %v7678_v49  ;;  %v2087_v34 = vsel %vm2071_vm0, %v10164_v38, %v10198_v53 }
 0x14a   :  { %v9616_v58 = vld [vmem:[#allocation8 + $0x69c] sm:$0xf0]  ;;  %v10215_v50 = vpack.c.bf16 %v2087_v34, %v2087_v34 }
 0x14b   :  { %5223 = vmatpush.bf16.msra.mxu2 %v7711_v43  ;;  %v7134_v63 = vld [vmem:[#allocation8 + $0x40] sm:$0xf]  ;;  %5198 = vmatpush.bf16.msra.mxu0 %v7167_v55  ;;  %v7935_v10 = vor.u32 %v9616_v58, %v7934_v57  ;;  %v10219_v55 = vpack.c.bf16 %v2089_v46, %v2089_v46 }
 0x14c   :  { %v9416_v0 = vld [vmem:[#allocation8 + $0x5c] sm:$0xf0] }
 0x14d   :  { %v7390_v1 = vld [vmem:[#allocation8 + $0x240] sm:$0xf]  ;;  %5236 = vmatpush.bf16.msra.mxu3 %v7967_v54  ;;  %v7135_v11 = vor.u32 %v9416_v0, %v7134_v63  ;;  %5211 = vmatpush.bf16.msra.mxu1 %v7423_v61 }
 0x14e   :  { %v9480_v2 = vld [vmem:[#allocation8 + $0x25c] sm:$0xf0] }
 0x14f   :  { %v7646_v3 = vld [vmem:[#allocation8 + $0x440] sm:$0xf]  ;;  %5224 = vmatpush.bf16.msra.mxu2 %v7679_v62  ;;  %v7391_v14 = vor.u32 %v9480_v2, %v7390_v1  ;;  %5199 = vmatpush.bf16.msra.mxu0 %v7135_v11 }
 0x150   :  { %v9544_v4 = vld [vmem:[#allocation8 + $0x45c] sm:$0xf0] }
 0x151   :  { %v7902_v9 = vld [vmem:[#allocation8 + $0x640] sm:$0xf]  ;;  %v7647_v16 = vor.u32 %v9544_v4, %v7646_v3  ;;  %5237 = vmatpush.bf16.msra.mxu3 %v7935_v10  ;;  %5212 = vmatpush.bf16.msra.mxu1 %v7391_v14  ;;  %v10227_v4 = vld [vmem:[#allocation7] sm:$0xff] }
 0x152   :  { %v9608_v25 = vld [vmem:[#allocation8 + $0x65c] sm:$0xf0]  ;;  %v363_v5 = vperm.slane %v10227_v4, 4 }
 0x153   :  { %v7102_v13 = vld [vmem:[#allocation8] sm:$0xf]  ;;  %v7903_v27 = vor.u32 %v9608_v25, %v7902_v9  ;;  %5225 = vmatpush.bf16.msra.mxu2 %v7647_v16 }
 0x154   :  { %v9408_v8 = vld [vmem:[#allocation8 + $0x1c] sm:$0xf0] }
 0x155   :  { %v7358_v17 = vld [vmem:[#allocation8 + $0x200] sm:$0xf]  ;;  %v7103_v28 = vor.u32 %v9408_v8, %v7102_v13  ;;  %5238 = vmatpush.bf16.msra.mxu3 %v7903_v27  ;;  %v1872_v13 = vpop.f32.mrf.mxu0 }
 0x156   :  { %v9472_v15 = vld [vmem:[#allocation8 + $0x21c] sm:$0xf0] }
 0x157   :  { %v7614_v18 = vld [vmem:[#allocation8 + $0x400] sm:$0xf]  ;;  %v7359_v31 = vor.u32 %v9472_v15, %v7358_v17  ;;  %5200 = vmatpush.bf16.msra.mxu0 %v7103_v28  ;;  %v1873_v17 = vadd.f32 %v1872_v13, %v363_v5  ;;  %v1885_v15 = vpop.f32.mrf.mxu1 }
 0x158   :  { %v9536_v19 = vld [vmem:[#allocation8 + $0x41c] sm:$0xf0] }
 0x159   :  { %v8350_v20 = vld [vmem:[#allocation8 + $0x9c0] sm:$0xf]  ;;  %v7615_v32 = vor.u32 %v9536_v19, %v7614_v18  ;;  %5213 = vmatpush.bf16.msra.mxu1 %v7359_v31 }
 0x15a   :  { %v9720_v22 = vld [vmem:[#allocation8 + $0x9dc] sm:$0xf0]  ;;  %5201 = vmatmul.bf16.vlgmr.msra.gmra.mxu0 %v10215_v50 }
 0x15b   :  { %v8606_v23 = vld [vmem:[#allocation8 + $0xbc0] sm:$0xf]  ;;  %v8351_v35 = vor.u32 %v9720_v22, %v8350_v20  ;;  %5226 = vmatpush.bf16.msra.mxu2 %v7615_v32  ;;  %v1886_v20 = vadd.f32 %v1885_v15, %v1873_v17  ;;  %v7552_v17 = vld [vmem:[#allocation8 + $0x3a0] sm:$0xf0] }
 0x15c   :  { %v9784_v24 = vld [vmem:[#allocation8 + $0xbdc] sm:$0xf0]  ;;  %5214 = vmatmul.bf16.vlgmr.msra.gmra.mxu1 %v10217_v52  ;;  %v1898_v28 = vpop.f32.mrf.mxu2 }
 0x15d   :  { %v8862_v42 = vld [vmem:[#allocation8 + $0xdc0] sm:$0xf]  ;;  %v8607_v37 = vor.u32 %v9784_v24, %v8606_v23  ;;  %5245 = vmatpush.bf16.msrb.mxu0 %v8351_v35 }
 0x15e   :  { %v9848_v29 = vld [vmem:[#allocation8 + $0xddc] sm:$0xf0]  ;;  %5227 = vmatmul.bf16.vlgmr.msra.gmra.mxu2 %v10219_v55  ;;  %v1911_v31 = vpop.f32.mrf.mxu3 }
 0x15f   :  { %v7870_v33 = vld [vmem:[#allocation8 + $0x600] sm:$0xf]  ;;  %v8863_v45 = vor.u32 %v9848_v29, %v8862_v42  ;;  %5258 = vmatpush.bf16.msrb.mxu1 %v8607_v37  ;;  %v1899_v29 = vadd.f32 %v1898_v28, %v1886_v20  ;;  %v7264_v28 = vld [vmem:[#allocation8 + $0x160] sm:$0xf0] }
 0x160   :  { %v9600_v36 = vld [vmem:[#allocation8 + $0x61c] sm:$0xf0] }
 0x161   :  { %v8318_v39 = vld [vmem:[#allocation8 + $0x980] sm:$0xf]  ;;  %v7871_v48 = vor.u32 %v9600_v36, %v7870_v33  ;;  %5271 = vmatpush.bf16.msrb.mxu2 %v8863_v45  ;;  %v1912_v35 = vadd.f32 %v1911_v31, %v1899_v29  ;;  %v7520_v29 = vld [vmem:[#allocation8 + $0x360] sm:$0xf0] }
 0x162   :  { %v9712_v41 = vld [vmem:[#allocation8 + $0x99c] sm:$0xf0] }
 0x163   :  { %v8574_v43 = vld [vmem:[#allocation8 + $0xb80] sm:$0xf]  ;;  %v8319_v6 = vor.u32 %v9712_v41, %v8318_v39  ;;  %5239 = vmatpush.bf16.msra.mxu3 %v7871_v48  ;;  %v1874_v39 = vpop.f32.mrf.mxu0  ;;  %vm2075_vm4 = vcmp.gt.f32.partialorder %v1912_v35, 0.0 }
 0x164   :  { %v9776_v44 = vld [vmem:[#allocation8 + $0xb9c] sm:$0xf0] }
 0x165   :  { %v8830_v38 = vld [vmem:[#allocation8 + $0xd80] sm:$0xf]  ;;  %v8575_v53 = vor.u32 %v9776_v44, %v8574_v43  ;;  %5246 = vmatpush.bf16.msrb.mxu0 %v8319_v6  ;;  %v1887_v44 = vpop.f32.mrf.mxu1  ;;  %v2083_v6 = vmul.f32 0.01, %v1912_v35 }
 0x166   :  { %v9840_v49 = vld [vmem:[#allocation8 + $0xd9c] sm:$0xf0]  ;;  %5240 = vmatmul.bf16.vlgmr.msra.gmra.mxu3 %v10221_v51  ;;  %v7488_v44 = vld [vmem:[#allocation8 + $0x320] sm:$0xf0] }
 0x167   :  { %v8286_v54 = vld [vmem:[#allocation8 + $0x940] sm:$0xf]  ;;  %v8831_v60 = vor.u32 %v9840_v49, %v8830_v38  ;;  %5259 = vmatpush.bf16.msrb.mxu1 %v8575_v53 }
 0x168   :  { %v9704_v57 = vld [vmem:[#allocation8 + $0x95c] sm:$0xf0] }
 0x169   :  { %v8542_v58 = vld [vmem:[#allocation8 + $0xb40] sm:$0xf]  ;;  %v8287_v63 = vor.u32 %v9704_v57, %v8286_v54  ;;  %5272 = vmatpush.bf16.msrb.mxu2 %v8831_v60  ;;  %v9524_v60 = vld [vmem:[#allocation8 + $0x3c4] sm:$0xf] }
 0x16a   :  { %v9768_v59 = vld [vmem:[#allocation8 + $0xb5c] sm:$0xf0] }
 0x16b   :  { %v8798_v61 = vld [vmem:[#allocation8 + $0xd40] sm:$0xf]  ;;  %v8543_v0 = vor.u32 %v9768_v59, %v8542_v58  ;;  %5247 = vmatpush.bf16.msrb.mxu0 %v8287_v63  ;;  %v9460_v58 = vld [vmem:[#allocation8 + $0x1c4] sm:$0xf] }
 0x16c   :  { %v9832_v62 = vld [vmem:[#allocation8 + $0xd5c] sm:$0xf0]  ;;  %v7328_v59 = vld [vmem:[#allocation8 + $0x1e0] sm:$0xf0] }
 0x16d   :  { %v8254_v1 = vld [vmem:[#allocation8 + $0x900] sm:$0xf]  ;;  %v8799_v7 = vor.u32 %v9832_v62, %v8798_v61  ;;  %5260 = vmatpush.bf16.msrb.mxu1 %v8543_v0  ;;  %v1900_v61 = vpop.f32.mrf.mxu2  ;;  %v7584_v63 = vld [vmem:[#allocation8 + $0x3e0] sm:$0xf0]  ;;  %v1913_v0 = vpop.f32.mrf.mxu3 }
 0x16e   :  { %v9696_v56 = vld [vmem:[#allocation8 + $0x91c] sm:$0xf0]  ;;  %v7587_v13 = vor.u32 %v9524_v60, %v7584_v63  ;;  %v7456_v61 = vld [vmem:[#allocation8 + $0x2e0] sm:$0xf0] }
 0x16f   :  { %v8510_v2 = vld [vmem:[#allocation8 + $0xb00] sm:$0xf]  ;;  %v8255_v12 = vor.u32 %v9696_v56, %v8254_v1  ;;  %5273 = vmatpush.bf16.msrb.mxu2 %v8799_v7  ;;  %v2091_v7 = vsel %vm2075_vm4, %v1912_v35, %v2083_v6  ;;  %v7776_v35 = vld [vmem:[#allocation8 + $0x560] sm:$0xf0] }
 0x170   :  { %v9760_v3 = vld [vmem:[#allocation8 + $0xb1c] sm:$0xf0]  ;;  %v7744_v6 = vld [vmem:[#allocation8 + $0x520] sm:$0xf0] }
 0x171   :  { %v8766_v10 = vld [vmem:[#allocation8 + $0xd00] sm:$0xf]  ;;  %v8511_v9 = vor.u32 %v9760_v3, %v8510_v2  ;;  %5248 = vmatpush.bf16.msrb.mxu0 %v8255_v12  ;;  %v9588_v12 = vld [vmem:[#allocation8 + $0x5c4] sm:$0xf] }
 0x172   :  { %v9824_v11 = vld [vmem:[#allocation8 + $0xd1c] sm:$0xf0]  ;;  %v1924_v60 = vpop.f32.mrf.mxu0 }
 0x173   :  { %v8222_v25 = vld [vmem:[#allocation8 + $0x8c0] sm:$0xf]  ;;  %v8767_v30 = vor.u32 %v9824_v11, %v8766_v10  ;;  %5261 = vmatpush.bf16.msrb.mxu1 %v8511_v9  ;;  %v7840_v9 = vld [vmem:[#allocation8 + $0x5e0] sm:$0xf0] }
 0x174   :  { %v9688_v14 = vld [vmem:[#allocation8 + $0x8dc] sm:$0xf0]  ;;  %v7843_v20 = vor.u32 %v9588_v12, %v7840_v9  ;;  %v9420_v12 = vld [vmem:[#allocation8 + $0x84] sm:$0xf] }
 0x175   :  { %v8478_v16 = vld [vmem:[#allocation8 + $0xac0] sm:$0xf]  ;;  %v8223_v21 = vor.u32 %v9688_v14, %v8222_v25  ;;  %5274 = vmatpush.bf16.msrb.mxu2 %v8767_v30  ;;  %v7331_v25 = vor.u32 %v9460_v58, %v7328_v59  ;;  %v9452_v14 = vld [vmem:[#allocation8 + $0x184] sm:$0xf] }
 0x176   :  { %v9752_v8 = vld [vmem:[#allocation8 + $0xadc] sm:$0xf0]  ;;  %v7200_v58 = vld [vmem:[#allocation8 + $0xe0] sm:$0xf0] }
 0x177   :  { %v8734_v18 = vld [vmem:[#allocation8 + $0xcc0] sm:$0xf]  ;;  %v8479_v22 = vor.u32 %v9752_v8, %v8478_v16  ;;  %5249 = vmatpush.bf16.msrb.mxu0 %v8223_v21  ;;  %v7296_v16 = vld [vmem:[#allocation8 + $0x1a0] sm:$0xf0] }
 0x178   :  { %v9816_v19 = vld [vmem:[#allocation8 + $0xcdc] sm:$0xf0]  ;;  %v9516_v8 = vld [vmem:[#allocation8 + $0x384] sm:$0xf] }
 0x179   :  { %v8190_v23 = vld [vmem:[#allocation8 + $0x880] sm:$0xf]  ;;  %v8735_v42 = vor.u32 %v9816_v19, %v8734_v18  ;;  %5262 = vmatpush.bf16.msrb.mxu1 %v8479_v22  ;;  %v10230_v19 = vpack.c.bf16 %v2091_v7, %v2091_v7  ;;  %v9580_v22 = vld [vmem:[#allocation8 + $0x584] sm:$0xf] }
 0x17a   :  { %v9680_v24 = vld [vmem:[#allocation8 + $0x89c] sm:$0xf0]  ;;  %v9492_v59 = vld [vmem:[#allocation8 + $0x2c4] sm:$0xf] }
 0x17b   :  { %v8446_v26 = vld [vmem:[#allocation8 + $0xa80] sm:$0xf]  ;;  %v8191_v36 = vor.u32 %v9680_v24, %v8190_v23  ;;  %5275 = vmatpush.bf16.msrb.mxu2 %v8735_v42  ;;  %v7808_v23 = vld [vmem:[#allocation8 + $0x5a0] sm:$0xf0]  ;;  %v7299_v24 = vor.u32 %v9452_v14, %v7296_v16 }
 0x17c   :  { %v9744_v27 = vld [vmem:[#allocation8 + $0xa9c] sm:$0xf0]  ;;  %v9508_v42 = vld [vmem:[#allocation8 + $0x344] sm:$0xf] }
 0x17d   :  { %v8702_v32 = vld [vmem:[#allocation8 + $0xc80] sm:$0xf]  ;;  %v8447_v34 = vor.u32 %v9744_v27, %v8446_v26  ;;  %5250 = vmatpush.bf16.msrb.mxu0 %v8191_v36  ;;  %v7555_v26 = vor.u32 %v9516_v8, %v7552_v17  ;;  %v9444_v27 = vld [vmem:[#allocation8 + $0x144] sm:$0xf]  ;;  %v7523_v39 = vor.u32 %v9508_v42, %v7520_v29  ;;  %v1950_v8 = vpop.f32.mrf.mxu2  ;;  %v1926_v29 = vpop.f32.mrf.mxu0 }
 0x17e   :  { %v9808_v33 = vld [vmem:[#allocation8 + $0xc9c] sm:$0xf0]  ;;  %v7168_v9 = vld [vmem:[#allocation8 + $0xa0] sm:$0xf0] }
 0x17f   :  { %v8158_v37 = vld [vmem:[#allocation8 + $0x840] sm:$0xf]  ;;  %v8703_v45 = vor.u32 %v9808_v33, %v8702_v32  ;;  %5263 = vmatpush.bf16.msrb.mxu1 %v8447_v34  ;;  %v7811_v33 = vor.u32 %v9580_v22, %v7808_v23  ;;  %v9572_v34 = vld [vmem:[#allocation8 + $0x544] sm:$0xf]  ;;  %v7171_v22 = vor.u32 %v9420_v12, %v7168_v9 }
 0x180   :  { %v9672_v40 = vld [vmem:[#allocation8 + $0x85c] sm:$0xf0]  ;;  %v7392_v42 = vld [vmem:[#allocation8 + $0x260] sm:$0xf0] }
 0x181   :  { %v8414_v41 = vld [vmem:[#allocation8 + $0xa40] sm:$0xf]  ;;  %v8159_v53 = vor.u32 %v9672_v40, %v8158_v37  ;;  %5276 = vmatpush.bf16.msrb.mxu2 %v8703_v45  ;;  %v7267_v37 = vor.u32 %v9444_v27, %v7264_v28  ;;  %v9436_v40 = vld [vmem:[#allocation8 + $0x104] sm:$0xf] }
 0x182   :  { %v9736_v43 = vld [vmem:[#allocation8 + $0xa5c] sm:$0xf0]  ;;  %v9476_v27 = vld [vmem:[#allocation8 + $0x244] sm:$0xf] }
 0x183   :  { %v8670_v46 = vld [vmem:[#allocation8 + $0xc40] sm:$0xf]  ;;  %v8415_v54 = vor.u32 %v9736_v43, %v8414_v41  ;;  %5251 = vmatpush.bf16.msrb.mxu0 %v8159_v53  ;;  %v7232_v41 = vld [vmem:[#allocation8 + $0x120] sm:$0xf0] }
 0x184   :  { %v9800_v47 = vld [vmem:[#allocation8 + $0xc5c] sm:$0xf0]  ;;  %v9500_v43 = vld [vmem:[#allocation8 + $0x304] sm:$0xf]  ;;  %v7235_v53 = vor.u32 %v9436_v40, %v7232_v41 }
 0x185   :  { %v8126_v48 = vld [vmem:[#allocation8 + $0x800] sm:$0xf]  ;;  %v8671_v62 = vor.u32 %v9800_v47, %v8670_v46  ;;  %5264 = vmatpush.bf16.msrb.mxu1 %v8415_v54  ;;  %v364_v47 = vperm.slane %v10227_v4, 5  ;;  %v7491_v54 = vor.u32 %v9500_v43, %v7488_v44  ;;  %v7104_v40 = vld [vmem:[#allocation8 + $0x20] sm:$0xf0] }
 0x186   :  { %v9664_v38 = vld [vmem:[#allocation8 + $0x81c] sm:$0xf0]  ;;  %v9468_v41 = vld [vmem:[#allocation8 + $0x204] sm:$0xf] }
 0x187   :  { %v8382_v49 = vld [vmem:[#allocation8 + $0xa00] sm:$0xf]  ;;  %v8127_v10 = vor.u32 %v9664_v38, %v8126_v48  ;;  %5277 = vmatpush.bf16.msrb.mxu2 %v8671_v62  ;;  %v7779_v48 = vor.u32 %v9572_v34, %v7776_v35  ;;  %v1925_v0 = vadd.f32 %v1924_v60, %v364_v47  ;;  %v9540_v35 = vld [vmem:[#allocation8 + $0x444] sm:$0xf] }
 0x188   :  { %v9728_v57 = vld [vmem:[#allocation8 + $0xa1c] sm:$0xf0]  ;;  %v7648_v43 = vld [vmem:[#allocation8 + $0x460] sm:$0xf0] }
 0x189   :  { %v9118_v1 = vld [vmem:[#allocation8 + $0xfc0] sm:$0xf]  ;;  %v8383_v11 = vor.u32 %v9728_v57, %v8382_v49  ;;  %5252 = vmatpush.bf16.msrb.mxu0 %v8127_v10  ;;  %v9564_v49 = vld [vmem:[#allocation8 + $0x504] sm:$0xf] }
 0x18a   :  { %v9912_v56 = vld [vmem:[#allocation8 + $0xfdc] sm:$0xf0]  ;;  %v9428_v57 = vld [vmem:[#allocation8 + $0xc4] sm:$0xf] }
 0x18b   :  { %v8638_v2 = vld [vmem:[#allocation8 + $0xc00] sm:$0xf]  ;;  %v9119_v5 = vor.u32 %v9912_v56, %v9118_v1  ;;  %5265 = vmatpush.bf16.msrb.mxu1 %v8383_v11  ;;  %v1937_v1 = vpop.f32.mrf.mxu1  ;;  %v7747_v56 = vor.u32 %v9564_v49, %v7744_v6  ;;  %v7203_v10 = vor.u32 %v9428_v57, %v7200_v58  ;;  %v7459_v11 = vor.u32 %v9492_v59, %v7456_v61  ;;  %v9716_v47 = vld [vmem:[#allocation8 + $0x9c4] sm:$0xf]  ;;  %v1952_v58 = vpop.f32.mrf.mxu2 }
 0x18c   :  { %v9792_v3 = vld [vmem:[#allocation8 + $0xc1c] sm:$0xf0]  ;;  %5253 = vmatmul.bf16.vlgmr.msrb.gmra.mxu0 %v10230_v19  ;;  %v1938_v7 = vadd.f32 %v1937_v1, %v1925_v0  ;;  %v9780_v49 = vld [vmem:[#allocation8 + $0xbc4] sm:$0xf]  ;;  %v7651_v59 = vor.u32 %v9540_v35, %v7648_v43 }
 0x18d   :  { %5284 = vmatpush.bf16.msrb.mxu3 %v9119_v5  ;;  %v8639_v15 = vor.u32 %v9792_v3, %v8638_v2  ;;  %v9086_v30 = vld [vmem:[#allocation8 + $0xf80] sm:$0xf]  ;;  %5297 = vmatpush.bf16.msra.mxu0 %v7331_v25  ;;  %v9556_v3 = vld [vmem:[#allocation8 + $0x4c4] sm:$0xf] }
 0x18e   :  { %v9904_v18 = vld [vmem:[#allocation8 + $0xf9c] sm:$0xf0]  ;;  %v7712_v5 = vld [vmem:[#allocation8 + $0x4e0] sm:$0xf0] }
 0x18f   :  { %v9087_v21 = vor.u32 %v9904_v18, %v9086_v30  ;;  %5310 = vmatpush.bf16.msra.mxu1 %v7587_v13  ;;  %5278 = vmatpush.bf16.msrb.mxu2 %v8639_v15  ;;  %v9054_v31 = vld [vmem:[#allocation8 + $0xf40] sm:$0xf]  ;;  %v9484_v25 = vld [vmem:[#allocation8 + $0x284] sm:$0xf]  ;;  %v7715_v17 = vor.u32 %v9556_v3, %v7712_v5  ;;  %v1951_v30 = vadd.f32 %v1950_v8, %v1938_v7  ;;  %v1963_v18 = vpop.f32.mrf.mxu3 }
 0x190   :  { %v9896_v32 = vld [vmem:[#allocation8 + $0xf5c] sm:$0xf0]  ;;  %v7424_v13 = vld [vmem:[#allocation8 + $0x2a0] sm:$0xf0] }
 0x191   :  { %5285 = vmatpush.bf16.msrb.mxu3 %v9087_v21  ;;  %v9055_v36 = vor.u32 %v9896_v32, %v9054_v31  ;;  %5298 = vmatpush.bf16.msra.mxu0 %v7299_v24  ;;  %v9022_v45 = vld [vmem:[#allocation8 + $0xf00] sm:$0xf]  ;;  %v7680_v21 = vld [vmem:[#allocation8 + $0x4a0] sm:$0xf0]  ;;  %v7427_v23 = vor.u32 %v9484_v25, %v7424_v13  ;;  %v1964_v28 = vadd.f32 %v1963_v18, %v1951_v30 }
 0x192   :  { %v9888_v46 = vld [vmem:[#allocation8 + $0xf1c] sm:$0xf0]  ;;  %v9412_v24 = vld [vmem:[#allocation8 + $0x44] sm:$0xf] }
 0x193   :  { %5323 = vmatpush.bf16.msra.mxu2 %v7843_v20  ;;  %5311 = vmatpush.bf16.msra.mxu1 %v7555_v26  ;;  %v9023_v38 = vor.u32 %v9888_v46, %v9022_v45  ;;  %v8990_v62 = vld [vmem:[#allocation8 + $0xec0] sm:$0xf]  ;;  %v9548_v20 = vld [vmem:[#allocation8 + $0x484] sm:$0xf]  ;;  %vm2076_vm5 = vcmp.gt.f32.partialorder %v1964_v28, 0.0  ;;  %v7395_v45 = vor.u32 %v9476_v27, %v7392_v42 }
 0x194   :  { %v9880_v63 = vld [vmem:[#allocation8 + $0xedc] sm:$0xf0]  ;;  %v7136_v26 = vld [vmem:[#allocation8 + $0x60] sm:$0xf0] }
 0x195   :  { %5286 = vmatpush.bf16.msrb.mxu3 %v9055_v36  ;;  %5299 = vmatpush.bf16.msra.mxu0 %v7267_v37  ;;  %v8991_v2 = vor.u32 %v9880_v63, %v8990_v62  ;;  %v8958_v14 = vld [vmem:[#allocation8 + $0xe80] sm:$0xf]  ;;  %v7683_v36 = vor.u32 %v9548_v20, %v7680_v21  ;;  %v2084_v37 = vmul.f32 0.01, %v1964_v28  ;;  %v7139_v44 = vor.u32 %v9412_v24, %v7136_v26  ;;  %v7360_v46 = vld [vmem:[#allocation8 + $0x220] sm:$0xf0] }
 0x196   :  { %v9872_v16 = vld [vmem:[#allocation8 + $0xe9c] sm:$0xf0]  ;;  %v8608_v57 = vld [vmem:[#allocation8 + $0xbe0] sm:$0xf0]  ;;  %v7363_v3 = vor.u32 %v9468_v41, %v7360_v46 }
 0x197   :  { %5324 = vmatpush.bf16.msra.mxu2 %v7811_v33  ;;  %5312 = vmatpush.bf16.msra.mxu1 %v7523_v39  ;;  %v8959_v15 = vor.u32 %v9872_v16, %v8958_v14  ;;  %v8926_v31 = vld [vmem:[#allocation8 + $0xe40] sm:$0xf]  ;;  %v1939_v33 = vpop.f32.mrf.mxu1  ;;  %v9404_v39 = vld [vmem:[#allocation8 + $0x4] sm:$0xf]  ;;  %v1965_v63 = vpop.f32.mrf.mxu3  ;;  %v8611_v7 = vor.u32 %v9780_v49, %v8608_v57 }
 0x198   :  { %v9864_v32 = vld [vmem:[#allocation8 + $0xe5c] sm:$0xf0]  ;;  %v9652_v61 = vld [vmem:[#allocation8 + $0x7c4] sm:$0xf] }
 0x199   :  { %5287 = vmatpush.bf16.msrb.mxu3 %v9023_v38  ;;  %5300 = vmatpush.bf16.msra.mxu0 %v7235_v53  ;;  %v8927_v34 = vor.u32 %v9864_v32, %v8926_v31  ;;  %v2092_v38 = vsel %vm2076_vm5, %v1964_v28, %v2084_v37  ;;  %v8894_v6 = vld [vmem:[#allocation8 + $0xe00] sm:$0xf]  ;;  %v8096_v62 = vld [vmem:[#allocation8 + $0x7e0] sm:$0xf0] }
 0x19a   :  { %v9856_v53 = vld [vmem:[#allocation8 + $0xe1c] sm:$0xf0]  ;;  %v9532_v0 = vld [vmem:[#allocation8 + $0x404] sm:$0xf] }
 0x19b   :  { %5325 = vmatpush.bf16.msra.mxu2 %v7779_v48  ;;  %5313 = vmatpush.bf16.msra.mxu1 %v7491_v54  ;;  %v8352_v48 = vld [vmem:[#allocation8 + $0x9e0] sm:$0xf0]  ;;  %v10234_v54 = vpack.c.bf16 %v2092_v38, %v2092_v38  ;;  %v8895_v60 = vor.u32 %v9856_v53, %v8894_v6 }
 0x19c   :  { %v7616_v1 = vld [vmem:[#allocation8 + $0x420] sm:$0xf0]  ;;  %v8355_v5 = vor.u32 %v9716_v47, %v8352_v48  ;;  %v2002_v63 = vpop.f32.mrf.mxu2 }
 0x19d   :  { %5288 = vmatpush.bf16.msrb.mxu3 %v8991_v2  ;;  %5301 = vmatpush.bf16.msra.mxu0 %v7203_v10  ;;  %v7107_v2 = vor.u32 %v9404_v39, %v7104_v40  ;;  %v9708_v10 = vld [vmem:[#allocation8 + $0x984] sm:$0xf]  ;;  %v7619_v25 = vor.u32 %v9532_v0, %v7616_v1 }
 0x19e   :  { %5266 = vmatmul.bf16.vlgmr.msrb.gmra.mxu1 %v10234_v54  ;;  %v9772_v12 = vld [vmem:[#allocation8 + $0xb84] sm:$0xf] }
 0x19f   :  { %5326 = vmatpush.bf16.msra.mxu2 %v7747_v56  ;;  %5314 = vmatpush.bf16.msra.mxu1 %v7459_v11  ;;  %v8099_v56 = vor.u32 %v9652_v61, %v8096_v62  ;;  %v8320_v11 = vld [vmem:[#allocation8 + $0x9a0] sm:$0xf0]  ;;  %v1989_v48 = vpop.f32.mrf.mxu1  ;;  %v2015_v1 = vpop.f32.mrf.mxu3 }
 0x1a0   :  { %v8576_v9 = vld [vmem:[#allocation8 + $0xba0] sm:$0xf0]  ;;  %v8323_v8 = vor.u32 %v9708_v10, %v8320_v11 }
 0x1a1   :  { %5289 = vmatpush.bf16.msrb.mxu3 %v8959_v15  ;;  %5302 = vmatpush.bf16.msra.mxu0 %v7171_v22  ;;  %v9644_v13 = vld [vmem:[#allocation8 + $0x784] sm:$0xf] }
 0x1a2   :  { %v8064_v14 = vld [vmem:[#allocation8 + $0x7a0] sm:$0xf0] }
 0x1a3   :  { %5327 = vmatpush.bf16.msra.mxu2 %v7715_v17  ;;  %5315 = vmatpush.bf16.msra.mxu1 %v7427_v23  ;;  %v8067_v16 = vor.u32 %v9644_v13, %v8064_v14  ;;  %v8579_v17 = vor.u32 %v9772_v12, %v8576_v9  ;;  %v9700_v15 = vld [vmem:[#allocation8 + $0x944] sm:$0xf] }
 0x1a4   :  { %v8288_v30 = vld [vmem:[#allocation8 + $0x960] sm:$0xf0] }
 0x1a5   :  { %5290 = vmatpush.bf16.msrb.mxu3 %v8927_v34  ;;  %5303 = vmatpush.bf16.msra.mxu0 %v7139_v44  ;;  %v9764_v18 = vld [vmem:[#allocation8 + $0xb44] sm:$0xf]  ;;  %v8291_v24 = vor.u32 %v9700_v15, %v8288_v30 }
 0x1a6   :  { %v8544_v20 = vld [vmem:[#allocation8 + $0xb60] sm:$0xf0] }
 0x1a7   :  { %5328 = vmatpush.bf16.msra.mxu2 %v7683_v36  ;;  %5316 = vmatpush.bf16.msra.mxu1 %v7395_v45  ;;  %v9636_v21 = vld [vmem:[#allocation8 + $0x744] sm:$0xf]  ;;  %v8547_v26 = vor.u32 %v9764_v18, %v8544_v20  ;;  %v365_v36 = vperm.slane %v10227_v4, 6  ;;  %v1976_v45 = vpop.f32.mrf.mxu0 }
 0x1a8   :  { %v8032_v22 = vld [vmem:[#allocation8 + $0x760] sm:$0xf0] }
 0x1a9   :  { %5291 = vmatpush.bf16.msrb.mxu3 %v8895_v60  ;;  %5304 = vmatpush.bf16.msra.mxu0 %v7107_v2  ;;  %v8035_v23 = vor.u32 %v9636_v21, %v8032_v22  ;;  %v9692_v27 = vld [vmem:[#allocation8 + $0x904] sm:$0xf]  ;;  %v1977_v47 = vadd.f32 %v1976_v45, %v365_v36  ;;  %v2004_v36 = vpop.f32.mrf.mxu2 }
 0x1aa   :  { %v8256_v28 = vld [vmem:[#allocation8 + $0x920] sm:$0xf0] }
 0x1ab   :  { %5329 = vmatpush.bf16.msra.mxu2 %v7651_v59  ;;  %5317 = vmatpush.bf16.msra.mxu1 %v7363_v3  ;;  %v9756_v42 = vld [vmem:[#allocation8 + $0xb04] sm:$0xf]  ;;  %v8259_v34 = vor.u32 %v9692_v27, %v8256_v28  ;;  %v1990_v58 = vadd.f32 %v1989_v48, %v1977_v47  ;;  %v7558_v47 = vld [vmem:[#allocation8 + $0x388] sm:$0xf] }
 0x1ac   :  { %5305 = vmatmul.bf16.vlgmr.msra.gmra.mxu0 %v10215_v50  ;;  %v8512_v29 = vld [vmem:[#allocation8 + $0xb20] sm:$0xf0]  ;;  %v9521_v48 = vld [vmem:[#allocation8 + $0x3a4] sm:$0xf0] }
 0x1ad   :  { %5336 = vmatpush.bf16.msra.mxu3 %v8099_v56  ;;  %5349 = vmatpush.bf16.msrb.mxu0 %v8355_v5  ;;  %v9628_v31 = vld [vmem:[#allocation8 + $0x704] sm:$0xf]  ;;  %v8515_v35 = vor.u32 %v9756_v42, %v8512_v29  ;;  %v2003_v0 = vadd.f32 %v2002_v63, %v1990_v58  ;;  %v9465_v42 = vld [vmem:[#allocation8 + $0x1e4] sm:$0xf0] }
 0x1ae   :  { %v8000_v32 = vld [vmem:[#allocation8 + $0x720] sm:$0xf0]  ;;  %5318 = vmatmul.bf16.vlgmr.msra.gmra.mxu1 %v10217_v52  ;;  %v7590_v29 = vld [vmem:[#allocation8 + $0x3c8] sm:$0xf] }
 0x1af   :  { %5362 = vmatpush.bf16.msrb.mxu1 %v8611_v7  ;;  %5330 = vmatpush.bf16.msra.mxu2 %v7619_v25  ;;  %v8003_v33 = vor.u32 %v9628_v31, %v8000_v32  ;;  %v9684_v37 = vld [vmem:[#allocation8 + $0x8c4] sm:$0xf]  ;;  %v2016_v9 = vadd.f32 %v2015_v1, %v2003_v0  ;;  %v1978_v25 = vpop.f32.mrf.mxu0  ;;  %v9529_v31 = vld [vmem:[#allocation8 + $0x3e4] sm:$0xf0] }
 0x1b0   :  { %v8224_v39 = vld [vmem:[#allocation8 + $0x8e0] sm:$0xf0] }
 0x1b1   :  { %5337 = vmatpush.bf16.msra.mxu3 %v8067_v16  ;;  %5350 = vmatpush.bf16.msrb.mxu0 %v8323_v8  ;;  %v9748_v40 = vld [vmem:[#allocation8 + $0xac4] sm:$0xf]  ;;  %v8227_v38 = vor.u32 %v9684_v37, %v8224_v39  ;;  %v1991_v8 = vpop.f32.mrf.mxu1  ;;  %vm2077_vm6 = vcmp.gt.f32.partialorder %v2016_v9, 0.0  ;;  %v2085_v18 = vmul.f32 0.01, %v2016_v9 }
 0x1b2   :  { %v8480_v41 = vld [vmem:[#allocation8 + $0xae0] sm:$0xf0]  ;;  %v9497_v8 = vld [vmem:[#allocation8 + $0x2e4] sm:$0xf0] }
 0x1b3   :  { %5363 = vmatpush.bf16.msrb.mxu1 %v8579_v17  ;;  %v9620_v43 = vld [vmem:[#allocation8 + $0x6c4] sm:$0xf]  ;;  %v8483_v49 = vor.u32 %v9748_v40, %v8480_v41  ;;  %v2093_v27 = vsel %vm2077_vm6, %v2016_v9, %v2085_v18  ;;  %v2017_v40 = vpop.f32.mrf.mxu3 }
 0x1b4   :  { %v7968_v44 = vld [vmem:[#allocation8 + $0x6e0] sm:$0xf0]  ;;  %v7398_v40 = vld [vmem:[#allocation8 + $0x248] sm:$0xf] }
 0x1b5   :  { %5338 = vmatpush.bf16.msra.mxu3 %v8035_v23  ;;  %5351 = vmatpush.bf16.msrb.mxu0 %v8291_v24  ;;  %v7971_v46 = vor.u32 %v9620_v43, %v7968_v44  ;;  %v9676_v6 = vld [vmem:[#allocation8 + $0x884] sm:$0xf]  ;;  %v7334_v23 = vld [vmem:[#allocation8 + $0x1c8] sm:$0xf]  ;;  %v7591_v43 = vor.u32 %v9529_v31, %v7590_v29 }
 0x1b6   :  { %v8192_v53 = vld [vmem:[#allocation8 + $0x8a0] sm:$0xf0]  ;;  %v7335_v41 = vor.u32 %v9465_v42, %v7334_v23  ;;  %v7302_v44 = vld [vmem:[#allocation8 + $0x188] sm:$0xf] }
 0x1b7   :  { %5364 = vmatpush.bf16.msrb.mxu1 %v8547_v26  ;;  %v9740_v57 = vld [vmem:[#allocation8 + $0xa84] sm:$0xf]  ;;  %v8195_v56 = vor.u32 %v9676_v6, %v8192_v53  ;;  %v7559_v53 = vor.u32 %v9521_v48, %v7558_v47  ;;  %v7174_v23 = vld [vmem:[#allocation8 + $0x88] sm:$0xf] }
 0x1b8   :  { %v8448_v59 = vld [vmem:[#allocation8 + $0xaa0] sm:$0xf0] }
 0x1b9   :  { %5339 = vmatpush.bf16.msra.mxu3 %v8003_v33  ;;  %5352 = vmatpush.bf16.msrb.mxu0 %v8259_v34  ;;  %v9612_v60 = vld [vmem:[#allocation8 + $0x684] sm:$0xf]  ;;  %v8451_v2 = vor.u32 %v9740_v57, %v8448_v59  ;;  %v10240_v33 = vpack.c.bf16 %v2093_v27, %v2093_v27  ;;  %v7270_v57 = vld [vmem:[#allocation8 + $0x148] sm:$0xf] }
 0x1ba   :  { %v7936_v61 = vld [vmem:[#allocation8 + $0x6a0] sm:$0xf0]  ;;  %v9449_v59 = vld [vmem:[#allocation8 + $0x164] sm:$0xf0] }
 0x1bb   :  { %5365 = vmatpush.bf16.msrb.mxu1 %v8515_v35  ;;  %v7939_v62 = vor.u32 %v9612_v60, %v7936_v61  ;;  %v9668_v3 = vld [vmem:[#allocation8 + $0x844] sm:$0xf]  ;;  %5279 = vmatmul.bf16.vlgmr.msrb.gmra.mxu2 %v10240_v33  ;;  %v7526_v60 = vld [vmem:[#allocation8 + $0x348] sm:$0xf]  ;;  %v7271_v0 = vor.u32 %v9449_v59, %v7270_v57 }
 0x1bc   :  { %v8160_v5 = vld [vmem:[#allocation8 + $0x860] sm:$0xf0]  ;;  %v9513_v61 = vld [vmem:[#allocation8 + $0x364] sm:$0xf0] }
 0x1bd   :  { %5340 = vmatpush.bf16.msra.mxu3 %v7971_v46  ;;  %5353 = vmatpush.bf16.msrb.mxu0 %v8227_v38  ;;  %v9732_v7 = vld [vmem:[#allocation8 + $0xa44] sm:$0xf]  ;;  %v8163_v20 = vor.u32 %v9668_v3, %v8160_v5  ;;  %v9457_v46 = vld [vmem:[#allocation8 + $0x1a4] sm:$0xf0]  ;;  %v7527_v1 = vor.u32 %v9513_v61, %v7526_v60 }
 0x1be   :  { %v8416_v10 = vld [vmem:[#allocation8 + $0xa60] sm:$0xf0]  ;;  %v7303_v6 = vor.u32 %v9457_v46, %v7302_v44  ;;  %v9441_v3 = vld [vmem:[#allocation8 + $0x124] sm:$0xf0] }
 0x1bf   :  { %5366 = vmatpush.bf16.msrb.mxu1 %v8483_v49  ;;  %v9604_v11 = vld [vmem:[#allocation8 + $0x644] sm:$0xf]  ;;  %v8419_v21 = vor.u32 %v9732_v7, %v8416_v10  ;;  %v7494_v5 = vld [vmem:[#allocation8 + $0x308] sm:$0xf]  ;;  %v366_v10 = vperm.slane %v10227_v4, 7 }
 0x1c0   :  { %v7904_v12 = vld [vmem:[#allocation8 + $0x660] sm:$0xf0]  ;;  %v9505_v7 = vld [vmem:[#allocation8 + $0x324] sm:$0xf0] }
 0x1c1   :  { %5341 = vmatpush.bf16.msra.mxu3 %v7939_v62  ;;  %v9844_v13 = vld [vmem:[#allocation8 + $0xdc4] sm:$0xf]  ;;  %v7907_v16 = vor.u32 %v9604_v11, %v7904_v12  ;;  %5354 = vmatpush.bf16.msrb.mxu0 %v8195_v56  ;;  %v7238_v56 = vld [vmem:[#allocation8 + $0x108] sm:$0xf]  ;;  %v7495_v25 = vor.u32 %v9505_v7, %v7494_v5 }
 0x1c2   :  { %v8864_v14 = vld [vmem:[#allocation8 + $0xde0] sm:$0xf0]  ;;  %v7239_v9 = vor.u32 %v9441_v3, %v7238_v56  ;;  %v9489_v27 = vld [vmem:[#allocation8 + $0x2a4] sm:$0xf0] }
 0x1c3   :  { %v9660_v17 = vld [vmem:[#allocation8 + $0x804] sm:$0xf]  ;;  %5367 = vmatpush.bf16.msrb.mxu1 %v8451_v2  ;;  %v8867_v28 = vor.u32 %v9844_v13, %v8864_v14  ;;  %v7206_v13 = vld [vmem:[#allocation8 + $0xc8] sm:$0xf] }
 0x1c4   :  { %v8128_v15 = vld [vmem:[#allocation8 + $0x820] sm:$0xf0]  ;;  %v9433_v14 = vld [vmem:[#allocation8 + $0xe4] sm:$0xf0] }
 0x1c5   :  { %v9724_v30 = vld [vmem:[#allocation8 + $0xa04] sm:$0xf]  ;;  %5342 = vmatpush.bf16.msra.mxu3 %v7907_v16  ;;  %5355 = vmatpush.bf16.msrb.mxu0 %v8163_v20  ;;  %v8131_v37 = vor.u32 %v9660_v17, %v8128_v15  ;;  %v7462_v16 = vld [vmem:[#allocation8 + $0x2c8] sm:$0xf]  ;;  %v2028_v17 = vpop.f32.mrf.mxu0  ;;  %v2041_v15 = vpop.f32.mrf.mxu1  ;;  %v7207_v4 = vor.u32 %v9433_v14, %v7206_v13 }
 0x1c6   :  { %v8384_v22 = vld [vmem:[#allocation8 + $0xa20] sm:$0xf0]  ;;  %5375 = vmatpush.bf16.msrb.mxu2 %v8867_v28  ;;  %v2029_v18 = vadd.f32 %v2028_v17, %v366_v10  ;;  %v9593_v59 = vld [vmem:[#allocation8 + $0x5e4] sm:$0xf0] }
 0x1c7   :  { %v9596_v24 = vld [vmem:[#allocation8 + $0x604] sm:$0xf]  ;;  %5368 = vmatpush.bf16.msrb.mxu1 %v8419_v21  ;;  %v8387_v39 = vor.u32 %v9724_v30, %v8384_v22  ;;  %v7463_v22 = vor.u32 %v9497_v8, %v7462_v16  ;;  %v7110_v60 = vld [vmem:[#allocation8 + $0x8] sm:$0xf] }
 0x1c8   :  { %v7872_v26 = vld [vmem:[#allocation8 + $0x620] sm:$0xf0]  ;;  %v2042_v28 = vadd.f32 %v2041_v15, %v2029_v18  ;;  %v9409_v61 = vld [vmem:[#allocation8 + $0x24] sm:$0xf0] }
 0x1c9   :  { %v7875_v32 = vor.u32 %v9596_v24, %v7872_v26  ;;  %v9836_v34 = vld [vmem:[#allocation8 + $0xd84] sm:$0xf]  ;;  %5356 = vmatpush.bf16.msrb.mxu0 %v8131_v37  ;;  %v9425_v24 = vld [vmem:[#allocation8 + $0xa4] sm:$0xf0]  ;;  %v2067_v37 = vpop.f32.mrf.mxu3 }
 0x1ca   :  { %v8832_v35 = vld [vmem:[#allocation8 + $0xda0] sm:$0xf0]  ;;  %v7430_v26 = vld [vmem:[#allocation8 + $0x288] sm:$0xf] }
 0x1cb   :  { %5343 = vmatpush.bf16.msra.mxu3 %v7875_v32  ;;  %v8835_v45 = vor.u32 %v9836_v34, %v8832_v35  ;;  %v9828_v38 = vld [vmem:[#allocation8 + $0xd44] sm:$0xf]  ;;  %5369 = vmatpush.bf16.msrb.mxu1 %v8387_v39  ;;  %v7175_v32 = vor.u32 %v9425_v24, %v7174_v23  ;;  %v7431_v36 = vor.u32 %v9489_v27, %v7430_v26  ;;  %v7142_v34 = vld [vmem:[#allocation8 + $0x48] sm:$0xf]  ;;  %v2054_v35 = vpop.f32.mrf.mxu2 }
 0x1cc   :  { %v8800_v49 = vld [vmem:[#allocation8 + $0xd60] sm:$0xf0]  ;;  %5357 = vmatmul.bf16.vlgmr.msrb.gmra.mxu0 %v10230_v19  ;;  %5331 = vmatmul.bf16.vlgmr.msra.gmra.mxu2 %v10219_v55  ;;  %v9417_v39 = vld [vmem:[#allocation8 + $0x64] sm:$0xf0] }
 0x1cd   :  { %5401 = vmatpush.bf16.msra.mxu0 %v7335_v41  ;;  %5376 = vmatpush.bf16.msrb.mxu2 %v8835_v45  ;;  %v8803_v58 = vor.u32 %v9828_v38, %v8800_v49  ;;  %v9820_v62 = vld [vmem:[#allocation8 + $0xd04] sm:$0xf]  ;;  %v9481_v41 = vld [vmem:[#allocation8 + $0x264] sm:$0xf0]  ;;  %v2030_v44 = vpop.f32.mrf.mxu0  ;;  %v2043_v45 = vpop.f32.mrf.mxu1  ;;  %v7143_v57 = vor.u32 %v9417_v39, %v7142_v34 }
 0x1ce   :  { %5370 = vmatmul.bf16.vlgmr.msrb.gmra.mxu1 %v10234_v54  ;;  %v8768_v63 = vld [vmem:[#allocation8 + $0xd20] sm:$0xf0]  ;;  %v8614_v5 = vld [vmem:[#allocation8 + $0xbc8] sm:$0xf] }
 0x1cf   :  { %5414 = vmatpush.bf16.msra.mxu1 %v7591_v43  ;;  %v8771_v2 = vor.u32 %v9820_v62, %v8768_v63  ;;  %v9812_v11 = vld [vmem:[#allocation8 + $0xcc4] sm:$0xf]  ;;  %v2055_v43 = vadd.f32 %v2054_v35, %v2042_v28  ;;  %v7366_v62 = vld [vmem:[#allocation8 + $0x208] sm:$0xf] }
 0x1d0   :  { %v8736_v12 = vld [vmem:[#allocation8 + $0xce0] sm:$0xf0]  ;;  %v9473_v63 = vld [vmem:[#allocation8 + $0x224] sm:$0xf0] }
 0x1d1   :  { %5402 = vmatpush.bf16.msra.mxu0 %v7303_v6  ;;  %5377 = vmatpush.bf16.msrb.mxu2 %v8803_v58  ;;  %v8739_v30 = vor.u32 %v9812_v11, %v8736_v12  ;;  %v9804_v20 = vld [vmem:[#allocation8 + $0xc84] sm:$0xf]  ;;  %v7846_v6 = vld [vmem:[#allocation8 + $0x5c8] sm:$0xf]  ;;  %v7399_v58 = vor.u32 %v9481_v41, %v7398_v40  ;;  %v7111_v12 = vor.u32 %v9409_v61, %v7110_v60  ;;  %v2069_v16 = vpop.f32.mrf.mxu3 }
 0x1d2   :  { %v8704_v21 = vld [vmem:[#allocation8 + $0xca0] sm:$0xf0]  ;;  %v7847_v3 = vor.u32 %v9593_v59, %v7846_v6  ;;  %v9785_v7 = vld [vmem:[#allocation8 + $0xbe4] sm:$0xf0]  ;;  %v7367_v8 = vor.u32 %v9473_v63, %v7366_v62 }
 0x1d3   :  { %5415 = vmatpush.bf16.msra.mxu1 %v7559_v53  ;;  %v8707_v42 = vor.u32 %v9804_v20, %v8704_v21  ;;  %v9796_v29 = vld [vmem:[#allocation8 + $0xc44] sm:$0xf]  ;;  %v2068_v53 = vadd.f32 %v2067_v37, %v2055_v43  ;;  %v2056_v14 = vpop.f32.mrf.mxu2  ;;  %v8615_v18 = vor.u32 %v9785_v7, %v8614_v5  ;;  %v8326_v20 = vld [vmem:[#allocation8 + $0x988] sm:$0xf] }
 0x1d4   :  { %v8672_v31 = vld [vmem:[#allocation8 + $0xc60] sm:$0xf0]  ;;  %v9713_v21 = vld [vmem:[#allocation8 + $0x9a4] sm:$0xf0] }
 0x1d5   :  { %5403 = vmatpush.bf16.msra.mxu0 %v7271_v0  ;;  %5378 = vmatpush.bf16.msrb.mxu2 %v8771_v2  ;;  %v8675_v46 = vor.u32 %v9796_v29, %v8672_v31  ;;  %v9788_v47 = vld [vmem:[#allocation8 + $0xc04] sm:$0xf]  ;;  %v8358_v0 = vld [vmem:[#allocation8 + $0x9c8] sm:$0xf]  ;;  %vm2078_vm7 = vcmp.gt.f32.partialorder %v2068_v53, 0.0  ;;  %v8327_v28 = vor.u32 %v9713_v21, %v8326_v20 }
 0x1d6   :  { %v8640_v48 = vld [vmem:[#allocation8 + $0xc20] sm:$0xf0]  ;;  %v9721_v2 = vld [vmem:[#allocation8 + $0x9e4] sm:$0xf0] }
 0x1d7   :  { %5416 = vmatpush.bf16.msra.mxu1 %v7527_v1  ;;  %v9908_v38 = vld [vmem:[#allocation8 + $0xfc4] sm:$0xf]  ;;  %v2086_v1 = vmul.f32 0.01, %v2068_v53  ;;  %v8643_v56 = vor.u32 %v9788_v47, %v8640_v48  ;;  %v8359_v17 = vor.u32 %v9721_v2, %v8358_v0  ;;  %v9777_v23 = vld [vmem:[#allocation8 + $0xba4] sm:$0xf0]  ;;  %v5202_v2 = vpop.f32.mrf.mxu0 }
 0x1d8   :  { %v9120_v49 = vld [vmem:[#allocation8 + $0xfe0] sm:$0xf0]  ;;  %v7782_v26 = vld [vmem:[#allocation8 + $0x548] sm:$0xf] }
 0x1d9   :  { %5404 = vmatpush.bf16.msra.mxu0 %v7239_v9  ;;  %5379 = vmatpush.bf16.msrb.mxu2 %v8739_v30  ;;  %v2094_v10 = vsel %vm2078_vm7, %v2068_v53, %v2086_v1  ;;  %v9123_v11 = vor.u32 %v9908_v38, %v9120_v49  ;;  %v7814_v9 = vld [vmem:[#allocation8 + $0x588] sm:$0xf]  ;;  %v9900_v15 = vld [vmem:[#allocation8 + $0xf84] sm:$0xf] }
 0x1da   :  { %v10247_v13 = vpack.c.bf16 %v2094_v10, %v2094_v10  ;;  %v9088_v30 = vld [vmem:[#allocation8 + $0xfa0] sm:$0xf0]  ;;  %v9577_v27 = vld [vmem:[#allocation8 + $0x564] sm:$0xf0] }
 0x1db   :  { %5417 = vmatpush.bf16.msra.mxu1 %v7495_v25  ;;  %v9585_v25 = vld [vmem:[#allocation8 + $0x5a4] sm:$0xf0]  ;;  %v9091_v24 = vor.u32 %v9900_v15, %v9088_v30  ;;  %v9056_v29 = vld [vmem:[#allocation8 + $0xf60] sm:$0xf0]  ;;  %v7783_v34 = vor.u32 %v9577_v27, %v7782_v26 }
 0x1dc   :  { %5292 = vmatmul.bf16.vlgmr.msrb.gmra.mxu3 %v10247_v13  ;;  %v8550_v35 = vld [vmem:[#allocation8 + $0xb48] sm:$0xf]  ;;  %v9884_v44 = vld [vmem:[#allocation8 + $0xf04] sm:$0xf] }
 0x1dd   :  { %5405 = vmatpush.bf16.msra.mxu0 %v7207_v4  ;;  %5380 = vmatpush.bf16.msrb.mxu2 %v8707_v42  ;;  %v7815_v4 = vor.u32 %v9585_v25, %v7814_v9  ;;  %v9892_v42 = vld [vmem:[#allocation8 + $0xf44] sm:$0xf]  ;;  %v9769_v37 = vld [vmem:[#allocation8 + $0xb64] sm:$0xf0] }
 0x1de   :  { %5388 = vmatpush.bf16.msrb.mxu3 %v9123_v11  ;;  %v9059_v39 = vor.u32 %v9892_v42, %v9056_v29  ;;  %v7750_v40 = vld [vmem:[#allocation8 + $0x508] sm:$0xf]  ;;  %v9024_v45 = vld [vmem:[#allocation8 + $0xf20] sm:$0xf0]  ;;  %v8551_v47 = vor.u32 %v9769_v37, %v8550_v35  ;;  %v5215_v11 = vpop.f32.mrf.mxu1 }
 0x1df   :  { %5418 = vmatpush.bf16.msra.mxu1 %v7463_v22  ;;  %v8582_v22 = vld [vmem:[#allocation8 + $0xb88] sm:$0xf]  ;;  %v9876_v62 = vld [vmem:[#allocation8 + $0xec4] sm:$0xf] }
 0x1e0   :  { %v8583_v31 = vor.u32 %v9777_v23, %v8582_v22  ;;  %v9569_v41 = vld [vmem:[#allocation8 + $0x524] sm:$0xf0]  ;;  %v8992_v63 = vld [vmem:[#allocation8 + $0xee0] sm:$0xf0] }
 0x1e1   :  { %5406 = vmatpush.bf16.msra.mxu0 %v7175_v32  ;;  %5381 = vmatpush.bf16.msrb.mxu2 %v8675_v46  ;;  %v8294_v32 = vld [vmem:[#allocation8 + $0x948] sm:$0xf]  ;;  %v10253_v46 = vld [vmem:[#allocation10] sm:$0xff]  ;;  %v7751_v49 = vor.u32 %v9569_v41, %v7750_v40 }
 0x1e2   :  { %5389 = vmatpush.bf16.msrb.mxu3 %v9091_v24  ;;  %v8262_v48 = vld [vmem:[#allocation8 + $0x908] sm:$0xf]  ;;  %v9868_v16 = vld [vmem:[#allocation8 + $0xe84] sm:$0xf] }
 0x1e3   :  { %5419 = vmatpush.bf16.msra.mxu1 %v7431_v36  ;;  %v9705_v36 = vld [vmem:[#allocation8 + $0x964] sm:$0xf0]  ;;  %v9860_v27 = vld [vmem:[#allocation8 + $0xe44] sm:$0xf] }
 0x1e4   :  { %v8295_v43 = vor.u32 %v9705_v36, %v8294_v32  ;;  %v9697_v38 = vld [vmem:[#allocation8 + $0x924] sm:$0xf0]  ;;  %v5228_v32 = vpop.f32.mrf.mxu2  ;;  %v5204_v36 = vpop.f32.mrf.mxu0 }
 0x1e5   :  { %5407 = vmatpush.bf16.msra.mxu0 %v7143_v57  ;;  %5382 = vmatpush.bf16.msrb.mxu2 %v8643_v56  ;;  %v8518_v6 = vld [vmem:[#allocation8 + $0xb08] sm:$0xf]  ;;  %v9027_v57 = vor.u32 %v9884_v44, %v9024_v45  ;;  %v8263_v61 = vor.u32 %v9697_v38, %v8262_v48  ;;  %v8896_v44 = vld [vmem:[#allocation8 + $0xe20] sm:$0xf0]  ;;  %v9509_v36 = vld [vmem:[#allocation8 + $0x34c] sm:$0xf] }
 0x1e6   :  { %v9761_v53 = vld [vmem:[#allocation8 + $0xb24] sm:$0xf0]  ;;  %5390 = vmatpush.bf16.msrb.mxu3 %v9059_v39  ;;  %v9852_v39 = vld [vmem:[#allocation8 + $0xe04] sm:$0xf]  ;;  %v5217_v41 = vpop.f32.mrf.mxu1 }
 0x1e7   :  { %5420 = vmatpush.bf16.msra.mxu1 %v7399_v58  ;;  %v2617_v58 = vperm.slane %v10253_v46, 0  ;;  %v7718_v59 = vld [vmem:[#allocation8 + $0x4c8] sm:$0xf]  ;;  %v8519_v0 = vor.u32 %v9761_v53, %v8518_v6 }
 0x1e8   :  { %5383 = vmatmul.bf16.vlgmr.msrb.gmra.mxu2 %v10240_v33  ;;  %v9561_v60 = vld [vmem:[#allocation8 + $0x4e4] sm:$0xf0] }
 0x1e9   :  { %5427 = vmatpush.bf16.msra.mxu2 %v7847_v3  ;;  %5408 = vmatpush.bf16.msra.mxu0 %v7111_v12  ;;  %v8230_v1 = vld [vmem:[#allocation8 + $0x8c8] sm:$0xf]  ;;  %v7719_v3 = vor.u32 %v9561_v60, %v7718_v59  ;;  %v5203_v10 = vadd.f32 %v5202_v2, %v2617_v58  ;;  %v8995_v12 = vor.u32 %v9876_v62, %v8992_v63  ;;  %v5241_v48 = vpop.f32.mrf.mxu3 }
 0x1ea   :  { %v9689_v56 = vld [vmem:[#allocation8 + $0x8e4] sm:$0xf0]  ;;  %5391 = vmatpush.bf16.msrb.mxu3 %v9027_v57 }
 0x1eb   :  { %5421 = vmatpush.bf16.msra.mxu1 %v7367_v8  ;;  %v8486_v5 = vld [vmem:[#allocation8 + $0xac8] sm:$0xf]  ;;  %v8231_v14 = vor.u32 %v9689_v56, %v8230_v1  ;;  %v8960_v8 = vld [vmem:[#allocation8 + $0xea0] sm:$0xf0]  ;;  %v9461_v1 = vld [vmem:[#allocation8 + $0x1cc] sm:$0xf]  ;;  %v8899_v56 = vor.u32 %v9852_v39, %v8896_v44 }
 0x1ec   :  { %5409 = vmatmul.bf16.vlgmr.msra.gmra.mxu0 %v10215_v50  ;;  %v9753_v7 = vld [vmem:[#allocation8 + $0xae4] sm:$0xf0]  ;;  %5344 = vmatmul.bf16.vlgmr.msra.gmra.mxu3 %v10221_v51  ;;  %v8963_v22 = vor.u32 %v9868_v16, %v8960_v8 }
 0x1ed   :  { %5453 = vmatpush.bf16.msrb.mxu0 %v8359_v17  ;;  %5428 = vmatpush.bf16.msra.mxu2 %v7815_v4  ;;  %v7686_v9 = vld [vmem:[#allocation8 + $0x488] sm:$0xf]  ;;  %v5216_v17 = vadd.f32 %v5215_v11, %v5203_v10  ;;  %v8487_v15 = vor.u32 %v9753_v7, %v8486_v5  ;;  %v9525_v5 = vld [vmem:[#allocation8 + $0x3cc] sm:$0xf] }
 0x1ee   :  { %5422 = vmatmul.bf16.vlgmr.msra.gmra.mxu1 %v10217_v52  ;;  %v9553_v25 = vld [vmem:[#allocation8 + $0x4a4] sm:$0xf0]  ;;  %5392 = vmatpush.bf16.msrb.mxu3 %v8995_v12  ;;  %v7592_v7 = vld [vmem:[#allocation8 + $0x3e8] sm:$0xf0] }
 0x1ef   :  { %5466 = vmatpush.bf16.msrb.mxu1 %v8615_v18  ;;  %v8198_v30 = vld [vmem:[#allocation8 + $0x888] sm:$0xf]  ;;  %v7687_v20 = vor.u32 %v9553_v25, %v7686_v9  ;;  %v5229_v40 = vadd.f32 %v5228_v32, %v5216_v17  ;;  %v7595_v8 = vor.u32 %v9525_v5, %v7592_v7  ;;  %v7272_v32 = vld [vmem:[#allocation8 + $0x168] sm:$0xf0] }
 0x1f0   :  { %v9681_v18 = vld [vmem:[#allocation8 + $0x8a4] sm:$0xf0] }
 0x1f1   :  { %5454 = vmatpush.bf16.msrb.mxu0 %v8327_v28  ;;  %5429 = vmatpush.bf16.msra.mxu2 %v7783_v34  ;;  %v8454_v21 = vld [vmem:[#allocation8 + $0xa88] sm:$0xf]  ;;  %v8199_v26 = vor.u32 %v9681_v18, %v8198_v30  ;;  %v8928_v28 = vld [vmem:[#allocation8 + $0xe60] sm:$0xf0]  ;;  %v10257_v57 = vadd.f32 %v5241_v48, %v5229_v40  ;;  %v9453_v30 = vld [vmem:[#allocation8 + $0x18c] sm:$0xf] }
 0x1f2   :  { %v9745_v4 = vld [vmem:[#allocation8 + $0xaa4] sm:$0xf0]  ;;  %5393 = vmatpush.bf16.msrb.mxu3 %v8963_v22  ;;  %v7304_v18 = vld [vmem:[#allocation8 + $0x1a8] sm:$0xf0]  ;;  %v5243_v22 = vpop.f32.mrf.mxu3 }
 0x1f3   :  { %5467 = vmatpush.bf16.msrb.mxu1 %v8583_v31  ;;  %v7654_v23 = vld [vmem:[#allocation8 + $0x448] sm:$0xf]  ;;  %v8455_v42 = vor.u32 %v9745_v4, %v8454_v21  ;;  %v7560_v21 = vld [vmem:[#allocation8 + $0x3a8] sm:$0xf0] }
 0x1f4   :  { %v9545_v24 = vld [vmem:[#allocation8 + $0x464] sm:$0xf0]  ;;  %v7240_v48 = vld [vmem:[#allocation8 + $0x128] sm:$0xf0] }
 0x1f5   :  { %5455 = vmatpush.bf16.msrb.mxu0 %v8295_v43  ;;  %5430 = vmatpush.bf16.msra.mxu2 %v7751_v49  ;;  %v8166_v29 = vld [vmem:[#allocation8 + $0x848] sm:$0xf]  ;;  %v7655_v34 = vor.u32 %v9545_v24, %v7654_v23  ;;  %v8931_v43 = vor.u32 %v9860_v27, %v8928_v28  ;;  %v7307_v27 = vor.u32 %v9453_v30, %v7304_v18  ;;  %v7432_v30 = vld [vmem:[#allocation8 + $0x2a8] sm:$0xf0] }
 0x1f6   :  { %v9673_v31 = vld [vmem:[#allocation8 + $0x864] sm:$0xf0] }
 0x1f7   :  { %5468 = vmatpush.bf16.msrb.mxu1 %v8551_v47  ;;  %v8422_v35 = vld [vmem:[#allocation8 + $0xa48] sm:$0xf]  ;;  %v8167_v38 = vor.u32 %v9673_v31, %v8166_v29  ;;  %5394 = vmatpush.bf16.msrb.mxu3 %v8931_v43  ;;  %v9445_v31 = vld [vmem:[#allocation8 + $0x14c] sm:$0xf] }
 0x1f8   :  { %v9737_v37 = vld [vmem:[#allocation8 + $0xa64] sm:$0xf0]  ;;  %v7275_v41 = vor.u32 %v9445_v31, %v7272_v32 }
 0x1f9   :  { %5456 = vmatpush.bf16.msrb.mxu0 %v8263_v61  ;;  %5431 = vmatpush.bf16.msra.mxu2 %v7719_v3  ;;  %v7622_v45 = vld [vmem:[#allocation8 + $0x408] sm:$0xf]  ;;  %v8423_v58 = vor.u32 %v9737_v37, %v8422_v35  ;;  %v7336_v3 = vld [vmem:[#allocation8 + $0x1e8] sm:$0xf0] }
 0x1fa   :  { %v9537_v47 = vld [vmem:[#allocation8 + $0x424] sm:$0xf0]  ;;  %v7339_v16 = vor.u32 %v9461_v1, %v7336_v3  ;;  %v7208_v1 = vld [vmem:[#allocation8 + $0xe8] sm:$0xf0] }
 0x1fb   :  { %5469 = vmatpush.bf16.msrb.mxu1 %v8519_v0  ;;  %v8102_v49 = vld [vmem:[#allocation8 + $0x7c8] sm:$0xf]  ;;  %v7623_v62 = vor.u32 %v9537_v47, %v7622_v45  ;;  %5395 = vmatpush.bf16.msrb.mxu3 %v8899_v56  ;;  %v9437_v47 = vld [vmem:[#allocation8 + $0x10c] sm:$0xf] }
 0x1fc   :  { %v8870_v6 = vld [vmem:[#allocation8 + $0xdc8] sm:$0xf]  ;;  %v9493_v56 = vld [vmem:[#allocation8 + $0x2cc] sm:$0xf] }
 0x1fd   :  { %5457 = vmatpush.bf16.msrb.mxu0 %v8231_v14  ;;  %5432 = vmatpush.bf16.msra.mxu2 %v7687_v20  ;;  %v9849_v53 = vld [vmem:[#allocation8 + $0xde4] sm:$0xf0]  ;;  %v5230_v14 = vpop.f32.mrf.mxu2  ;;  %v9517_v20 = vld [vmem:[#allocation8 + $0x38c] sm:$0xf] }
 0x1fe   :  { %v9657_v59 = vld [vmem:[#allocation8 + $0x7e4] sm:$0xf0]  ;;  %v8871_v2 = vor.u32 %v9849_v53, %v8870_v6  ;;  %v7563_v28 = vor.u32 %v9517_v20, %v7560_v21  ;;  %5396 = vmatmul.bf16.vlgmr.msrb.gmra.mxu3 %v10247_v13 }
 0x1ff   :  { %5470 = vmatpush.bf16.msrb.mxu1 %v8487_v15  ;;  %v8134_v60 = vld [vmem:[#allocation8 + $0x808] sm:$0xf]  ;;  %v8103_v10 = vor.u32 %v9657_v59, %v8102_v49  ;;  %v7496_v49 = vld [vmem:[#allocation8 + $0x328] sm:$0xf0] }
 0x200   :  { %v9665_v61 = vld [vmem:[#allocation8 + $0x824] sm:$0xf0] }
 0x201   :  { %5458 = vmatpush.bf16.msrb.mxu0 %v8199_v26  ;;  %5433 = vmatpush.bf16.msra.mxu2 %v7655_v34  ;;  %v8390_v63 = vld [vmem:[#allocation8 + $0xa08] sm:$0xf]  ;;  %v8135_v11 = vor.u32 %v9665_v61, %v8134_v60  ;;  %v7528_v34 = vld [vmem:[#allocation8 + $0x368] sm:$0xf0]  ;;  %v7243_v60 = vor.u32 %v9437_v47, %v7240_v48 }
 0x202   :  { %v9729_v0 = vld [vmem:[#allocation8 + $0xa24] sm:$0xf0]  ;;  %5440 = vmatpush.bf16.msra.mxu3 %v8103_v10  ;;  %v7531_v43 = vor.u32 %v9509_v36, %v7528_v34  ;;  %v9405_v47 = vld [vmem:[#allocation8 + $0xc] sm:$0xf] }
 0x203   :  { %5471 = vmatpush.bf16.msrb.mxu1 %v8455_v42  ;;  %v8391_v12 = vor.u32 %v9729_v0, %v8390_v63  ;;  %v8070_v9 = vld [vmem:[#allocation8 + $0x788] sm:$0xf]  ;;  %v9429_v0 = vld [vmem:[#allocation8 + $0xcc] sm:$0xf] }
 0x204   :  { %v9649_v25 = vld [vmem:[#allocation8 + $0x7a4] sm:$0xf0]  ;;  %v7112_v48 = vld [vmem:[#allocation8 + $0x28] sm:$0xf0] }
 0x205   :  { %5459 = vmatpush.bf16.msrb.mxu0 %v8167_v38  ;;  %5434 = vmatpush.bf16.msra.mxu2 %v7623_v62  ;;  %v8838_v17 = vld [vmem:[#allocation8 + $0xd88] sm:$0xf]  ;;  %v8071_v4 = vor.u32 %v9649_v25, %v8070_v9  ;;  %v9501_v38 = vld [vmem:[#allocation8 + $0x30c] sm:$0xf]  ;;  %v7211_v9 = vor.u32 %v9429_v0, %v7208_v1 }
 0x206   :  { %v9841_v15 = vld [vmem:[#allocation8 + $0xda4] sm:$0xf0]  ;;  %v7499_v61 = vor.u32 %v9501_v38, %v7496_v49  ;;  %v9469_v49 = vld [vmem:[#allocation8 + $0x20c] sm:$0xf] }
 0x207   :  { %5472 = vmatpush.bf16.msrb.mxu1 %v8423_v58  ;;  %v8839_v23 = vor.u32 %v9841_v15, %v8838_v17  ;;  %v8038_v24 = vld [vmem:[#allocation8 + $0x748] sm:$0xf]  ;;  %5441 = vmatpush.bf16.msra.mxu3 %v8071_v4  ;;  %v7176_v17 = vld [vmem:[#allocation8 + $0xa8] sm:$0xf0] }
 0x208   :  { %5435 = vmatmul.bf16.vlgmr.msra.gmra.mxu2 %v10219_v55  ;;  %v9641_v26 = vld [vmem:[#allocation8 + $0x764] sm:$0xf0]  ;;  %v9485_v15 = vld [vmem:[#allocation8 + $0x28c] sm:$0xf] }
 0x209   :  { %5479 = vmatpush.bf16.msrb.mxu2 %v8871_v2  ;;  %5460 = vmatpush.bf16.msrb.mxu0 %v8135_v11  ;;  %v8806_v42 = vld [vmem:[#allocation8 + $0xd48] sm:$0xf]  ;;  %v8039_v35 = vor.u32 %v9641_v26, %v8038_v24  ;;  %v7464_v2 = vld [vmem:[#allocation8 + $0x2e8] sm:$0xf0]  ;;  %v5254_v3 = vpop.f32.mrf.mxu0  ;;  %v7435_v22 = vor.u32 %v9485_v15, %v7432_v30 }
 0x20a   :  { %v9833_v29 = vld [vmem:[#allocation8 + $0xd64] sm:$0xf0]  ;;  %v10264_v7 = vadd.f32 %v5254_v3, %v10257_v57  ;;  %v7467_v25 = vor.u32 %v9493_v56, %v7464_v2  ;;  %v9413_v26 = vld [vmem:[#allocation8 + $0x4c] sm:$0xf] }
 0x20b   :  { %5473 = vmatpush.bf16.msrb.mxu1 %v8391_v12  ;;  %v8807_v37 = vor.u32 %v9833_v29, %v8806_v42  ;;  %v8006_v39 = vld [vmem:[#allocation8 + $0x708] sm:$0xf]  ;;  %5442 = vmatpush.bf16.msra.mxu3 %v8039_v35  ;;  %v7400_v42 = vld [vmem:[#allocation8 + $0x268] sm:$0xf0] }
 0x20c   :  { %5461 = vmatmul.bf16.vlgmr.msrb.gmra.mxu0 %v10230_v19  ;;  %v9633_v40 = vld [vmem:[#allocation8 + $0x724] sm:$0xf0]  ;;  %v8616_v0 = vld [vmem:[#allocation8 + $0xbe8] sm:$0xf0] }
 0x20d   :  { %5505 = vmatpush.bf16.msra.mxu0 %v7339_v16  ;;  %5480 = vmatpush.bf16.msrb.mxu2 %v8839_v23  ;;  %v8774_v44 = vld [vmem:[#allocation8 + $0xd08] sm:$0xf]  ;;  %v8007_v6 = vor.u32 %v9633_v40, %v8006_v39 }
 0x20e   :  { %5474 = vmatmul.bf16.vlgmr.msrb.gmra.mxu1 %v10234_v54  ;;  %v9825_v45 = vld [vmem:[#allocation8 + $0xd24] sm:$0xf0] }
 0x20f   :  { %5518 = vmatpush.bf16.msra.mxu1 %v7595_v8  ;;  %v8775_v53 = vor.u32 %v9825_v45, %v8774_v44  ;;  %v7974_v58 = vld [vmem:[#allocation8 + $0x6c8] sm:$0xf]  ;;  %5443 = vmatpush.bf16.msra.mxu3 %v8007_v6  ;;  %v9421_v8 = vld [vmem:[#allocation8 + $0x8c] sm:$0xf] }
 0x210   :  { %v9625_v59 = vld [vmem:[#allocation8 + $0x6e4] sm:$0xf0]  ;;  %v7179_v4 = vor.u32 %v9421_v8, %v7176_v17  ;;  %v9589_v44 = vld [vmem:[#allocation8 + $0x5cc] sm:$0xf] }
 0x211   :  { %5506 = vmatpush.bf16.msra.mxu0 %v7307_v27  ;;  %5481 = vmatpush.bf16.msrb.mxu2 %v8807_v37  ;;  %v8742_v62 = vld [vmem:[#allocation8 + $0xcc8] sm:$0xf]  ;;  %v7975_v5 = vor.u32 %v9625_v59, %v7974_v58  ;;  %v7144_v27 = vld [vmem:[#allocation8 + $0x68] sm:$0xf0]  ;;  %v5256_v32 = vpop.f32.mrf.mxu0 }
 0x212   :  { %v9817_v63 = vld [vmem:[#allocation8 + $0xce4] sm:$0xf0]  ;;  %v7147_v39 = vor.u32 %v9413_v26, %v7144_v27  ;;  %v7848_v45 = vld [vmem:[#allocation8 + $0x5e8] sm:$0xf0] }
 0x213   :  { %5519 = vmatpush.bf16.msra.mxu1 %v7563_v28  ;;  %v8743_v10 = vor.u32 %v9817_v63, %v8742_v62  ;;  %v7942_v11 = vld [vmem:[#allocation8 + $0x688] sm:$0xf]  ;;  %5444 = vmatpush.bf16.msra.mxu3 %v7975_v5  ;;  %v9477_v28 = vld [vmem:[#allocation8 + $0x24c] sm:$0xf]  ;;  %v7851_v62 = vor.u32 %v9589_v44, %v7848_v45  ;;  %v7115_v63 = vor.u32 %v9405_v47, %v7112_v48 }
 0x214   :  { %v9617_v12 = vld [vmem:[#allocation8 + $0x6a4] sm:$0xf0]  ;;  %v7403_v40 = vor.u32 %v9477_v28, %v7400_v42  ;;  %v7368_v6 = vld [vmem:[#allocation8 + $0x228] sm:$0xf0] }
 0x215   :  { %5507 = vmatpush.bf16.msra.mxu0 %v7275_v41  ;;  %5482 = vmatpush.bf16.msrb.mxu2 %v8775_v53  ;;  %v8710_v14 = vld [vmem:[#allocation8 + $0xc88] sm:$0xf]  ;;  %v7943_v18 = vor.u32 %v9617_v12, %v7942_v11  ;;  %v9717_v59 = vld [vmem:[#allocation8 + $0x9cc] sm:$0xf]  ;;  %v7371_v2 = vor.u32 %v9469_v49, %v7368_v6 }
 0x216   :  { %v9809_v16 = vld [vmem:[#allocation8 + $0xca4] sm:$0xf0]  ;;  %v9581_v5 = vld [vmem:[#allocation8 + $0x58c] sm:$0xf] }
 0x217   :  { %5520 = vmatpush.bf16.msra.mxu1 %v7531_v43  ;;  %v8711_v20 = vor.u32 %v9809_v16, %v8710_v14  ;;  %v7910_v21 = vld [vmem:[#allocation8 + $0x648] sm:$0xf]  ;;  %5445 = vmatpush.bf16.msra.mxu3 %v7943_v18  ;;  %v9773_v14 = vld [vmem:[#allocation8 + $0xb8c] sm:$0xf] }
 0x218   :  { %v9609_v57 = vld [vmem:[#allocation8 + $0x664] sm:$0xf0]  ;;  %v8584_v16 = vld [vmem:[#allocation8 + $0xba8] sm:$0xf0] }
 0x219   :  { %5508 = vmatpush.bf16.msra.mxu0 %v7243_v60  ;;  %5483 = vmatpush.bf16.msrb.mxu2 %v8743_v10  ;;  %v8678_v23 = vld [vmem:[#allocation8 + $0xc48] sm:$0xf]  ;;  %v7911_v29 = vor.u32 %v9609_v57, %v7910_v21  ;;  %v8360_v60 = vld [vmem:[#allocation8 + $0x9e8] sm:$0xf0]  ;;  %v8587_v21 = vor.u32 %v9773_v14, %v8584_v16  ;;  %v2618_v16 = vperm.slane %v10253_v46, 1 }
 0x21a   :  { %v9801_v24 = vld [vmem:[#allocation8 + $0xc64] sm:$0xf0]  ;;  %v8363_v3 = vor.u32 %v9717_v59, %v8360_v60  ;;  %v7816_v10 = vld [vmem:[#allocation8 + $0x5a8] sm:$0xf0] }
 0x21b   :  { %5521 = vmatpush.bf16.msra.mxu1 %v7499_v61  ;;  %v7878_v31 = vld [vmem:[#allocation8 + $0x608] sm:$0xf]  ;;  %v8679_v36 = vor.u32 %v9801_v24, %v8678_v23  ;;  %5446 = vmatpush.bf16.msra.mxu3 %v7911_v29  ;;  %v9781_v61 = vld [vmem:[#allocation8 + $0xbcc] sm:$0xf]  ;;  %v7819_v15 = vor.u32 %v9581_v5, %v7816_v10  ;;  %v10270_v42 = vpop.f32.mrf.mxu1 }
 0x21c   :  { %v9601_v34 = vld [vmem:[#allocation8 + $0x624] sm:$0xf0]  ;;  %v8619_v11 = vor.u32 %v9781_v61, %v8616_v0  ;;  %v9573_v18 = vld [vmem:[#allocation8 + $0x54c] sm:$0xf] }
 0x21d   :  { %5509 = vmatpush.bf16.msra.mxu0 %v7211_v9  ;;  %5484 = vmatpush.bf16.msrb.mxu2 %v8711_v20  ;;  %v8646_v35 = vld [vmem:[#allocation8 + $0xc08] sm:$0xf]  ;;  %v7879_v38 = vor.u32 %v9601_v34, %v7878_v31  ;;  %v9709_v9 = vld [vmem:[#allocation8 + $0x98c] sm:$0xf] }
 0x21e   :  { %v9793_v37 = vld [vmem:[#allocation8 + $0xc24] sm:$0xf0]  ;;  %v7784_v20 = vld [vmem:[#allocation8 + $0x568] sm:$0xf0] }
 0x21f   :  { %5522 = vmatpush.bf16.msra.mxu1 %v7467_v25  ;;  %v9126_v41 = vld [vmem:[#allocation8 + $0xfc8] sm:$0xf]  ;;  %v8647_v53 = vor.u32 %v9793_v37, %v8646_v35  ;;  %5447 = vmatpush.bf16.msra.mxu3 %v7879_v38  ;;  %v8328_v25 = vld [vmem:[#allocation8 + $0x9a8] sm:$0xf0]  ;;  %v7787_v28 = vor.u32 %v9573_v18, %v7784_v20 }
 0x220   :  { %v9913_v43 = vld [vmem:[#allocation8 + $0xfe4] sm:$0xf0]  ;;  %v8331_v30 = vor.u32 %v9709_v9, %v8328_v25  ;;  %v9765_v23 = vld [vmem:[#allocation8 + $0xb4c] sm:$0xf] }
 0x221   :  { %5510 = vmatpush.bf16.msra.mxu0 %v7179_v4  ;;  %5485 = vmatpush.bf16.msrb.mxu2 %v8679_v36  ;;  %v9127_v58 = vor.u32 %v9913_v43, %v9126_v41  ;;  %v9094_v1 = vld [vmem:[#allocation8 + $0xf88] sm:$0xf]  ;;  %v9701_v4 = vld [vmem:[#allocation8 + $0x94c] sm:$0xf] }
 0x222   :  { %v9905_v56 = vld [vmem:[#allocation8 + $0xfa4] sm:$0xf0]  ;;  %5448 = vmatmul.bf16.vlgmr.msra.gmra.mxu3 %v10221_v51  ;;  %v8552_v24 = vld [vmem:[#allocation8 + $0xb68] sm:$0xf0] }
 0x223   :  { %5523 = vmatpush.bf16.msra.mxu1 %v7435_v22  ;;  %5492 = vmatpush.bf16.msrb.mxu3 %v9127_v58  ;;  %v9095_v12 = vor.u32 %v9905_v56, %v9094_v1  ;;  %v9062_v8 = vld [vmem:[#allocation8 + $0xf48] sm:$0xf]  ;;  %v8296_v22 = vld [vmem:[#allocation8 + $0x968] sm:$0xf0]  ;;  %v8555_v36 = vor.u32 %v9765_v23, %v8552_v24  ;;  %v5269_v0 = vpop.f32.mrf.mxu1 }
 0x224   :  { %v9897_v17 = vld [vmem:[#allocation8 + $0xf64] sm:$0xf0]  ;;  %v8299_v29 = vor.u32 %v9701_v4, %v8296_v22  ;;  %v9565_v31 = vld [vmem:[#allocation8 + $0x50c] sm:$0xf] }
 0x225   :  { %5511 = vmatpush.bf16.msra.mxu0 %v7147_v39  ;;  %5486 = vmatpush.bf16.msrb.mxu2 %v8647_v53  ;;  %v9063_v57 = vor.u32 %v9897_v17, %v9062_v8  ;;  %v9030_v26 = vld [vmem:[#allocation8 + $0xf08] sm:$0xf]  ;;  %v7752_v32 = vld [vmem:[#allocation8 + $0x528] sm:$0xf0] }
 0x226   :  { %v9889_v27 = vld [vmem:[#allocation8 + $0xf24] sm:$0xf0]  ;;  %v9693_v35 = vld [vmem:[#allocation8 + $0x90c] sm:$0xf]  ;;  %v7755_v44 = vor.u32 %v9565_v31, %v7752_v32 }
 0x227   :  { %5524 = vmatpush.bf16.msra.mxu1 %v7403_v40  ;;  %5493 = vmatpush.bf16.msrb.mxu3 %v9095_v12  ;;  %v9031_v34 = vor.u32 %v9889_v27, %v9030_v26  ;;  %v8264_v37 = vld [vmem:[#allocation8 + $0x928] sm:$0xf0]  ;;  %v8998_v41 = vld [vmem:[#allocation8 + $0xec8] sm:$0xf] }
 0x228   :  { %5487 = vmatmul.bf16.vlgmr.msrb.gmra.mxu2 %v10240_v33  ;;  %v9757_v39 = vld [vmem:[#allocation8 + $0xb0c] sm:$0xf]  ;;  %v9881_v43 = vld [vmem:[#allocation8 + $0xee4] sm:$0xf0]  ;;  %v8267_v45 = vor.u32 %v9693_v35, %v8264_v37 }
 0x229   :  { %5531 = vmatpush.bf16.msra.mxu2 %v7851_v62  ;;  %5512 = vmatpush.bf16.msra.mxu0 %v7115_v63  ;;  %v8520_v40 = vld [vmem:[#allocation8 + $0xb28] sm:$0xf0]  ;;  %v5306_v38 = vpop.f32.mrf.mxu0  ;;  %v8999_v6 = vor.u32 %v9881_v43, %v8998_v41  ;;  %v8966_v61 = vld [vmem:[#allocation8 + $0xe88] sm:$0xf] }
 0x22a   :  { %v9557_v47 = vld [vmem:[#allocation8 + $0x4cc] sm:$0xf]  ;;  %v8523_v49 = vor.u32 %v9757_v39, %v8520_v40  ;;  %v9873_v62 = vld [vmem:[#allocation8 + $0xea4] sm:$0xf0]  ;;  %v5307_v27 = vadd.f32 %v5306_v38, %v2618_v16 }
 0x22b   :  { %5525 = vmatpush.bf16.msra.mxu1 %v7371_v2  ;;  %5494 = vmatpush.bf16.msrb.mxu3 %v9063_v57  ;;  %v7720_v48 = vld [vmem:[#allocation8 + $0x4e8] sm:$0xf0]  ;;  %v8967_v5 = vor.u32 %v9873_v62, %v8966_v61  ;;  %v8934_v25 = vld [vmem:[#allocation8 + $0xe48] sm:$0xf]  ;;  %v5319_v31 = vpop.f32.mrf.mxu1 }
 0x22c   :  { %5513 = vmatmul.bf16.vlgmr.msra.gmra.mxu0 %v10215_v50  ;;  %v9685_v53 = vld [vmem:[#allocation8 + $0x8cc] sm:$0xf]  ;;  %v7723_v63 = vor.u32 %v9557_v47, %v7720_v48  ;;  %v9865_v14 = vld [vmem:[#allocation8 + $0xe64] sm:$0xf0]  ;;  %v10273_v37 = vadd.f32 %v5319_v31, %v5307_v27  ;;  %v7246_v31 = vld [vmem:[#allocation8 + $0x110] sm:$0xf] }
 0x22d   :  { %5557 = vmatpush.bf16.msrb.mxu0 %v8363_v3  ;;  %5532 = vmatpush.bf16.msra.mxu2 %v7819_v15  ;;  %v8232_v58 = vld [vmem:[#allocation8 + $0x8e8] sm:$0xf0]  ;;  %v8902_v24 = vld [vmem:[#allocation8 + $0xe08] sm:$0xf] }
 0x22e   :  { %5526 = vmatmul.bf16.vlgmr.msra.gmra.mxu1 %v10217_v52  ;;  %v9749_v59 = vld [vmem:[#allocation8 + $0xacc] sm:$0xf]  ;;  %v8235_v1 = vor.u32 %v9685_v53, %v8232_v58  ;;  %v9857_v26 = vld [vmem:[#allocation8 + $0xe24] sm:$0xf0]  ;;  %v7598_v53 = vld [vmem:[#allocation8 + $0x3d0] sm:$0xf] }
 0x22f   :  { %5570 = vmatpush.bf16.msrb.mxu1 %v8619_v11  ;;  %5495 = vmatpush.bf16.msrb.mxu3 %v9031_v34  ;;  %v8488_v60 = vld [vmem:[#allocation8 + $0xae8] sm:$0xf0]  ;;  %v8903_v40 = vor.u32 %v9857_v26, %v8902_v24 }
 0x230   :  { %v9549_v56 = vld [vmem:[#allocation8 + $0x48c] sm:$0xf]  ;;  %v8491_v3 = vor.u32 %v9749_v59, %v8488_v60  ;;  %v9530_v60 = vld [vmem:[#allocation8 + $0x3ec] sm:$0xf0] }
 0x231   :  { %5558 = vmatpush.bf16.msrb.mxu0 %v8331_v30  ;;  %5533 = vmatpush.bf16.msra.mxu2 %v7787_v28  ;;  %v7688_v2 = vld [vmem:[#allocation8 + $0x4a8] sm:$0xf0]  ;;  %v5308_v18 = vpop.f32.mrf.mxu0 }
 0x232   :  { %v9677_v10 = vld [vmem:[#allocation8 + $0x88c] sm:$0xf]  ;;  %v7691_v8 = vor.u32 %v9549_v56, %v7688_v2  ;;  %v7599_v2 = vor.u32 %v9530_v60, %v7598_v53  ;;  %v9434_v53 = vld [vmem:[#allocation8 + $0xec] sm:$0xf0] }
 0x233   :  { %5571 = vmatpush.bf16.msrb.mxu1 %v8587_v21  ;;  %5496 = vmatpush.bf16.msrb.mxu3 %v8999_v6  ;;  %v8200_v11 = vld [vmem:[#allocation8 + $0x8a8] sm:$0xf0]  ;;  %v8935_v21 = vor.u32 %v9865_v14, %v8934_v25  ;;  %v9466_v6 = vld [vmem:[#allocation8 + $0x1ec] sm:$0xf0] }
 0x234   :  { %v9741_v12 = vld [vmem:[#allocation8 + $0xa8c] sm:$0xf]  ;;  %v8203_v17 = vor.u32 %v9677_v10, %v8200_v11  ;;  %v9458_v10 = vld [vmem:[#allocation8 + $0x1ac] sm:$0xf0] }
 0x235   :  { %5559 = vmatpush.bf16.msrb.mxu0 %v8299_v29  ;;  %5534 = vmatpush.bf16.msra.mxu2 %v7755_v44  ;;  %v8456_v9 = vld [vmem:[#allocation8 + $0xaa8] sm:$0xf0]  ;;  %v7566_v11 = vld [vmem:[#allocation8 + $0x390] sm:$0xf] }
 0x236   :  { %v9541_v15 = vld [vmem:[#allocation8 + $0x44c] sm:$0xf]  ;;  %v8459_v20 = vor.u32 %v9741_v12, %v8456_v9  ;;  %v5321_v12 = vpop.f32.mrf.mxu1  ;;  %v9522_v9 = vld [vmem:[#allocation8 + $0x3ac] sm:$0xf0] }
 0x237   :  { %5572 = vmatpush.bf16.msrb.mxu1 %v8555_v36  ;;  %v7656_v30 = vld [vmem:[#allocation8 + $0x468] sm:$0xf0]  ;;  %5497 = vmatpush.bf16.msrb.mxu3 %v8967_v5  ;;  %v7310_v5 = vld [vmem:[#allocation8 + $0x190] sm:$0xf] }
 0x238   :  { %v9669_v57 = vld [vmem:[#allocation8 + $0x84c] sm:$0xf]  ;;  %v7659_v46 = vor.u32 %v9541_v15, %v7656_v30  ;;  %v7567_v30 = vor.u32 %v9522_v9, %v7566_v11  ;;  %v9490_v11 = vld [vmem:[#allocation8 + $0x2ac] sm:$0xf0] }
 0x239   :  { %5560 = vmatpush.bf16.msrb.mxu0 %v8267_v45  ;;  %5535 = vmatpush.bf16.msra.mxu2 %v7723_v63  ;;  %v8168_v4 = vld [vmem:[#allocation8 + $0x868] sm:$0xf0] }
 0x23a   :  { %v9733_v22 = vld [vmem:[#allocation8 + $0xa4c] sm:$0xf]  ;;  %v8171_v32 = vor.u32 %v9669_v57, %v8168_v4  ;;  %v7534_v57 = vld [vmem:[#allocation8 + $0x350] sm:$0xf] }
 0x23b   :  { %5573 = vmatpush.bf16.msrb.mxu1 %v8523_v49  ;;  %v8424_v23 = vld [vmem:[#allocation8 + $0xa68] sm:$0xf0]  ;;  %5498 = vmatpush.bf16.msrb.mxu3 %v8935_v21  ;;  %v7342_v49 = vld [vmem:[#allocation8 + $0x1d0] sm:$0xf] }
 0x23c   :  { %v9653_v28 = vld [vmem:[#allocation8 + $0x7cc] sm:$0xf]  ;;  %v8427_v39 = vor.u32 %v9733_v22, %v8424_v23  ;;  %v7343_v0 = vor.u32 %v9466_v6, %v7342_v49  ;;  %v9450_v21 = vld [vmem:[#allocation8 + $0x16c] sm:$0xf0] }
 0x23d   :  { %5561 = vmatpush.bf16.msrb.mxu0 %v8235_v1  ;;  %5536 = vmatpush.bf16.msra.mxu2 %v7691_v8  ;;  %v8104_v29 = vld [vmem:[#allocation8 + $0x7e8] sm:$0xf0]  ;;  %v7311_v8 = vor.u32 %v9458_v10, %v7310_v5  ;;  %v9514_v4 = vld [vmem:[#allocation8 + $0x36c] sm:$0xf0] }
 0x23e   :  { %v9533_v36 = vld [vmem:[#allocation8 + $0x40c] sm:$0xf]  ;;  %v8107_v45 = vor.u32 %v9653_v28, %v8104_v29  ;;  %v7535_v28 = vor.u32 %v9514_v4, %v7534_v57  ;;  %v7214_v6 = vld [vmem:[#allocation8 + $0xd0] sm:$0xf] }
 0x23f   :  { %5574 = vmatpush.bf16.msrb.mxu1 %v8491_v3  ;;  %v7624_v34 = vld [vmem:[#allocation8 + $0x428] sm:$0xf0]  ;;  %5499 = vmatpush.bf16.msrb.mxu3 %v8903_v40  ;;  %v9426_v5 = vld [vmem:[#allocation8 + $0xac] sm:$0xf0] }
 0x240   :  { %v9845_v35 = vld [vmem:[#allocation8 + $0xdcc] sm:$0xf]  ;;  %v7627_v38 = vor.u32 %v9533_v36, %v7624_v34  ;;  %v7502_v36 = vld [vmem:[#allocation8 + $0x310] sm:$0xf] }
 0x241   :  { %5562 = vmatpush.bf16.msrb.mxu0 %v8203_v17  ;;  %v8872_v41 = vld [vmem:[#allocation8 + $0xde8] sm:$0xf0]  ;;  %5537 = vmatpush.bf16.msra.mxu2 %v7659_v46  ;;  %v9506_v34 = vld [vmem:[#allocation8 + $0x32c] sm:$0xf0] }
 0x242   :  { %v9661_v43 = vld [vmem:[#allocation8 + $0x80c] sm:$0xf]  ;;  %v8875_v58 = vor.u32 %v9845_v35, %v8872_v41  ;;  %5500 = vmatmul.bf16.vlgmr.msrb.gmra.mxu3 %v10247_v13  ;;  %v7438_v10 = vld [vmem:[#allocation8 + $0x290] sm:$0xf] }
 0x243   :  { %5575 = vmatpush.bf16.msrb.mxu1 %v8459_v20  ;;  %v8136_v44 = vld [vmem:[#allocation8 + $0x828] sm:$0xf0]  ;;  %5544 = vmatpush.bf16.msra.mxu3 %v8107_v45  ;;  %v7278_v20 = vld [vmem:[#allocation8 + $0x150] sm:$0xf] }
 0x244   :  { %v9725_v47 = vld [vmem:[#allocation8 + $0xa0c] sm:$0xf]  ;;  %v8139_v59 = vor.u32 %v9661_v43, %v8136_v44  ;;  %v7279_v26 = vor.u32 %v9450_v21, %v7278_v20  ;;  %v7150_v21 = vld [vmem:[#allocation8 + $0x50] sm:$0xf] }
 0x245   :  { %v8392_v48 = vld [vmem:[#allocation8 + $0xa28] sm:$0xf0]  ;;  %5563 = vmatpush.bf16.msrb.mxu0 %v8171_v32  ;;  %5538 = vmatpush.bf16.msra.mxu2 %v7627_v38  ;;  %v9442_v32 = vld [vmem:[#allocation8 + $0x12c] sm:$0xf0]  ;;  %v10283_v38 = vpop.f32.mrf.mxu2 }
 0x246   :  { %v9645_v61 = vld [vmem:[#allocation8 + $0x78c] sm:$0xf]  ;;  %v8395_v63 = vor.u32 %v9725_v47, %v8392_v48  ;;  %v7247_v44 = vor.u32 %v9442_v32, %v7246_v31  ;;  %v7503_v48 = vor.u32 %v9506_v34, %v7502_v36  ;;  %v9418_v57 = vld [vmem:[#allocation8 + $0x6c] sm:$0xf0] }
 0x247   :  { %v8072_v62 = vld [vmem:[#allocation8 + $0x7a8] sm:$0xf0]  ;;  %5576 = vmatpush.bf16.msrb.mxu1 %v8427_v39  ;;  %v7406_v4 = vld [vmem:[#allocation8 + $0x250] sm:$0xf] }
 0x248   :  { %v9837_v1 = vld [vmem:[#allocation8 + $0xd8c] sm:$0xf]  ;;  %v8075_v3 = vor.u32 %v9645_v61, %v8072_v62  ;;  %5539 = vmatmul.bf16.vlgmr.msra.gmra.mxu2 %v10219_v55  ;;  %v7854_v32 = vld [vmem:[#allocation8 + $0x5d0] sm:$0xf] }
 0x249   :  { %v8840_v56 = vld [vmem:[#allocation8 + $0xda8] sm:$0xf0]  ;;  %5583 = vmatpush.bf16.msrb.mxu2 %v8875_v58  ;;  %5564 = vmatpush.bf16.msrb.mxu0 %v8139_v59  ;;  %v10279_v41 = vpop.f32.mrf.mxu0  ;;  %v7470_v58 = vld [vmem:[#allocation8 + $0x2d0] sm:$0xf] }
 0x24a   :  { %v9637_v25 = vld [vmem:[#allocation8 + $0x74c] sm:$0xf]  ;;  %v8843_v16 = vor.u32 %v9837_v1, %v8840_v56  ;;  %5545 = vmatpush.bf16.msra.mxu3 %v8075_v3  ;;  %v9498_v59 = vld [vmem:[#allocation8 + $0x2ec] sm:$0xf0] }
 0x24b   :  { %v8040_v14 = vld [vmem:[#allocation8 + $0x768] sm:$0xf0]  ;;  %5577 = vmatpush.bf16.msrb.mxu1 %v8395_v63  ;;  %v10281_v43 = vpop.f32.mrf.mxu1  ;;  %v7215_v63 = vor.u32 %v9434_v53, %v7214_v6  ;;  %v7471_v56 = vor.u32 %v9498_v59, %v7470_v58  ;;  %v7182_v3 = vld [vmem:[#allocation8 + $0x90] sm:$0xf] }
 0x24c   :  { %v9829_v17 = vld [vmem:[#allocation8 + $0xd4c] sm:$0xf]  ;;  %v8043_v18 = vor.u32 %v9637_v25, %v8040_v14  ;;  %5565 = vmatmul.bf16.vlgmr.msrb.gmra.mxu0 %v10230_v19  ;;  %v9722_v6 = vld [vmem:[#allocation8 + $0x9ec] sm:$0xf0] }
 0x24d   :  { %5609 = vmatpush.bf16.msra.mxu0 %v7343_v0  ;;  %v8808_v15 = vld [vmem:[#allocation8 + $0xd68] sm:$0xf0]  ;;  %5584 = vmatpush.bf16.msrb.mxu2 %v8843_v16  ;;  %v8622_v53 = vld [vmem:[#allocation8 + $0xbd0] sm:$0xf] }
 0x24e   :  { %5578 = vmatmul.bf16.vlgmr.msrb.gmra.mxu1 %v10234_v54  ;;  %v9629_v22 = vld [vmem:[#allocation8 + $0x70c] sm:$0xf]  ;;  %v8811_v24 = vor.u32 %v9829_v17, %v8808_v15  ;;  %5546 = vmatpush.bf16.msra.mxu3 %v8043_v18  ;;  %v5282_v18 = vpop.f32.mrf.mxu2 }
 0x24f   :  { %5622 = vmatpush.bf16.msra.mxu1 %v7599_v2  ;;  %v8008_v23 = vld [vmem:[#allocation8 + $0x728] sm:$0xf0] }
 0x250   :  { %v9821_v27 = vld [vmem:[#allocation8 + $0xd0c] sm:$0xf]  ;;  %v8011_v29 = vor.u32 %v9629_v22, %v8008_v23  ;;  %v9482_v22 = vld [vmem:[#allocation8 + $0x26c] sm:$0xf0] }
 0x251   :  { %5610 = vmatpush.bf16.msra.mxu0 %v7311_v8  ;;  %v8776_v46 = vld [vmem:[#allocation8 + $0xd28] sm:$0xf0]  ;;  %5585 = vmatpush.bf16.msrb.mxu2 %v8811_v24  ;;  %v5360_v14 = vpop.f32.mrf.mxu0  ;;  %v7183_v8 = vor.u32 %v9426_v5, %v7182_v3  ;;  %v7407_v36 = vor.u32 %v9482_v22, %v7406_v4  ;;  %v9770_v4 = vld [vmem:[#allocation8 + $0xb6c] sm:$0xf0] }
 0x252   :  { %v9621_v35 = vld [vmem:[#allocation8 + $0x6cc] sm:$0xf]  ;;  %v8779_v40 = vor.u32 %v9821_v27, %v8776_v46  ;;  %5547 = vmatpush.bf16.msra.mxu3 %v8011_v29 }
 0x253   :  { %5623 = vmatpush.bf16.msra.mxu1 %v7567_v30  ;;  %v7976_v39 = vld [vmem:[#allocation8 + $0x6e8] sm:$0xf0]  ;;  %v5373_v16 = vpop.f32.mrf.mxu1  ;;  %v7439_v30 = vor.u32 %v9490_v11, %v7438_v10  ;;  %v8334_v10 = vld [vmem:[#allocation8 + $0x990] sm:$0xf] }
 0x254   :  { %v9813_v45 = vld [vmem:[#allocation8 + $0xccc] sm:$0xf]  ;;  %v7979_v49 = vor.u32 %v9621_v35, %v7976_v39  ;;  %v9594_v35 = vld [vmem:[#allocation8 + $0x5ec] sm:$0xf0] }
 0x255   :  { %5611 = vmatpush.bf16.msra.mxu0 %v7279_v26  ;;  %v8744_v47 = vld [vmem:[#allocation8 + $0xce8] sm:$0xf0]  ;;  %5586 = vmatpush.bf16.msrb.mxu2 %v8779_v40  ;;  %v7118_v39 = vld [vmem:[#allocation8 + $0x10] sm:$0xf]  ;;  %v7855_v58 = vor.u32 %v9594_v35, %v7854_v32 }
 0x256   :  { %v9613_v60 = vld [vmem:[#allocation8 + $0x68c] sm:$0xf]  ;;  %v8747_v62 = vor.u32 %v9813_v45, %v8744_v47  ;;  %5548 = vmatpush.bf16.msra.mxu3 %v7979_v49  ;;  %v9410_v40 = vld [vmem:[#allocation8 + $0x2c] sm:$0xf0] }
 0x257   :  { %5624 = vmatpush.bf16.msra.mxu1 %v7535_v28  ;;  %v7944_v61 = vld [vmem:[#allocation8 + $0x6a8] sm:$0xf0]  ;;  %v7151_v28 = vor.u32 %v9418_v57, %v7150_v21  ;;  %v7374_v45 = vld [vmem:[#allocation8 + $0x210] sm:$0xf]  ;;  %v7119_v59 = vor.u32 %v9410_v40, %v7118_v39  ;;  %v5268_v40 = vadd.f32 %v10270_v42, %v10264_v7 }
 0x258   :  { %v9805_v0 = vld [vmem:[#allocation8 + $0xc8c] sm:$0xf]  ;;  %v7947_v2 = vor.u32 %v9613_v60, %v7944_v61  ;;  %v9474_v47 = vld [vmem:[#allocation8 + $0x22c] sm:$0xf0] }
 0x259   :  { %5612 = vmatpush.bf16.msra.mxu0 %v7247_v44  ;;  %v8712_v1 = vld [vmem:[#allocation8 + $0xca8] sm:$0xf0]  ;;  %5587 = vmatpush.bf16.msrb.mxu2 %v8747_v62  ;;  %v8366_v49 = vld [vmem:[#allocation8 + $0x9d0] sm:$0xf] }
 0x25a   :  { %v9605_v12 = vld [vmem:[#allocation8 + $0x64c] sm:$0xf]  ;;  %v8715_v25 = vor.u32 %v9805_v0, %v8712_v1  ;;  %5549 = vmatpush.bf16.msra.mxu3 %v7947_v2  ;;  %v9786_v60 = vld [vmem:[#allocation8 + $0xbec] sm:$0xf0]  ;;  %v10285_v0 = vpop.f32.mrf.mxu2  ;;  %v8367_v1 = vor.u32 %v9722_v6, %v8366_v49  ;;  %v5281_v6 = vadd.f32 %v10283_v38, %v5268_v40 }
 0x25b   :  { %5625 = vmatpush.bf16.msra.mxu1 %v7503_v48  ;;  %v7912_v9 = vld [vmem:[#allocation8 + $0x668] sm:$0xf0]  ;;  %v9586_v2 = vld [vmem:[#allocation8 + $0x5ac] sm:$0xf0]  ;;  %v8623_v3 = vor.u32 %v9786_v60, %v8622_v53 }
 0x25c   :  { %v9797_v17 = vld [vmem:[#allocation8 + $0xc4c] sm:$0xf]  ;;  %v7915_v20 = vor.u32 %v9605_v12, %v7912_v9  ;;  %v9714_v11 = vld [vmem:[#allocation8 + $0x9ac] sm:$0xf0] }
 0x25d   :  { %5613 = vmatpush.bf16.msra.mxu0 %v7215_v63  ;;  %v8680_v15 = vld [vmem:[#allocation8 + $0xc68] sm:$0xf0]  ;;  %5588 = vmatpush.bf16.msrb.mxu2 %v8715_v25  ;;  %v7375_v63 = vor.u32 %v9474_v47, %v7374_v45  ;;  %v8590_v12 = vld [vmem:[#allocation8 + $0xb90] sm:$0xf] }
 0x25e   :  { %v9597_v23 = vld [vmem:[#allocation8 + $0x60c] sm:$0xf]  ;;  %v8683_v26 = vor.u32 %v9797_v17, %v8680_v15  ;;  %5550 = vmatpush.bf16.msra.mxu3 %v7915_v20  ;;  %v9778_v9 = vld [vmem:[#allocation8 + $0xbac] sm:$0xf0] }
 0x25f   :  { %5626 = vmatpush.bf16.msra.mxu1 %v7471_v56  ;;  %v7880_v24 = vld [vmem:[#allocation8 + $0x628] sm:$0xf0]  ;;  %v7822_v56 = vld [vmem:[#allocation8 + $0x590] sm:$0xf] }
 0x260   :  { %v9909_v27 = vld [vmem:[#allocation8 + $0xfcc] sm:$0xf]  ;;  %v7883_v34 = vor.u32 %v9597_v23, %v7880_v24  ;;  %v7823_v16 = vor.u32 %v9586_v2, %v7822_v56  ;;  %v7790_v17 = vld [vmem:[#allocation8 + $0x550] sm:$0xf] }
 0x261   :  { %v9128_v46 = vld [vmem:[#allocation8 + $0xfe8] sm:$0xf0]  ;;  %5614 = vmatpush.bf16.msra.mxu0 %v7183_v8  ;;  %5589 = vmatpush.bf16.msrb.mxu2 %v8683_v26  ;;  %v8335_v8 = vor.u32 %v9714_v11, %v8334_v10  ;;  %v9578_v15 = vld [vmem:[#allocation8 + $0x56c] sm:$0xf0] }
 0x262   :  { %v9789_v29 = vld [vmem:[#allocation8 + $0xc0c] sm:$0xf]  ;;  %v9131_v44 = vor.u32 %v9909_v27, %v9128_v46  ;;  %5551 = vmatpush.bf16.msra.mxu3 %v7883_v34  ;;  %v8302_v20 = vld [vmem:[#allocation8 + $0x950] sm:$0xf]  ;;  %v7791_v24 = vor.u32 %v9578_v15, %v7790_v17  ;;  %v5334_v26 = vpop.f32.mrf.mxu2 }
 0x263   :  { %v8648_v31 = vld [vmem:[#allocation8 + $0xc28] sm:$0xf0]  ;;  %5627 = vmatpush.bf16.msra.mxu1 %v7439_v30  ;;  %v8591_v30 = vor.u32 %v9778_v9, %v8590_v12  ;;  %v9706_v21 = vld [vmem:[#allocation8 + $0x96c] sm:$0xf0] }
 0x264   :  { %v8651_v48 = vor.u32 %v9789_v29, %v8648_v31  ;;  %v9901_v61 = vld [vmem:[#allocation8 + $0xf8c] sm:$0xf]  ;;  %v8558_v57 = vld [vmem:[#allocation8 + $0xb50] sm:$0xf]  ;;  %v8303_v27 = vor.u32 %v9706_v21, %v8302_v20  ;;  %v10291_v29 = vld [vmem:[#allocation10] sm:$0xff] }
 0x265   :  { %5615 = vmatpush.bf16.msra.mxu0 %v7151_v28  ;;  %v9096_v62 = vld [vmem:[#allocation8 + $0xfa8] sm:$0xf0]  ;;  %5552 = vmatmul.bf16.vlgmr.msra.gmra.mxu3 %v10221_v51  ;;  %v7758_v46 = vld [vmem:[#allocation8 + $0x510] sm:$0xf]  ;;  %v2619_v31 = vperm.slane %v10291_v29, 2  ;;  %v8559_v32 = vor.u32 %v9770_v4, %v8558_v57 }
 0x266   :  { %5596 = vmatpush.bf16.msrb.mxu3 %v9131_v44  ;;  %5590 = vmatpush.bf16.msrb.mxu2 %v8651_v48  ;;  %v9099_v5 = vor.u32 %v9901_v61, %v9096_v62  ;;  %v9893_v25 = vld [vmem:[#allocation8 + $0xf4c] sm:$0xf]  ;;  %v9570_v28 = vld [vmem:[#allocation8 + $0x52c] sm:$0xf0] }
 0x267   :  { %5628 = vmatpush.bf16.msra.mxu1 %v7407_v36  ;;  %v9064_v14 = vld [vmem:[#allocation8 + $0xf68] sm:$0xf0]  ;;  %v8270_v34 = vld [vmem:[#allocation8 + $0x910] sm:$0xf]  ;;  %v7759_v48 = vor.u32 %v9570_v28, %v7758_v46 }
 0x268   :  { %v9067_v18 = vor.u32 %v9893_v25, %v9064_v14  ;;  %v9885_v22 = vld [vmem:[#allocation8 + $0xf0c] sm:$0xf]  ;;  %v9698_v35 = vld [vmem:[#allocation8 + $0x92c] sm:$0xf0] }
 0x269   :  { %5616 = vmatpush.bf16.msra.mxu0 %v7119_v59  ;;  %5591 = vmatmul.bf16.vlgmr.msrb.gmra.mxu2 %v10240_v33  ;;  %v9032_v23 = vld [vmem:[#allocation8 + $0xf28] sm:$0xf0]  ;;  %v8526_v39 = vld [vmem:[#allocation8 + $0xb10] sm:$0xf]  ;;  %v5410_v49 = vpop.f32.mrf.mxu0  ;;  %v8271_v59 = vor.u32 %v9698_v35, %v8270_v34 }
 0x26a   :  { %5635 = vmatpush.bf16.msra.mxu2 %v7855_v58  ;;  %5597 = vmatpush.bf16.msrb.mxu3 %v9099_v5  ;;  %v9035_v36 = vor.u32 %v9885_v22, %v9032_v23  ;;  %v9762_v44 = vld [vmem:[#allocation8 + $0xb2c] sm:$0xf0]  ;;  %v9877_v45 = vld [vmem:[#allocation8 + $0xecc] sm:$0xf]  ;;  %v5411_v53 = vadd.f32 %v5410_v49, %v2619_v31 }
 0x26b   :  { %5629 = vmatpush.bf16.msra.mxu1 %v7375_v63  ;;  %v9000_v47 = vld [vmem:[#allocation8 + $0xee8] sm:$0xf0]  ;;  %v5423_v58 = vpop.f32.mrf.mxu1  ;;  %v7726_v60 = vld [vmem:[#allocation8 + $0x4d0] sm:$0xf]  ;;  %v8527_v62 = vor.u32 %v9762_v44, %v8526_v39  ;;  %v5293_v63 = vpop.f32.mrf.mxu3 }
 0x26c   :  { %5617 = vmatmul.bf16.vlgmr.msra.gmra.mxu0 %v10215_v50  ;;  %v9562_v61 = vld [vmem:[#allocation8 + $0x4ec] sm:$0xf0]  ;;  %v10297_v2 = vadd.f32 %v5423_v58, %v5411_v53  ;;  %v9869_v10 = vld [vmem:[#allocation8 + $0xe8c] sm:$0xf]  ;;  %v10299_v25 = vpop.f32.mrf.mxu2 }
 0x26d   :  { %5661 = vmatpush.bf16.msrb.mxu0 %v8367_v1  ;;  %v9003_v1 = vor.u32 %v9877_v45, %v9000_v47  ;;  %v8238_v7 = vld [vmem:[#allocation8 + $0x8d0] sm:$0xf]  ;;  %v8968_v38 = vld [vmem:[#allocation8 + $0xea8] sm:$0xf0]  ;;  %v7727_v11 = vor.u32 %v9562_v61, %v7726_v60 }
 0x26e   :  { %5630 = vmatmul.bf16.vlgmr.msra.gmra.mxu1 %v10217_v52  ;;  %5636 = vmatpush.bf16.msra.mxu2 %v7823_v16  ;;  %v9690_v42 = vld [vmem:[#allocation8 + $0x8ec] sm:$0xf0]  ;;  %v8971_v17 = vor.u32 %v9869_v10, %v8968_v38  ;;  %v9861_v57 = vld [vmem:[#allocation8 + $0xe4c] sm:$0xf]  ;;  %v7344_v10 = vld [vmem:[#allocation8 + $0x1f0] sm:$0xf0] }
 0x26f   :  { %5674 = vmatpush.bf16.msrb.mxu1 %v8623_v3  ;;  %5598 = vmatpush.bf16.msrb.mxu3 %v9067_v18  ;;  %v8494_v56 = vld [vmem:[#allocation8 + $0xad0] sm:$0xf]  ;;  %v5294_v3 = vadd.f32 %v5293_v63, %v5281_v6  ;;  %v8239_v14 = vor.u32 %v9690_v42, %v8238_v7  ;;  %v8936_v4 = vld [vmem:[#allocation8 + $0xe68] sm:$0xf0]  ;;  %v9526_v38 = vld [vmem:[#allocation8 + $0x3d4] sm:$0xf] }
 0x270   :  { %v9754_v5 = vld [vmem:[#allocation8 + $0xaec] sm:$0xf0]  ;;  %v9853_v40 = vld [vmem:[#allocation8 + $0xe0c] sm:$0xf] }
 0x271   :  { %5662 = vmatpush.bf16.msrb.mxu0 %v8335_v8  ;;  %v7694_v12 = vld [vmem:[#allocation8 + $0x490] sm:$0xf]  ;;  %vm6025_vm8 = vcmp.gt.f32.partialorder %v5294_v3, 0.0  ;;  %v6033_v9 = vmul.f32 0.01, %v5294_v3  ;;  %v8495_v8 = vor.u32 %v9754_v5, %v8494_v56  ;;  %v5412_v23 = vpop.f32.mrf.mxu0 }
 0x272   :  { %5637 = vmatpush.bf16.msra.mxu2 %v7791_v24  ;;  %v9554_v16 = vld [vmem:[#allocation8 + $0x4ac] sm:$0xf0]  ;;  %v8904_v44 = vld [vmem:[#allocation8 + $0xe28] sm:$0xf0]  ;;  %v9462_v5 = vld [vmem:[#allocation8 + $0x1d4] sm:$0xf] }
 0x273   :  { %5675 = vmatpush.bf16.msrb.mxu1 %v8591_v30  ;;  %5599 = vmatpush.bf16.msrb.mxu3 %v9035_v36  ;;  %v8206_v15 = vld [vmem:[#allocation8 + $0x890] sm:$0xf]  ;;  %v6041_v20 = vsel %vm6025_vm8, %v5294_v3, %v6033_v9  ;;  %v7695_v22 = vor.u32 %v9554_v16, %v7694_v12  ;;  %v5425_v24 = vpop.f32.mrf.mxu1  ;;  %v5295_v31 = vpop.f32.mrf.mxu3  ;;  %v8907_v61 = vor.u32 %v9853_v40, %v8904_v44  ;;  %v7600_v9 = vld [vmem:[#allocation8 + $0x3f0] sm:$0xf0] }
 0x274   :  { %v9682_v30 = vld [vmem:[#allocation8 + $0x8ac] sm:$0xf0]  ;;  %6049 = vst [vmem:[#allocation11] sm:$0xff] %v6041_v20  ;;  %v5386_v49 = vpop.f32.mrf.mxu2  ;;  %v5333_v20 = vadd.f32 %v10285_v0, %v10273_v37  ;;  %v9518_v23 = vld [vmem:[#allocation8 + $0x394] sm:$0xf] }
 0x275   :  { %5663 = vmatpush.bf16.msrb.mxu0 %v8303_v27  ;;  %v8462_v18 = vld [vmem:[#allocation8 + $0xa90] sm:$0xf]  ;;  %v8207_v26 = vor.u32 %v9682_v30, %v8206_v15  ;;  %v7347_v15 = vor.u32 %v9462_v5, %v7344_v10  ;;  %v7568_v24 = vld [vmem:[#allocation8 + $0x3b0] sm:$0xf0] }
 0x276   :  { %5638 = vmatpush.bf16.msra.mxu2 %v7759_v48  ;;  %v9746_v21 = vld [vmem:[#allocation8 + $0xaac] sm:$0xf0]  ;;  %v7536_v40 = vld [vmem:[#allocation8 + $0x370] sm:$0xf0] }
 0x277   :  { %5676 = vmatpush.bf16.msrb.mxu1 %v8559_v32  ;;  %5600 = vmatpush.bf16.msrb.mxu3 %v9003_v1  ;;  %v7662_v27 = vld [vmem:[#allocation8 + $0x450] sm:$0xf]  ;;  %v8463_v28 = vor.u32 %v9746_v21, %v8462_v18  ;;  %v8939_v32 = vor.u32 %v9861_v57, %v8936_v4  ;;  %v7603_v21 = vor.u32 %v9526_v38, %v7600_v9  ;;  %v9454_v4 = vld [vmem:[#allocation8 + $0x194] sm:$0xf] }
 0x278   :  { %v9546_v46 = vld [vmem:[#allocation8 + $0x46c] sm:$0xf0] }
 0x279   :  { %5664 = vmatpush.bf16.msrb.mxu0 %v8271_v59  ;;  %v8174_v36 = vld [vmem:[#allocation8 + $0x850] sm:$0xf]  ;;  %v7663_v45 = vor.u32 %v9546_v46, %v7662_v27 }
 0x27a   :  { %5639 = vmatpush.bf16.msra.mxu2 %v7727_v11  ;;  %v9674_v34 = vld [vmem:[#allocation8 + $0x86c] sm:$0xf0] }
 0x27b   :  { %5677 = vmatpush.bf16.msrb.mxu1 %v8527_v62  ;;  %5601 = vmatpush.bf16.msrb.mxu3 %v8971_v17  ;;  %v8430_v35 = vld [vmem:[#allocation8 + $0xa50] sm:$0xf]  ;;  %v8175_v6 = vor.u32 %v9674_v34, %v8174_v36  ;;  %v5345_v17 = vpop.f32.mrf.mxu3  ;;  %v9446_v34 = vld [vmem:[#allocation8 + $0x154] sm:$0xf] }
 0x27c   :  { %v9738_v39 = vld [vmem:[#allocation8 + $0xa6c] sm:$0xf0]  ;;  %v5346_v46 = vadd.f32 %v5345_v17, %v5333_v20 }
 0x27d   :  { %5665 = vmatpush.bf16.msrb.mxu0 %v8239_v14  ;;  %v8110_v47 = vld [vmem:[#allocation8 + $0x7d0] sm:$0xf]  ;;  %v8431_v60 = vor.u32 %v9738_v39, %v8430_v35  ;;  %v7280_v35 = vld [vmem:[#allocation8 + $0x170] sm:$0xf0] }
 0x27e   :  { %5640 = vmatpush.bf16.msra.mxu2 %v7695_v22  ;;  %v9658_v48 = vld [vmem:[#allocation8 + $0x7ec] sm:$0xf0]  ;;  %v7312_v22 = vld [vmem:[#allocation8 + $0x1b0] sm:$0xf0] }
 0x27f   :  { %5678 = vmatpush.bf16.msrb.mxu1 %v8495_v8  ;;  %v7630_v53 = vld [vmem:[#allocation8 + $0x410] sm:$0xf]  ;;  %5602 = vmatpush.bf16.msrb.mxu3 %v8939_v32  ;;  %v8111_v7 = vor.u32 %v9658_v48, %v8110_v47  ;;  %v7315_v37 = vor.u32 %v9454_v4, %v7312_v22  ;;  %v7571_v32 = vor.u32 %v9518_v23, %v7568_v24  ;;  %v9510_v39 = vld [vmem:[#allocation8 + $0x354] sm:$0xf] }
 0x280   :  { %v9538_v58 = vld [vmem:[#allocation8 + $0x42c] sm:$0xf0]  ;;  %v5359_v47 = vadd.f32 %v10279_v41, %v5346_v46  ;;  %v7184_v46 = vld [vmem:[#allocation8 + $0xb0] sm:$0xf0] }
 0x281   :  { %5666 = vmatpush.bf16.msrb.mxu0 %v8207_v26  ;;  %v8878_v59 = vld [vmem:[#allocation8 + $0xdd0] sm:$0xf]  ;;  %v7631_v3 = vor.u32 %v9538_v58, %v7630_v53 }
 0x282   :  { %v9850_v62 = vld [vmem:[#allocation8 + $0xdec] sm:$0xf0]  ;;  %5641 = vmatpush.bf16.msra.mxu2 %v7663_v45  ;;  %v5372_v5 = vadd.f32 %v10281_v43, %v5359_v47 }
 0x283   :  { %5679 = vmatpush.bf16.msrb.mxu1 %v8463_v28  ;;  %v8142_v63 = vld [vmem:[#allocation8 + $0x810] sm:$0xf]  ;;  %v8879_v11 = vor.u32 %v9850_v62, %v8878_v59  ;;  %5603 = vmatpush.bf16.msrb.mxu3 %v8907_v61  ;;  %v5347_v49 = vpop.f32.mrf.mxu3  ;;  %v7539_v59 = vor.u32 %v9510_v39, %v7536_v40  ;;  %v9438_v61 = vld [vmem:[#allocation8 + $0x114] sm:$0xf] }
 0x284   :  { %v9666_v1 = vld [vmem:[#allocation8 + $0x82c] sm:$0xf0]  ;;  %v7248_v62 = vld [vmem:[#allocation8 + $0x130] sm:$0xf0]  ;;  %v5385_v43 = vadd.f32 %v10299_v25, %v5372_v5 }
 0x285   :  { %v8398_v42 = vld [vmem:[#allocation8 + $0xa10] sm:$0xf]  ;;  %5667 = vmatpush.bf16.msrb.mxu0 %v8175_v6  ;;  %v8143_v12 = vor.u32 %v9666_v1, %v8142_v63  ;;  %v7283_v6 = vor.u32 %v9446_v34, %v7280_v35  ;;  %v9502_v63 = vld [vmem:[#allocation8 + $0x314] sm:$0xf]  ;;  %v7251_v10 = vor.u32 %v9438_v61, %v7248_v62 }
 0x286   :  { %v9730_v56 = vld [vmem:[#allocation8 + $0xa2c] sm:$0xf0]  ;;  %5642 = vmatpush.bf16.msra.mxu2 %v7631_v3  ;;  %5604 = vmatmul.bf16.vlgmr.msrb.gmra.mxu3 %v10247_v13  ;;  %v7152_v49 = vld [vmem:[#allocation8 + $0x70] sm:$0xf0] }
 0x287   :  { %v8078_v14 = vld [vmem:[#allocation8 + $0x790] sm:$0xf]  ;;  %5680 = vmatpush.bf16.msrb.mxu1 %v8431_v60  ;;  %v8399_v8 = vor.u32 %v9730_v56, %v8398_v42  ;;  %5648 = vmatpush.bf16.msra.mxu3 %v8111_v7  ;;  %v7504_v7 = vld [vmem:[#allocation8 + $0x330] sm:$0xf0] }
 0x288   :  { %v9650_v16 = vld [vmem:[#allocation8 + $0x7ac] sm:$0xf0]  ;;  %v9590_v5 = vld [vmem:[#allocation8 + $0x5d4] sm:$0xf] }
 0x289   :  { %v8846_v30 = vld [vmem:[#allocation8 + $0xd90] sm:$0xf]  ;;  %v8079_v57 = vor.u32 %v9650_v16, %v8078_v14  ;;  %5668 = vmatpush.bf16.msrb.mxu0 %v8143_v12  ;;  %5643 = vmatmul.bf16.vlgmr.msra.gmra.mxu2 %v10219_v55  ;;  %v10308_v1 = vpop.f32.mrf.mxu0  ;;  %v7507_v12 = vor.u32 %v9502_v63, %v7504_v7  ;;  %v9430_v14 = vld [vmem:[#allocation8 + $0xd4] sm:$0xf] }
 0x28a   :  { %v9842_v18 = vld [vmem:[#allocation8 + $0xdac] sm:$0xf0]  ;;  %5687 = vmatpush.bf16.msrb.mxu2 %v8879_v11  ;;  %v7216_v16 = vld [vmem:[#allocation8 + $0xf0] sm:$0xf0] }
 0x28b   :  { %v8046_v26 = vld [vmem:[#allocation8 + $0x750] sm:$0xf]  ;;  %5681 = vmatpush.bf16.msrb.mxu1 %v8399_v8  ;;  %v8847_v28 = vor.u32 %v9842_v18, %v8846_v30  ;;  %5649 = vmatpush.bf16.msra.mxu3 %v8079_v57  ;;  %v10310_v3 = vpop.f32.mrf.mxu1  ;;  %v9494_v8 = vld [vmem:[#allocation8 + $0x2d4] sm:$0xf]  ;;  %v10313_v17 = vpop.f32.mrf.mxu2  ;;  %v7219_v57 = vor.u32 %v9430_v14, %v7216_v16 }
 0x28c   :  { %v9642_v27 = vld [vmem:[#allocation8 + $0x76c] sm:$0xf0]  ;;  %5669 = vmatmul.bf16.vlgmr.msrb.gmra.mxu0 %v10230_v19  ;;  %v9470_v16 = vld [vmem:[#allocation8 + $0x214] sm:$0xf] }
 0x28d   :  { %5713 = vmatpush.bf16.msra.mxu0 %v7347_v15  ;;  %v8814_v0 = vld [vmem:[#allocation8 + $0xd50] sm:$0xf]  ;;  %v8047_v36 = vor.u32 %v9642_v27, %v8046_v26  ;;  %v7472_v15 = vld [vmem:[#allocation8 + $0x2f0] sm:$0xf0] }
 0x28e   :  { %v9834_v31 = vld [vmem:[#allocation8 + $0xd6c] sm:$0xf0]  ;;  %5682 = vmatmul.bf16.vlgmr.msrb.gmra.mxu1 %v10234_v54  ;;  %5688 = vmatpush.bf16.msrb.mxu2 %v8847_v28  ;;  %v7475_v24 = vor.u32 %v9494_v8, %v7472_v15  ;;  %v9422_v27 = vld [vmem:[#allocation8 + $0x94] sm:$0xf] }
 0x28f   :  { %5726 = vmatpush.bf16.msra.mxu1 %v7603_v21  ;;  %v8014_v44 = vld [vmem:[#allocation8 + $0x710] sm:$0xf]  ;;  %v8815_v48 = vor.u32 %v9834_v31, %v8814_v0  ;;  %5650 = vmatpush.bf16.msra.mxu3 %v8047_v36  ;;  %v5397_v21 = vpop.f32.mrf.mxu3  ;;  %v9486_v28 = vld [vmem:[#allocation8 + $0x294] sm:$0xf]  ;;  %v7187_v35 = vor.u32 %v9422_v27, %v7184_v46 }
 0x290   :  { %v9634_v45 = vld [vmem:[#allocation8 + $0x72c] sm:$0xf0]  ;;  %v5398_v23 = vadd.f32 %v5397_v21, %v5385_v43  ;;  %v7440_v0 = vld [vmem:[#allocation8 + $0x2b0] sm:$0xf0] }
 0x291   :  { %5714 = vmatpush.bf16.msra.mxu0 %v7315_v37  ;;  %v8782_v53 = vld [vmem:[#allocation8 + $0xd10] sm:$0xf]  ;;  %v8015_v60 = vor.u32 %v9634_v45, %v8014_v44  ;;  %v5464_v37 = vpop.f32.mrf.mxu0  ;;  %v9414_v44 = vld [vmem:[#allocation8 + $0x54] sm:$0xf]  ;;  %v7443_v47 = vor.u32 %v9486_v28, %v7440_v0 }
 0x292   :  { %v9826_v58 = vld [vmem:[#allocation8 + $0xd2c] sm:$0xf0]  ;;  %5689 = vmatpush.bf16.msrb.mxu2 %v8815_v48  ;;  %vm6026_vm9 = vcmp.gt.f32.partialorder %v5398_v23, 0.0  ;;  %v6034_v25 = vmul.f32 0.01, %v5398_v23 }
 0x293   :  { %5727 = vmatpush.bf16.msra.mxu1 %v7571_v32  ;;  %v7982_v42 = vld [vmem:[#allocation8 + $0x6d0] sm:$0xf]  ;;  %v8783_v41 = vor.u32 %v9826_v58, %v8782_v53  ;;  %5651 = vmatpush.bf16.msra.mxu3 %v8015_v60  ;;  %v5477_v34 = vpop.f32.mrf.mxu1  ;;  %v7408_v53 = vld [vmem:[#allocation8 + $0x270] sm:$0xf0]  ;;  %v5438_v58 = vpop.f32.mrf.mxu2 }
 0x294   :  { %v9626_v56 = vld [vmem:[#allocation8 + $0x6ec] sm:$0xf0]  ;;  %v6042_v45 = vsel %vm6026_vm9, %v5398_v23, %v6034_v25  ;;  %v7376_v8 = vld [vmem:[#allocation8 + $0x230] sm:$0xf0] }
 0x295   :  { %5715 = vmatpush.bf16.msra.mxu0 %v7283_v6  ;;  %v8750_v38 = vld [vmem:[#allocation8 + $0xcd0] sm:$0xf]  ;;  %v7983_v9 = vor.u32 %v9626_v56, %v7982_v42  ;;  %v9478_v6 = vld [vmem:[#allocation8 + $0x254] sm:$0xf]  ;;  %6050 = vst [vmem:[#allocation11 + $0x8] sm:$0xff] %v6042_v45  ;;  %v7155_v42 = vor.u32 %v9414_v44, %v7152_v49  ;;  %v7379_v23 = vor.u32 %v9470_v16, %v7376_v8 }
 0x296   :  { %v9818_v11 = vld [vmem:[#allocation8 + $0xcec] sm:$0xf0]  ;;  %5690 = vmatpush.bf16.msrb.mxu2 %v8783_v41  ;;  %v7824_v27 = vld [vmem:[#allocation8 + $0x5b0] sm:$0xf0] }
 0x297   :  { %5728 = vmatpush.bf16.msra.mxu1 %v7539_v59  ;;  %v7950_v30 = vld [vmem:[#allocation8 + $0x690] sm:$0xf]  ;;  %v8751_v20 = vor.u32 %v9818_v11, %v8750_v38  ;;  %5652 = vmatpush.bf16.msra.mxu3 %v7983_v9  ;;  %v5399_v7 = vpop.f32.mrf.mxu3  ;;  %v7856_v11 = vld [vmem:[#allocation8 + $0x5f0] sm:$0xf0] }
 0x298   :  { %v9618_v18 = vld [vmem:[#allocation8 + $0x6ac] sm:$0xf0]  ;;  %v7120_v9 = vld [vmem:[#allocation8 + $0x30] sm:$0xf0]  ;;  %v7859_v43 = vor.u32 %v9590_v5, %v7856_v11 }
 0x299   :  { %5716 = vmatpush.bf16.msra.mxu0 %v7251_v10  ;;  %v8718_v4 = vld [vmem:[#allocation8 + $0xc90] sm:$0xf]  ;;  %v7951_v26 = vor.u32 %v9618_v18, %v7950_v30  ;;  %v7411_v10 = vor.u32 %v9478_v6, %v7408_v53  ;;  %v9718_v30 = vld [vmem:[#allocation8 + $0x9d4] sm:$0xf] }
 0x29a   :  { %v9810_v22 = vld [vmem:[#allocation8 + $0xcac] sm:$0xf0]  ;;  %5691 = vmatpush.bf16.msrb.mxu2 %v8751_v20  ;;  %v8368_v18 = vld [vmem:[#allocation8 + $0x9f0] sm:$0xf0] }
 0x29b   :  { %5729 = vmatpush.bf16.msra.mxu1 %v7507_v12  ;;  %v7918_v31 = vld [vmem:[#allocation8 + $0x650] sm:$0xf]  ;;  %v8719_v36 = vor.u32 %v9810_v22, %v8718_v4  ;;  %5653 = vmatpush.bf16.msra.mxu3 %v7951_v26  ;;  %v9406_v12 = vld [vmem:[#allocation8 + $0x14] sm:$0xf] }
 0x29c   :  { %v9610_v32 = vld [vmem:[#allocation8 + $0x66c] sm:$0xf0]  ;;  %v9782_v20 = vld [vmem:[#allocation8 + $0xbd4] sm:$0xf]  ;;  %v7123_v21 = vor.u32 %v9406_v12, %v7120_v9 }
 0x29d   :  { %5717 = vmatpush.bf16.msra.mxu0 %v7219_v57  ;;  %v8686_v39 = vld [vmem:[#allocation8 + $0xc50] sm:$0xf]  ;;  %v7919_v48 = vor.u32 %v9610_v32, %v7918_v31  ;;  %v8624_v57 = vld [vmem:[#allocation8 + $0xbf0] sm:$0xf0] }
 0x29e   :  { %v9802_v40 = vld [vmem:[#allocation8 + $0xc6c] sm:$0xf0]  ;;  %5692 = vmatpush.bf16.msrb.mxu2 %v8719_v36  ;;  %v9582_v26 = vld [vmem:[#allocation8 + $0x594] sm:$0xf]  ;;  %v8627_v46 = vor.u32 %v9782_v20, %v8624_v57 }
 0x29f   :  { %5730 = vmatpush.bf16.msra.mxu1 %v7475_v24  ;;  %v7886_v59 = vld [vmem:[#allocation8 + $0x610] sm:$0xf]  ;;  %v8687_v61 = vor.u32 %v9802_v40, %v8686_v39  ;;  %5654 = vmatpush.bf16.msra.mxu3 %v7919_v48  ;;  %v8371_v24 = vor.u32 %v9718_v30, %v8368_v18  ;;  %v9710_v37 = vld [vmem:[#allocation8 + $0x994] sm:$0xf]  ;;  %v7827_v34 = vor.u32 %v9582_v26, %v7824_v27 }
 0x2a0   :  { %v9602_v60 = vld [vmem:[#allocation8 + $0x62c] sm:$0xf0]  ;;  %v8336_v0 = vld [vmem:[#allocation8 + $0x9b0] sm:$0xf0] }
 0x2a1   :  { %v9134_v62 = vld [vmem:[#allocation8 + $0xfd0] sm:$0xf]  ;;  %5718 = vmatpush.bf16.msra.mxu0 %v7187_v35  ;;  %v7887_v38 = vor.u32 %v9602_v60, %v7886_v59  ;;  %v9774_v31 = vld [vmem:[#allocation8 + $0xb94] sm:$0xf]  ;;  %v8339_v35 = vor.u32 %v9710_v37, %v8336_v0 }
 0x2a2   :  { %v9914_v63 = vld [vmem:[#allocation8 + $0xfec] sm:$0xf0]  ;;  %5693 = vmatpush.bf16.msrb.mxu2 %v8687_v61  ;;  %v8592_v32 = vld [vmem:[#allocation8 + $0xbb0] sm:$0xf0] }
 0x2a3   :  { %v8654_v56 = vld [vmem:[#allocation8 + $0xc10] sm:$0xf]  ;;  %5731 = vmatpush.bf16.msra.mxu1 %v7443_v47  ;;  %v9135_v14 = vor.u32 %v9914_v63, %v9134_v62  ;;  %5655 = vmatpush.bf16.msra.mxu3 %v7887_v38  ;;  %v9574_v39 = vld [vmem:[#allocation8 + $0x554] sm:$0xf]  ;;  %v8595_v44 = vor.u32 %v9774_v31, %v8592_v32  ;;  %v2620_v63 = vperm.slane %v10291_v29, 3 }
 0x2a4   :  { %v9794_v41 = vld [vmem:[#allocation8 + $0xc2c] sm:$0xf0]  ;;  %v7792_v40 = vld [vmem:[#allocation8 + $0x570] sm:$0xf0] }
 0x2a5   :  { %v8655_v15 = vor.u32 %v9794_v41, %v8654_v56  ;;  %5719 = vmatpush.bf16.msra.mxu0 %v7155_v42  ;;  %v9102_v4 = vld [vmem:[#allocation8 + $0xf90] sm:$0xf]  ;;  %v9702_v47 = vld [vmem:[#allocation8 + $0x954] sm:$0xf]  ;;  %v7795_v59 = vor.u32 %v9574_v39, %v7792_v40 }
 0x2a6   :  { %v9906_v22 = vld [vmem:[#allocation8 + $0xfac] sm:$0xf0]  ;;  %5656 = vmatmul.bf16.vlgmr.msra.gmra.mxu3 %v10221_v51  ;;  %v8304_v48 = vld [vmem:[#allocation8 + $0x970] sm:$0xf0] }
 0x2a7   :  { %5732 = vmatpush.bf16.msra.mxu1 %v7411_v10  ;;  %5700 = vmatpush.bf16.msrb.mxu3 %v9135_v14  ;;  %v9103_v28 = vor.u32 %v9906_v22, %v9102_v4  ;;  %v9070_v25 = vld [vmem:[#allocation8 + $0xf50] sm:$0xf]  ;;  %v9766_v49 = vld [vmem:[#allocation8 + $0xb54] sm:$0xf]  ;;  %v8307_v60 = vor.u32 %v9702_v47, %v8304_v48  ;;  %v10323_v4 = vpop.f32.mrf.mxu3 }
 0x2a8   :  { %5694 = vmatpush.bf16.msrb.mxu2 %v8655_v15  ;;  %v9898_v36 = vld [vmem:[#allocation8 + $0xf6c] sm:$0xf0]  ;;  %v8560_v6 = vld [vmem:[#allocation8 + $0xb70] sm:$0xf0] }
 0x2a9   :  { %5720 = vmatpush.bf16.msra.mxu0 %v7123_v21  ;;  %v9071_v45 = vor.u32 %v9898_v36, %v9070_v25  ;;  %v9038_v53 = vld [vmem:[#allocation8 + $0xf10] sm:$0xf]  ;;  %v9566_v61 = vld [vmem:[#allocation8 + $0x514] sm:$0xf]  ;;  %v8563_v7 = vor.u32 %v9766_v49, %v8560_v6  ;;  %v5514_v9 = vpop.f32.mrf.mxu0 }
 0x2aa   :  { %v9890_v58 = vld [vmem:[#allocation8 + $0xf2c] sm:$0xf0]  ;;  %v7760_v62 = vld [vmem:[#allocation8 + $0x530] sm:$0xf0]  ;;  %v5515_v16 = vadd.f32 %v5514_v9, %v2620_v63 }
 0x2ab   :  { %5733 = vmatpush.bf16.msra.mxu1 %v7379_v23  ;;  %5695 = vmatmul.bf16.vlgmr.msrb.gmra.mxu2 %v10240_v33  ;;  %v9039_v42 = vor.u32 %v9890_v58, %v9038_v53  ;;  %v9694_v56 = vld [vmem:[#allocation8 + $0x914] sm:$0xf]  ;;  %v9006_v38 = vld [vmem:[#allocation8 + $0xed0] sm:$0xf]  ;;  %v7763_v12 = vor.u32 %v9566_v61, %v7760_v62  ;;  %v5527_v14 = vpop.f32.mrf.mxu1  ;;  %v10325_v27 = vpop.f32.mrf.mxu2 }
 0x2ac   :  { %5739 = vmatpush.bf16.msra.mxu2 %v7859_v43  ;;  %5701 = vmatpush.bf16.msrb.mxu3 %v9103_v28  ;;  %v8272_v41 = vld [vmem:[#allocation8 + $0x930] sm:$0xf0]  ;;  %v9882_v11 = vld [vmem:[#allocation8 + $0xeec] sm:$0xf0]  ;;  %v10321_v57 = vadd.f32 %v5527_v14, %v5515_v16 }
 0x2ad   :  { %5765 = vmatpush.bf16.msrb.mxu0 %v8371_v24  ;;  %v9758_v5 = vld [vmem:[#allocation8 + $0xb14] sm:$0xf]  ;;  %v8275_v8 = vor.u32 %v9694_v56, %v8272_v41  ;;  %v9007_v18 = vor.u32 %v9882_v11, %v9006_v38  ;;  %v8974_v23 = vld [vmem:[#allocation8 + $0xe90] sm:$0xf] }
 0x2ae   :  { %5721 = vmatmul.bf16.vlgmr.msra.gmra.mxu0 %v10215_v50  ;;  %5734 = vmatmul.bf16.vlgmr.msra.gmra.mxu1 %v10217_v52  ;;  %v8528_v10 = vld [vmem:[#allocation8 + $0xb30] sm:$0xf0]  ;;  %v9874_v24 = vld [vmem:[#allocation8 + $0xeac] sm:$0xf0] }
 0x2af   :  { %5778 = vmatpush.bf16.msrb.mxu1 %v8627_v46  ;;  %v9558_v15 = vld [vmem:[#allocation8 + $0x4d4] sm:$0xf]  ;;  %v8531_v29 = vor.u32 %v9758_v5, %v8528_v10  ;;  %v8975_v31 = vor.u32 %v9874_v24, %v8974_v23  ;;  %v9866_v39 = vld [vmem:[#allocation8 + $0xe6c] sm:$0xf0]  ;;  %v5451_v61 = vpop.f32.mrf.mxu3 }
 0x2b0   :  { %5740 = vmatpush.bf16.msra.mxu2 %v7827_v34  ;;  %5702 = vmatpush.bf16.msrb.mxu3 %v9071_v45  ;;  %v7728_v30 = vld [vmem:[#allocation8 + $0x4f0] sm:$0xf0]  ;;  %v8910_v63 = vld [vmem:[#allocation8 + $0xe10] sm:$0xf]  ;;  %v7542_v61 = vld [vmem:[#allocation8 + $0x358] sm:$0xf] }
 0x2b1   :  { %5766 = vmatpush.bf16.msrb.mxu0 %v8339_v35  ;;  %v9686_v20 = vld [vmem:[#allocation8 + $0x8d4] sm:$0xf]  ;;  %v7731_v26 = vor.u32 %v9558_v15, %v7728_v30  ;;  %v8942_v35 = vld [vmem:[#allocation8 + $0xe50] sm:$0xf] }
 0x2b2   :  { %v8240_v43 = vld [vmem:[#allocation8 + $0x8f0] sm:$0xf0]  ;;  %v8943_v53 = vor.u32 %v9866_v39, %v8942_v35  ;;  %v7318_v39 = vld [vmem:[#allocation8 + $0x198] sm:$0xf] }
 0x2b3   :  { %5779 = vmatpush.bf16.msrb.mxu1 %v8595_v44  ;;  %v9750_v21 = vld [vmem:[#allocation8 + $0xad4] sm:$0xf]  ;;  %v8243_v46 = vor.u32 %v9686_v20, %v8240_v43  ;;  %v5516_v44 = vpop.f32.mrf.mxu0  ;;  %v5529_v45 = vpop.f32.mrf.mxu1  ;;  %v7350_v43 = vld [vmem:[#allocation8 + $0x1d8] sm:$0xf] }
 0x2b4   :  { %5741 = vmatpush.bf16.msra.mxu2 %v7795_v59  ;;  %5703 = vmatpush.bf16.msrb.mxu3 %v9039_v42  ;;  %v8496_v22 = vld [vmem:[#allocation8 + $0xaf0] sm:$0xf0]  ;;  %v5490_v56 = vpop.f32.mrf.mxu2  ;;  %v7574_v44 = vld [vmem:[#allocation8 + $0x398] sm:$0xf] }
 0x2b5   :  { %5767 = vmatpush.bf16.msrb.mxu0 %v8307_v60  ;;  %v9550_v28 = vld [vmem:[#allocation8 + $0x494] sm:$0xf]  ;;  %v8499_v0 = vor.u32 %v9750_v21, %v8496_v22  ;;  %v9467_v21 = vld [vmem:[#allocation8 + $0x1f4] sm:$0xf0] }
 0x2b6   :  { %v7696_v37 = vld [vmem:[#allocation8 + $0x4b0] sm:$0xf0]  ;;  %v7606_v22 = vld [vmem:[#allocation8 + $0x3d8] sm:$0xf] }
 0x2b7   :  { %5780 = vmatpush.bf16.msrb.mxu1 %v8563_v7  ;;  %v9678_v32 = vld [vmem:[#allocation8 + $0x894] sm:$0xf]  ;;  %v7699_v40 = vor.u32 %v9550_v28, %v7696_v37  ;;  %v9858_v7 = vld [vmem:[#allocation8 + $0xe2c] sm:$0xf0]  ;;  %v5437_v37 = vadd.f32 %v10313_v17, %v10297_v2  ;;  %v9523_v45 = vld [vmem:[#allocation8 + $0x3b4] sm:$0xf0] }
 0x2b8   :  { %5742 = vmatpush.bf16.msra.mxu2 %v7763_v12  ;;  %5704 = vmatpush.bf16.msrb.mxu3 %v9007_v18  ;;  %v8208_v25 = vld [vmem:[#allocation8 + $0x8b0] sm:$0xf0]  ;;  %v8911_v14 = vor.u32 %v9858_v7, %v8910_v63 }
 0x2b9   :  { %5768 = vmatpush.bf16.msrb.mxu0 %v8275_v8  ;;  %v9742_v36 = vld [vmem:[#allocation8 + $0xa94] sm:$0xf]  ;;  %v8211_v47 = vor.u32 %v9678_v32, %v8208_v25 }
 0x2ba   :  { %v8464_v34 = vld [vmem:[#allocation8 + $0xab0] sm:$0xf0] }
 0x2bb   :  { %5781 = vmatpush.bf16.msrb.mxu1 %v8531_v29  ;;  %v9542_v48 = vld [vmem:[#allocation8 + $0x454] sm:$0xf]  ;;  %v8467_v6 = vor.u32 %v9742_v36, %v8464_v34  ;;  %v5450_v36 = vadd.f32 %v10323_v4, %v5437_v37 }
 0x2bc   :  { %5743 = vmatpush.bf16.msra.mxu2 %v7731_v26  ;;  %v7664_v49 = vld [vmem:[#allocation8 + $0x470] sm:$0xf0]  ;;  %5705 = vmatpush.bf16.msrb.mxu3 %v8975_v31  ;;  %v9531_v26 = vld [vmem:[#allocation8 + $0x3f4] sm:$0xf0]  ;;  %v7351_v31 = vor.u32 %v9467_v21, %v7350_v43 }
 0x2bd   :  { %5769 = vmatpush.bf16.msrb.mxu0 %v8243_v46  ;;  %v9670_v58 = vld [vmem:[#allocation8 + $0x854] sm:$0xf]  ;;  %v7667_v42 = vor.u32 %v9542_v48, %v7664_v49  ;;  %v7607_v34 = vor.u32 %v9531_v26, %v7606_v22  ;;  %v7478_v26 = vld [vmem:[#allocation8 + $0x2d8] sm:$0xf] }
 0x2be   :  { %v8176_v59 = vld [vmem:[#allocation8 + $0x870] sm:$0xf0] }
 0x2bf   :  { %5782 = vmatpush.bf16.msrb.mxu1 %v8499_v0  ;;  %v9734_v60 = vld [vmem:[#allocation8 + $0xa54] sm:$0xf]  ;;  %v8179_v10 = vor.u32 %v9670_v58, %v8176_v59  ;;  %v7286_v59 = vld [vmem:[#allocation8 + $0x158] sm:$0xf] }
 0x2c0   :  { %v8432_v62 = vld [vmem:[#allocation8 + $0xa70] sm:$0xf0]  ;;  %5744 = vmatpush.bf16.msra.mxu2 %v7699_v40  ;;  %5706 = vmatpush.bf16.msrb.mxu3 %v8943_v53  ;;  %v9459_v40 = vld [vmem:[#allocation8 + $0x1b4] sm:$0xf0]  ;;  %v7575_v53 = vor.u32 %v9523_v45, %v7574_v44 }
 0x2c1   :  { %v9654_v41 = vld [vmem:[#allocation8 + $0x7d4] sm:$0xf]  ;;  %5770 = vmatpush.bf16.msrb.mxu0 %v8211_v47  ;;  %v8435_v9 = vor.u32 %v9734_v60, %v8432_v62  ;;  %v7319_v48 = vor.u32 %v9459_v40, %v7318_v39  ;;  %v9451_v60 = vld [vmem:[#allocation8 + $0x174] sm:$0xf0] }
 0x2c2   :  { %v8112_v5 = vld [vmem:[#allocation8 + $0x7f0] sm:$0xf0]  ;;  %v9515_v62 = vld [vmem:[#allocation8 + $0x374] sm:$0xf0]  ;;  %v7287_v56 = vor.u32 %v9451_v60, %v7286_v59 }
 0x2c3   :  { %v9534_v38 = vld [vmem:[#allocation8 + $0x414] sm:$0xf]  ;;  %5783 = vmatpush.bf16.msrb.mxu1 %v8467_v6  ;;  %v8115_v30 = vor.u32 %v9654_v41, %v8112_v5  ;;  %v5463_v6 = vadd.f32 %v10308_v1, %v5450_v36  ;;  %v9427_v39 = vld [vmem:[#allocation8 + $0xb4] sm:$0xf0] }
 0x2c4   :  { %v7632_v11 = vld [vmem:[#allocation8 + $0x430] sm:$0xf0]  ;;  %5745 = vmatpush.bf16.msra.mxu2 %v7667_v42  ;;  %5707 = vmatpush.bf16.msrb.mxu3 %v8911_v14  ;;  %v9507_v14 = vld [vmem:[#allocation8 + $0x334] sm:$0xf0] }
 0x2c5   :  { %v9846_v12 = vld [vmem:[#allocation8 + $0xdd4] sm:$0xf]  ;;  %v7635_v20 = vor.u32 %v9534_v38, %v7632_v11  ;;  %5771 = vmatpush.bf16.msrb.mxu0 %v8179_v10  ;;  %v5476_v5 = vadd.f32 %v10310_v3, %v5463_v6  ;;  %v7543_v10 = vor.u32 %v9515_v62, %v7542_v61  ;;  %v7254_v11 = vld [vmem:[#allocation8 + $0x118] sm:$0xf] }
 0x2c6   :  { %v8880_v16 = vld [vmem:[#allocation8 + $0xdf0] sm:$0xf0] }
 0x2c7   :  { %v9662_v8 = vld [vmem:[#allocation8 + $0x814] sm:$0xf]  ;;  %v8883_v23 = vor.u32 %v9846_v12, %v8880_v16  ;;  %5784 = vmatpush.bf16.msrb.mxu1 %v8435_v9  ;;  %5708 = vmatmul.bf16.vlgmr.msrb.gmra.mxu3 %v10247_v13  ;;  %v9443_v12 = vld [vmem:[#allocation8 + $0x134] sm:$0xf0]  ;;  %v5489_v43 = vadd.f32 %v10325_v27, %v5476_v5 }
 0x2c8   :  { %v8144_v15 = vld [vmem:[#allocation8 + $0x830] sm:$0xf0]  ;;  %5752 = vmatpush.bf16.msra.mxu3 %v8115_v30  ;;  %5746 = vmatpush.bf16.msra.mxu2 %v7635_v20  ;;  %v7510_v9 = vld [vmem:[#allocation8 + $0x318] sm:$0xf] }
 0x2c9   :  { %v9726_v29 = vld [vmem:[#allocation8 + $0xa14] sm:$0xf]  ;;  %v8147_v24 = vor.u32 %v9662_v8, %v8144_v15  ;;  %v10336_v30 = vpop.f32.mrf.mxu0  ;;  %v7511_v21 = vor.u32 %v9507_v14, %v7510_v9 }
 0x2ca   :  { %v8400_v18 = vld [vmem:[#allocation8 + $0xa30] sm:$0xf0] }
 0x2cb   :  { %v9646_v46 = vld [vmem:[#allocation8 + $0x794] sm:$0xf]  ;;  %v8403_v0 = vor.u32 %v9726_v29, %v8400_v18  ;;  %5772 = vmatpush.bf16.msrb.mxu0 %v8147_v24  ;;  %5747 = vmatmul.bf16.vlgmr.msra.gmra.mxu2 %v10219_v55  ;;  %v10338_v29 = vpop.f32.mrf.mxu1  ;;  %v7255_v18 = vor.u32 %v9443_v12, %v7254_v11  ;;  %v9435_v24 = vld [vmem:[#allocation8 + $0xf4] sm:$0xf0] }
 0x2cc   :  { %v8080_v28 = vld [vmem:[#allocation8 + $0x7b0] sm:$0xf0]  ;;  %5791 = vmatpush.bf16.msrb.mxu2 %v8883_v23  ;;  %v7222_v23 = vld [vmem:[#allocation8 + $0xd8] sm:$0xf] }
 0x2cd   :  { %v9838_v32 = vld [vmem:[#allocation8 + $0xd94] sm:$0xf]  ;;  %v8083_v35 = vor.u32 %v9646_v46, %v8080_v28  ;;  %5785 = vmatpush.bf16.msrb.mxu1 %v8403_v0  ;;  %v5501_v46 = vpop.f32.mrf.mxu3  ;;  %v9499_v28 = vld [vmem:[#allocation8 + $0x2f4] sm:$0xf0] }
 0x2ce   :  { %v8848_v25 = vld [vmem:[#allocation8 + $0xdb0] sm:$0xf0]  ;;  %5773 = vmatmul.bf16.vlgmr.msrb.gmra.mxu0 %v10230_v19  ;;  %v7479_v44 = vor.u32 %v9499_v28, %v7478_v26  ;;  %v8374_v26 = vld [vmem:[#allocation8 + $0x9d8] sm:$0xf] }
 0x2cf   :  { %v9638_v47 = vld [vmem:[#allocation8 + $0x754] sm:$0xf]  ;;  %v8851_v17 = vor.u32 %v9838_v32, %v8848_v25  ;;  %5817 = vmatpush.bf16.msra.mxu0 %v7351_v31  ;;  %5753 = vmatpush.bf16.msra.mxu3 %v8083_v35  ;;  %v5502_v32 = vadd.f32 %v5501_v46, %v5489_v43  ;;  %v10341_v25 = vpop.f32.mrf.mxu2  ;;  %v7190_v35 = vld [vmem:[#allocation8 + $0x98] sm:$0xf] }
 0x2d0   :  { %v8048_v2 = vld [vmem:[#allocation8 + $0x770] sm:$0xf0]  ;;  %5786 = vmatmul.bf16.vlgmr.msrb.gmra.mxu1 %v10234_v54  ;;  %v9411_v43 = vld [vmem:[#allocation8 + $0x34] sm:$0xf0] }
 0x2d1   :  { %v9830_v4 = vld [vmem:[#allocation8 + $0xd54] sm:$0xf]  ;;  %5830 = vmatpush.bf16.msra.mxu1 %v7607_v34  ;;  %v8051_v58 = vor.u32 %v9638_v47, %v8048_v2  ;;  %5792 = vmatpush.bf16.msrb.mxu2 %v8851_v17  ;;  %v7223_v34 = vor.u32 %v9435_v24, %v7222_v23  ;;  %vm6027_vm10 = vcmp.gt.f32.partialorder %v5502_v32, 0.0  ;;  %v6035_v40 = vmul.f32 0.01, %v5502_v32  ;;  %v5568_v6 = vpop.f32.mrf.mxu0 }
 0x2d2   :  { %v8816_v49 = vld [vmem:[#allocation8 + $0xd70] sm:$0xf0]  ;;  %v7446_v47 = vld [vmem:[#allocation8 + $0x298] sm:$0xf] }
 0x2d3   :  { %v9630_v63 = vld [vmem:[#allocation8 + $0x714] sm:$0xf]  ;;  %v8819_v42 = vor.u32 %v9830_v4, %v8816_v49  ;;  %5818 = vmatpush.bf16.msra.mxu0 %v7319_v48  ;;  %5754 = vmatpush.bf16.msra.mxu3 %v8051_v58  ;;  %v9491_v2 = vld [vmem:[#allocation8 + $0x2b4] sm:$0xf0]  ;;  %v6043_v4 = vsel %vm6027_vm10, %v5502_v32, %v6035_v40  ;;  %v7191_v58 = vor.u32 %v9427_v39, %v7190_v35 }
 0x2d4   :  { %v8016_v7 = vld [vmem:[#allocation8 + $0x730] sm:$0xf0]  ;;  %6051 = vst [vmem:[#allocation11 + $0x10] sm:$0xff] %v6043_v4  ;;  %v7447_v61 = vor.u32 %v9491_v2, %v7446_v47  ;;  %v9475_v23 = vld [vmem:[#allocation8 + $0x234] sm:$0xf0] }
 0x2d5   :  { %v9822_v41 = vld [vmem:[#allocation8 + $0xd14] sm:$0xf]  ;;  %5831 = vmatpush.bf16.msra.mxu1 %v7575_v53  ;;  %v8019_v38 = vor.u32 %v9630_v63, %v8016_v7  ;;  %5793 = vmatpush.bf16.msrb.mxu2 %v8819_v42  ;;  %v5581_v53 = vpop.f32.mrf.mxu1  ;;  %v7158_v63 = vld [vmem:[#allocation8 + $0x58] sm:$0xf] }
 0x2d6   :  { %v8784_v1 = vld [vmem:[#allocation8 + $0xd30] sm:$0xf0]  ;;  %v9419_v7 = vld [vmem:[#allocation8 + $0x74] sm:$0xf0] }
 0x2d7   :  { %v9622_v16 = vld [vmem:[#allocation8 + $0x6d4] sm:$0xf]  ;;  %v8787_v15 = vor.u32 %v9822_v41, %v8784_v1  ;;  %5819 = vmatpush.bf16.msra.mxu0 %v7287_v56  ;;  %5755 = vmatpush.bf16.msra.mxu3 %v8019_v38  ;;  %v7414_v42 = vld [vmem:[#allocation8 + $0x258] sm:$0xf]  ;;  %v5503_v56 = vpop.f32.mrf.mxu3  ;;  %v5542_v38 = vpop.f32.mrf.mxu2  ;;  %v7159_v9 = vor.u32 %v9419_v7, %v7158_v63 }
 0x2d8   :  { %v7984_v8 = vld [vmem:[#allocation8 + $0x6f0] sm:$0xf0]  ;;  %v9483_v41 = vld [vmem:[#allocation8 + $0x274] sm:$0xf0]  ;;  %v10347_v38 = vld [vmem:[#allocation10] sm:$0xff] }
 0x2d9   :  { %v9814_v20 = vld [vmem:[#allocation8 + $0xcd4] sm:$0xf]  ;;  %5832 = vmatpush.bf16.msra.mxu1 %v7543_v10  ;;  %v7987_v22 = vor.u32 %v9622_v16, %v7984_v8  ;;  %5794 = vmatpush.bf16.msrb.mxu2 %v8787_v15  ;;  %v7862_v8 = vld [vmem:[#allocation8 + $0x5d8] sm:$0xf]  ;;  %v7415_v15 = vor.u32 %v9483_v41, %v7414_v42 }
 0x2da   :  { %v8752_v3 = vld [vmem:[#allocation8 + $0xcf0] sm:$0xf0]  ;;  %v9723_v46 = vld [vmem:[#allocation8 + $0x9f4] sm:$0xf0] }
 0x2db   :  { %v9614_v37 = vld [vmem:[#allocation8 + $0x694] sm:$0xf]  ;;  %v8755_v31 = vor.u32 %v9814_v20, %v8752_v3  ;;  %5820 = vmatpush.bf16.msra.mxu0 %v7255_v18  ;;  %5756 = vmatpush.bf16.msra.mxu3 %v7987_v22  ;;  %v9595_v20 = vld [vmem:[#allocation8 + $0x5f4] sm:$0xf0] }
 0x2dc   :  { %v7952_v0 = vld [vmem:[#allocation8 + $0x6b0] sm:$0xf0]  ;;  %v7126_v3 = vld [vmem:[#allocation8 + $0x18] sm:$0xf] }
 0x2dd   :  { %v9806_v36 = vld [vmem:[#allocation8 + $0xc94] sm:$0xf]  ;;  %5833 = vmatpush.bf16.msra.mxu1 %v7511_v21  ;;  %v7955_v45 = vor.u32 %v9614_v37, %v7952_v0  ;;  %5795 = vmatpush.bf16.msrb.mxu2 %v8755_v31  ;;  %v7382_v22 = vld [vmem:[#allocation8 + $0x218] sm:$0xf]  ;;  %v7863_v37 = vor.u32 %v9595_v20, %v7862_v8  ;;  %v7127_v0 = vor.u32 %v9411_v43, %v7126_v3 }
 0x2de   :  { %v8720_v27 = vld [vmem:[#allocation8 + $0xcb0] sm:$0xf0]  ;;  %v8630_v28 = vld [vmem:[#allocation8 + $0xbd8] sm:$0xf] }
 0x2df   :  { %v9606_v17 = vld [vmem:[#allocation8 + $0x654] sm:$0xf]  ;;  %v8723_v49 = vor.u32 %v9806_v36, %v8720_v27  ;;  %5821 = vmatpush.bf16.msra.mxu0 %v7223_v34  ;;  %5757 = vmatpush.bf16.msra.mxu3 %v7955_v45  ;;  %v9787_v31 = vld [vmem:[#allocation8 + $0xbf4] sm:$0xf0]  ;;  %v7383_v34 = vor.u32 %v9475_v23, %v7382_v22  ;;  %v8375_v27 = vor.u32 %v9723_v46, %v8374_v26 }
 0x2e0   :  { %v7920_v48 = vld [vmem:[#allocation8 + $0x670] sm:$0xf0]  ;;  %v7830_v35 = vld [vmem:[#allocation8 + $0x598] sm:$0xf]  ;;  %v8631_v40 = vor.u32 %v9787_v31, %v8630_v28 }
 0x2e1   :  { %v9798_v59 = vld [vmem:[#allocation8 + $0xc54] sm:$0xf]  ;;  %5834 = vmatpush.bf16.msra.mxu1 %v7479_v44  ;;  %v7923_v62 = vor.u32 %v9606_v17, %v7920_v48  ;;  %5796 = vmatpush.bf16.msrb.mxu2 %v8723_v49  ;;  %v9587_v39 = vld [vmem:[#allocation8 + $0x5b4] sm:$0xf0] }
 0x2e2   :  { %v8688_v60 = vld [vmem:[#allocation8 + $0xc70] sm:$0xf0]  ;;  %v8342_v45 = vld [vmem:[#allocation8 + $0x998] sm:$0xf]  ;;  %v7831_v49 = vor.u32 %v9587_v39, %v7830_v35 }
 0x2e3   :  { %v9598_v1 = vld [vmem:[#allocation8 + $0x614] sm:$0xf]  ;;  %v8691_v10 = vor.u32 %v9798_v59, %v8688_v60  ;;  %5822 = vmatpush.bf16.msra.mxu0 %v7191_v58  ;;  %5758 = vmatpush.bf16.msra.mxu3 %v7923_v62  ;;  %v9715_v47 = vld [vmem:[#allocation8 + $0x9b4] sm:$0xf0] }
 0x2e4   :  { %v7888_v5 = vld [vmem:[#allocation8 + $0x630] sm:$0xf0]  ;;  %v8598_v2 = vld [vmem:[#allocation8 + $0xb98] sm:$0xf]  ;;  %v8343_v6 = vor.u32 %v9715_v47, %v8342_v45 }
 0x2e5   :  { %v9910_v11 = vld [vmem:[#allocation8 + $0xfd4] sm:$0xf]  ;;  %5835 = vmatpush.bf16.msra.mxu1 %v7447_v61  ;;  %v7891_v18 = vor.u32 %v9598_v1, %v7888_v5  ;;  %5797 = vmatpush.bf16.msrb.mxu2 %v8691_v10  ;;  %v9779_v17 = vld [vmem:[#allocation8 + $0xbb4] sm:$0xf0] }
 0x2e6   :  { %v9136_v12 = vld [vmem:[#allocation8 + $0xff0] sm:$0xf0]  ;;  %v7798_v53 = vld [vmem:[#allocation8 + $0x558] sm:$0xf]  ;;  %v8599_v59 = vor.u32 %v9779_v17, %v8598_v2 }
 0x2e7   :  { %v9790_v14 = vld [vmem:[#allocation8 + $0xc14] sm:$0xf]  ;;  %v9139_v21 = vor.u32 %v9910_v11, %v9136_v12  ;;  %5823 = vmatpush.bf16.msra.mxu0 %v7159_v9  ;;  %5759 = vmatpush.bf16.msra.mxu3 %v7891_v18  ;;  %v9579_v58 = vld [vmem:[#allocation8 + $0x574] sm:$0xf0]  ;;  %v2621_v11 = vperm.slane %v10347_v38, 4 }
 0x2e8   :  { %v8656_v16 = vld [vmem:[#allocation8 + $0xc30] sm:$0xf0]  ;;  %v8310_v61 = vld [vmem:[#allocation8 + $0x958] sm:$0xf]  ;;  %v7799_v41 = vor.u32 %v9579_v58, %v7798_v53 }
 0x2e9   :  { %v8659_v24 = vor.u32 %v9790_v14, %v8656_v16  ;;  %v9902_v32 = vld [vmem:[#allocation8 + $0xf94] sm:$0xf]  ;;  %5836 = vmatpush.bf16.msra.mxu1 %v7415_v15  ;;  %v9707_v62 = vld [vmem:[#allocation8 + $0x974] sm:$0xf0]  ;;  %v5618_v43 = vpop.f32.mrf.mxu0 }
 0x2ea   :  { %v9104_v36 = vld [vmem:[#allocation8 + $0xfb0] sm:$0xf0]  ;;  %5760 = vmatmul.bf16.vlgmr.msra.gmra.mxu3 %v10221_v51  ;;  %v8566_v63 = vld [vmem:[#allocation8 + $0xb58] sm:$0xf]  ;;  %v8311_v1 = vor.u32 %v9707_v62, %v8310_v61  ;;  %v5619_v22 = vadd.f32 %v5618_v43, %v2621_v11 }
 0x2eb   :  { %5804 = vmatpush.bf16.msrb.mxu3 %v9139_v21  ;;  %5798 = vmatpush.bf16.msrb.mxu2 %v8659_v24  ;;  %v9107_v44 = vor.u32 %v9902_v32, %v9104_v36  ;;  %v9894_v48 = vld [vmem:[#allocation8 + $0xf54] sm:$0xf]  ;;  %v9771_v7 = vld [vmem:[#allocation8 + $0xb74] sm:$0xf0]  ;;  %v5631_v21 = vpop.f32.mrf.mxu1  ;;  %v10352_v36 = vpop.f32.mrf.mxu3 }
 0x2ec   :  { %5824 = vmatpush.bf16.msra.mxu0 %v7127_v0  ;;  %v9072_v4 = vld [vmem:[#allocation8 + $0xf70] sm:$0xf0]  ;;  %v7766_v5 = vld [vmem:[#allocation8 + $0x518] sm:$0xf]  ;;  %v8567_v12 = vor.u32 %v9771_v7, %v8566_v63  ;;  %v10350_v32 = vadd.f32 %v5631_v21, %v5619_v22 }
 0x2ed   :  { %5837 = vmatpush.bf16.msra.mxu1 %v7383_v34  ;;  %v9075_v60 = vor.u32 %v9894_v48, %v9072_v4  ;;  %v9886_v42 = vld [vmem:[#allocation8 + $0xf14] sm:$0xf]  ;;  %v9571_v10 = vld [vmem:[#allocation8 + $0x534] sm:$0xf0] }
 0x2ee   :  { %5799 = vmatmul.bf16.vlgmr.msrb.gmra.mxu2 %v10240_v33  ;;  %v9040_v56 = vld [vmem:[#allocation8 + $0xf30] sm:$0xf0]  ;;  %v8278_v14 = vld [vmem:[#allocation8 + $0x918] sm:$0xf]  ;;  %v7767_v3 = vor.u32 %v9571_v10, %v7766_v5 }
 0x2ef   :  { %5843 = vmatpush.bf16.msra.mxu2 %v7863_v37  ;;  %5805 = vmatpush.bf16.msrb.mxu3 %v9107_v44  ;;  %v9043_v9 = vor.u32 %v9886_v42, %v9040_v56  ;;  %v9699_v16 = vld [vmem:[#allocation8 + $0x934] sm:$0xf0]  ;;  %v9878_v18 = vld [vmem:[#allocation8 + $0xed4] sm:$0xf] }
 0x2f0   :  { %5869 = vmatpush.bf16.msrb.mxu0 %v8375_v27  ;;  %5838 = vmatmul.bf16.vlgmr.msra.gmra.mxu1 %v10217_v52  ;;  %v8534_v8 = vld [vmem:[#allocation8 + $0xb18] sm:$0xf]  ;;  %v9008_v20 = vld [vmem:[#allocation8 + $0xef0] sm:$0xf0]  ;;  %v8279_v23 = vor.u32 %v9699_v16, %v8278_v14 }
 0x2f1   :  { %5882 = vmatpush.bf16.msrb.mxu1 %v8631_v40  ;;  %5825 = vmatmul.bf16.vlgmr.msra.gmra.mxu0 %v10215_v50  ;;  %v9763_v15 = vld [vmem:[#allocation8 + $0xb34] sm:$0xf0]  ;;  %v9011_v28 = vor.u32 %v9878_v18, %v9008_v20  ;;  %v9870_v27 = vld [vmem:[#allocation8 + $0xe94] sm:$0xf]  ;;  %v10354_v40 = vpop.f32.mrf.mxu2 }
 0x2f2   :  { %v7734_v24 = vld [vmem:[#allocation8 + $0x4d8] sm:$0xf]  ;;  %v8535_v46 = vor.u32 %v9763_v15, %v8534_v8  ;;  %v8976_v35 = vld [vmem:[#allocation8 + $0xeb0] sm:$0xf0] }
 0x2f3   :  { %5844 = vmatpush.bf16.msra.mxu2 %v7831_v49  ;;  %5806 = vmatpush.bf16.msrb.mxu3 %v9075_v60  ;;  %v9563_v26 = vld [vmem:[#allocation8 + $0x4f4] sm:$0xf0]  ;;  %v8979_v17 = vor.u32 %v9870_v27, %v8976_v35  ;;  %v9862_v53 = vld [vmem:[#allocation8 + $0xe54] sm:$0xf]  ;;  %v5620_v60 = vpop.f32.mrf.mxu0  ;;  %v5633_v61 = vpop.f32.mrf.mxu1  ;;  %v9527_v27 = vld [vmem:[#allocation8 + $0x3dc] sm:$0xf] }
 0x2f4   :  { %5870 = vmatpush.bf16.msrb.mxu0 %v8343_v6  ;;  %v8246_v37 = vld [vmem:[#allocation8 + $0x8d8] sm:$0xf]  ;;  %v7735_v39 = vor.u32 %v9563_v26, %v7734_v24  ;;  %v8944_v58 = vld [vmem:[#allocation8 + $0xe70] sm:$0xf0]  ;;  %v5555_v10 = vpop.f32.mrf.mxu3  ;;  %v7320_v60 = vld [vmem:[#allocation8 + $0x1b8] sm:$0xf0] }
 0x2f5   :  { %5883 = vmatpush.bf16.msrb.mxu1 %v8599_v59  ;;  %v9691_v0 = vld [vmem:[#allocation8 + $0x8f4] sm:$0xf0]  ;;  %v8947_v56 = vor.u32 %v9862_v53, %v8944_v58  ;;  %v9519_v61 = vld [vmem:[#allocation8 + $0x39c] sm:$0xf] }
 0x2f6   :  { %v8502_v31 = vld [vmem:[#allocation8 + $0xad8] sm:$0xf]  ;;  %v8247_v44 = vor.u32 %v9691_v0, %v8246_v37  ;;  %v7288_v10 = vld [vmem:[#allocation8 + $0x178] sm:$0xf0] }
 0x2f7   :  { %5845 = vmatpush.bf16.msra.mxu2 %v7799_v41  ;;  %5807 = vmatpush.bf16.msrb.mxu3 %v9043_v9  ;;  %v9755_v34 = vld [vmem:[#allocation8 + $0xaf4] sm:$0xf0]  ;;  %v8912_v9 = vld [vmem:[#allocation8 + $0xe30] sm:$0xf0] }
 0x2f8   :  { %5871 = vmatpush.bf16.msrb.mxu0 %v8311_v1  ;;  %v7702_v45 = vld [vmem:[#allocation8 + $0x498] sm:$0xf]  ;;  %v8503_v2 = vor.u32 %v9755_v34, %v8502_v31  ;;  %v9463_v31 = vld [vmem:[#allocation8 + $0x1dc] sm:$0xf] }
 0x2f9   :  { %5884 = vmatpush.bf16.msrb.mxu1 %v8567_v12  ;;  %v9555_v47 = vld [vmem:[#allocation8 + $0x4b4] sm:$0xf0]  ;;  %v9854_v12 = vld [vmem:[#allocation8 + $0xe14] sm:$0xf]  ;;  %v5594_v16 = vpop.f32.mrf.mxu2  ;;  %v7352_v34 = vld [vmem:[#allocation8 + $0x1f8] sm:$0xf0] }
 0x2fa   :  { %v8214_v48 = vld [vmem:[#allocation8 + $0x898] sm:$0xf]  ;;  %v7703_v59 = vor.u32 %v9555_v47, %v7702_v45  ;;  %v8915_v22 = vor.u32 %v9854_v12, %v8912_v9  ;;  %v7544_v12 = vld [vmem:[#allocation8 + $0x378] sm:$0xf0] }
 0x2fb   :  { %5846 = vmatpush.bf16.msra.mxu2 %v7767_v3  ;;  %5808 = vmatpush.bf16.msrb.mxu3 %v9011_v28  ;;  %v9683_v4 = vld [vmem:[#allocation8 + $0x8b4] sm:$0xf0] }
 0x2fc   :  { %5872 = vmatpush.bf16.msrb.mxu0 %v8279_v23  ;;  %v8470_v49 = vld [vmem:[#allocation8 + $0xa98] sm:$0xf]  ;;  %v8215_v62 = vor.u32 %v9683_v4, %v8214_v48  ;;  %v7355_v48 = vor.u32 %v9463_v31, %v7352_v34 }
 0x2fd   :  { %5885 = vmatpush.bf16.msrb.mxu1 %v8535_v46  ;;  %v9747_v6 = vld [vmem:[#allocation8 + $0xab4] sm:$0xf0] }
 0x2fe   :  { %v7670_v63 = vld [vmem:[#allocation8 + $0x458] sm:$0xf]  ;;  %v8471_v42 = vor.u32 %v9747_v6, %v8470_v49 }
 0x2ff   :  { %5847 = vmatpush.bf16.msra.mxu2 %v7735_v39  ;;  %v9547_v7 = vld [vmem:[#allocation8 + $0x474] sm:$0xf0]  ;;  %5809 = vmatpush.bf16.msrb.mxu3 %v8979_v17 }
 0x300   :  { %5873 = vmatpush.bf16.msrb.mxu0 %v8247_v44  ;;  %v8182_v41 = vld [vmem:[#allocation8 + $0x858] sm:$0xf]  ;;  %v7671_v14 = vor.u32 %v9547_v7, %v7670_v63  ;;  %v7608_v44 = vld [vmem:[#allocation8 + $0x3f8] sm:$0xf0] }
 0x301   :  { %5886 = vmatpush.bf16.msrb.mxu1 %v8503_v2  ;;  %v9675_v1 = vld [vmem:[#allocation8 + $0x874] sm:$0xf0]  ;;  %v5541_v2 = vadd.f32 %v10341_v25, %v10321_v57  ;;  %v7611_v53 = vor.u32 %v9527_v27, %v7608_v44  ;;  %v7224_v44 = vld [vmem:[#allocation8 + $0xf8] sm:$0xf0] }
 0x302   :  { %v8438_v5 = vld [vmem:[#allocation8 + $0xa58] sm:$0xf]  ;;  %v8183_v18 = vor.u32 %v9675_v1, %v8182_v41 }
 0x303   :  { %v9739_v11 = vld [vmem:[#allocation8 + $0xa74] sm:$0xf0]  ;;  %5848 = vmatpush.bf16.msra.mxu2 %v7703_v59  ;;  %5810 = vmatpush.bf16.msrb.mxu3 %v8947_v56  ;;  %v5554_v6 = vadd.f32 %v10352_v36, %v5541_v2  ;;  %v9455_v59 = vld [vmem:[#allocation8 + $0x19c] sm:$0xf] }
 0x304   :  { %v8118_v8 = vld [vmem:[#allocation8 + $0x7d8] sm:$0xf]  ;;  %5874 = vmatpush.bf16.msrb.mxu0 %v8215_v62  ;;  %v8439_v21 = vor.u32 %v9739_v11, %v8438_v5  ;;  %v7576_v62 = vld [vmem:[#allocation8 + $0x3b8] sm:$0xf0]  ;;  %v7323_v7 = vor.u32 %v9455_v59, %v7320_v60 }
 0x305   :  { %v9659_v15 = vld [vmem:[#allocation8 + $0x7f4] sm:$0xf0]  ;;  %5887 = vmatpush.bf16.msrb.mxu1 %v8471_v42  ;;  %v5567_v56 = vadd.f32 %v10336_v30, %v5554_v6  ;;  %v7579_v41 = vor.u32 %v9519_v61, %v7576_v62  ;;  %v9447_v5 = vld [vmem:[#allocation8 + $0x15c] sm:$0xf] }
 0x306   :  { %v7638_v20 = vld [vmem:[#allocation8 + $0x418] sm:$0xf]  ;;  %v8119_v46 = vor.u32 %v9659_v15, %v8118_v8  ;;  %v9511_v11 = vld [vmem:[#allocation8 + $0x35c] sm:$0xf]  ;;  %v7291_v8 = vor.u32 %v9447_v5, %v7288_v10 }
 0x307   :  { %v9539_v3 = vld [vmem:[#allocation8 + $0x434] sm:$0xf0]  ;;  %5849 = vmatpush.bf16.msra.mxu2 %v7671_v14  ;;  %5811 = vmatpush.bf16.msrb.mxu3 %v8915_v22  ;;  %v9503_v22 = vld [vmem:[#allocation8 + $0x31c] sm:$0xf] }
 0x308   :  { %v8886_v43 = vld [vmem:[#allocation8 + $0xdd8] sm:$0xf]  ;;  %v7639_v0 = vor.u32 %v9539_v3, %v7638_v20  ;;  %5875 = vmatpush.bf16.msrb.mxu0 %v8183_v18  ;;  %v5580_v18 = vadd.f32 %v10338_v29, %v5567_v56  ;;  %v7547_v20 = vor.u32 %v9511_v11, %v7544_v12  ;;  %v7480_v2 = vld [vmem:[#allocation8 + $0x2f8] sm:$0xf0] }
 0x309   :  { %v9851_v23 = vld [vmem:[#allocation8 + $0xdf4] sm:$0xf0]  ;;  %5888 = vmatpush.bf16.msrb.mxu1 %v8439_v21  ;;  %v7256_v21 = vld [vmem:[#allocation8 + $0x138] sm:$0xf0] }
 0x30a   :  { %v8150_v24 = vld [vmem:[#allocation8 + $0x818] sm:$0xf]  ;;  %v8887_v35 = vor.u32 %v9851_v23, %v8886_v43  ;;  %5812 = vmatmul.bf16.vlgmr.msrb.gmra.mxu3 %v10247_v13  ;;  %v9439_v43 = vld [vmem:[#allocation8 + $0x11c] sm:$0xf]  ;;  %v5593_v34 = vadd.f32 %v10354_v40, %v5580_v18 }
 0x30b   :  { %v9667_v26 = vld [vmem:[#allocation8 + $0x834] sm:$0xf0]  ;;  %5856 = vmatpush.bf16.msra.mxu3 %v8119_v46  ;;  %5850 = vmatpush.bf16.msra.mxu2 %v7639_v0  ;;  %v7512_v23 = vld [vmem:[#allocation8 + $0x338] sm:$0xf0]  ;;  %v7259_v0 = vor.u32 %v9439_v43, %v7256_v21 }
 0x30c   :  { %v8406_v28 = vld [vmem:[#allocation8 + $0xa18] sm:$0xf]  ;;  %v8151_v39 = vor.u32 %v9667_v26, %v8150_v24  ;;  %v7515_v27 = vor.u32 %v9503_v22, %v7512_v23  ;;  %v10370_v6 = vpop.f32.mrf.mxu2  ;;  %v9423_v59 = vld [vmem:[#allocation8 + $0x9c] sm:$0xf] }
 0x30d   :  { %v9731_v37 = vld [vmem:[#allocation8 + $0xa34] sm:$0xf0]  ;;  %v7192_v60 = vld [vmem:[#allocation8 + $0xb8] sm:$0xf0] }
 0x30e   :  { %v8086_v45 = vld [vmem:[#allocation8 + $0x798] sm:$0xf]  ;;  %v8407_v17 = vor.u32 %v9731_v37, %v8406_v28  ;;  %5876 = vmatpush.bf16.msrb.mxu0 %v8151_v39  ;;  %5851 = vmatmul.bf16.vlgmr.msra.gmra.mxu2 %v10219_v55  ;;  %v10365_v28 = vpop.f32.mrf.mxu0  ;;  %v10367_v37 = vpop.f32.mrf.mxu1  ;;  %v9431_v39 = vld [vmem:[#allocation8 + $0xdc] sm:$0xf]  ;;  %v7195_v5 = vor.u32 %v9423_v59, %v7192_v60 }
 0x30f   :  { %v9651_v47 = vld [vmem:[#allocation8 + $0x7b4] sm:$0xf0]  ;;  %5895 = vmatpush.bf16.msrb.mxu2 %v8887_v35  ;;  %v9583_v60 = vld [vmem:[#allocation8 + $0x59c] sm:$0xf] }
 0x310   :  { %v8854_v4 = vld [vmem:[#allocation8 + $0xd98] sm:$0xf]  ;;  %v8087_v58 = vor.u32 %v9651_v47, %v8086_v45  ;;  %5889 = vmatpush.bf16.msrb.mxu1 %v8407_v17  ;;  %v9495_v45 = vld [vmem:[#allocation8 + $0x2dc] sm:$0xf]  ;;  %v5605_v47 = vpop.f32.mrf.mxu3 }
 0x311   :  { %v9843_v49 = vld [vmem:[#allocation8 + $0xdb4] sm:$0xf0]  ;;  %5877 = vmatmul.bf16.vlgmr.msrb.gmra.mxu0 %v10230_v19  ;;  %v7483_v62 = vor.u32 %v9495_v45, %v7480_v2  ;;  %v8376_v2 = vld [vmem:[#allocation8 + $0x9f8] sm:$0xf0] }
 0x312   :  { %v8054_v63 = vld [vmem:[#allocation8 + $0x758] sm:$0xf]  ;;  %v8855_v25 = vor.u32 %v9843_v49, %v8854_v4  ;;  %5921 = vmatpush.bf16.msra.mxu0 %v7355_v48  ;;  %5857 = vmatpush.bf16.msra.mxu3 %v8087_v58  ;;  %v5606_v49 = vadd.f32 %v5605_v47, %v5593_v34  ;;  %v7227_v58 = vor.u32 %v9431_v39, %v7224_v44  ;;  %v9407_v34 = vld [vmem:[#allocation8 + $0x1c] sm:$0xf] }
 0x313   :  { %v9643_v57 = vld [vmem:[#allocation8 + $0x774] sm:$0xf0]  ;;  %5890 = vmatmul.bf16.vlgmr.msrb.gmra.mxu1 %v10234_v54  ;;  %v9471_v39 = vld [vmem:[#allocation8 + $0x21c] sm:$0xf] }
 0x314   :  { %v8822_v36 = vld [vmem:[#allocation8 + $0xd58] sm:$0xf]  ;;  %5934 = vmatpush.bf16.msra.mxu1 %v7611_v53  ;;  %v8055_v1 = vor.u32 %v9643_v57, %v8054_v63  ;;  %5896 = vmatpush.bf16.msrb.mxu2 %v8855_v25  ;;  %vm6028_vm11 = vcmp.gt.f32.partialorder %v5606_v49, 0.0  ;;  %v6036_v61 = vmul.f32 0.01, %v5606_v49  ;;  %v5646_v43 = vpop.f32.mrf.mxu2 }
 0x315   :  { %v9835_v42 = vld [vmem:[#allocation8 + $0xd74] sm:$0xf0]  ;;  %v9487_v57 = vld [vmem:[#allocation8 + $0x29c] sm:$0xf] }
 0x316   :  { %v8022_v9 = vld [vmem:[#allocation8 + $0x718] sm:$0xf]  ;;  %v8823_v16 = vor.u32 %v9835_v42, %v8822_v36  ;;  %5922 = vmatpush.bf16.msra.mxu0 %v7323_v7  ;;  %5858 = vmatpush.bf16.msra.mxu3 %v8055_v1  ;;  %v7448_v25 = vld [vmem:[#allocation8 + $0x2b8] sm:$0xf0]  ;;  %v6044_v42 = vsel %vm6028_vm11, %v5606_v49, %v6036_v61  ;;  %v5685_v1 = vpop.f32.mrf.mxu1 }
 0x317   :  { %v9635_v14 = vld [vmem:[#allocation8 + $0x734] sm:$0xf0]  ;;  %6052 = vst [vmem:[#allocation11 + $0x18] sm:$0xff] %v6044_v42  ;;  %v7451_v12 = vor.u32 %v9487_v57, %v7448_v25  ;;  %v7384_v44 = vld [vmem:[#allocation8 + $0x238] sm:$0xf0] }
 0x318   :  { %v8790_v15 = vld [vmem:[#allocation8 + $0xd18] sm:$0xf]  ;;  %5935 = vmatpush.bf16.msra.mxu1 %v7579_v41  ;;  %v8023_v3 = vor.u32 %v9635_v14, %v8022_v9  ;;  %5897 = vmatpush.bf16.msrb.mxu2 %v8823_v16  ;;  %v5672_v41 = vpop.f32.mrf.mxu0  ;;  %v9415_v14 = vld [vmem:[#allocation8 + $0x5c] sm:$0xf] }
 0x319   :  { %v9827_v30 = vld [vmem:[#allocation8 + $0xd34] sm:$0xf0]  ;;  %v7160_v16 = vld [vmem:[#allocation8 + $0x78] sm:$0xf0] }
 0x31a   :  { %v7990_v24 = vld [vmem:[#allocation8 + $0x6d8] sm:$0xf]  ;;  %v8791_v46 = vor.u32 %v9827_v30, %v8790_v15  ;;  %5923 = vmatpush.bf16.msra.mxu0 %v7291_v8  ;;  %5859 = vmatpush.bf16.msra.mxu3 %v8023_v3  ;;  %v9479_v8 = vld [vmem:[#allocation8 + $0x25c] sm:$0xf]  ;;  %v5607_v15 = vpop.f32.mrf.mxu3  ;;  %v7163_v23 = vor.u32 %v9415_v14, %v7160_v16 }
 0x31b   :  { %v9627_v26 = vld [vmem:[#allocation8 + $0x6f4] sm:$0xf0]  ;;  %v7416_v30 = vld [vmem:[#allocation8 + $0x278] sm:$0xf0] }
 0x31c   :  { %v8758_v31 = vld [vmem:[#allocation8 + $0xcd8] sm:$0xf]  ;;  %5936 = vmatpush.bf16.msra.mxu1 %v7547_v20  ;;  %v7991_v35 = vor.u32 %v9627_v26, %v7990_v24  ;;  %5898 = vmatpush.bf16.msrb.mxu2 %v8791_v46  ;;  %v9591_v46 = vld [vmem:[#allocation8 + $0x5dc] sm:$0xf] }
 0x31d   :  { %v9819_v29 = vld [vmem:[#allocation8 + $0xcf4] sm:$0xf0]  ;;  %v9719_v47 = vld [vmem:[#allocation8 + $0x9dc] sm:$0xf] }
 0x31e   :  { %v7958_v17 = vld [vmem:[#allocation8 + $0x698] sm:$0xf]  ;;  %v8759_v4 = vor.u32 %v9819_v29, %v8758_v31  ;;  %5924 = vmatpush.bf16.msra.mxu0 %v7259_v0  ;;  %5860 = vmatpush.bf16.msra.mxu3 %v7991_v35  ;;  %v7419_v0 = vor.u32 %v9479_v8, %v7416_v30  ;;  %v7864_v29 = vld [vmem:[#allocation8 + $0x5f8] sm:$0xf0]  ;;  %v8379_v59 = vor.u32 %v9719_v47, %v8376_v2 }
 0x31f   :  { %v9619_v48 = vld [vmem:[#allocation8 + $0x6b4] sm:$0xf0]  ;;  %v8632_v49 = vld [vmem:[#allocation8 + $0xbf8] sm:$0xf0] }
 0x320   :  { %v8726_v53 = vld [vmem:[#allocation8 + $0xc98] sm:$0xf]  ;;  %5937 = vmatpush.bf16.msra.mxu1 %v7515_v27  ;;  %v7959_v63 = vor.u32 %v9619_v48, %v7958_v17  ;;  %5899 = vmatpush.bf16.msrb.mxu2 %v8759_v4  ;;  %v7128_v27 = vld [vmem:[#allocation8 + $0x38] sm:$0xf0]  ;;  %v7867_v48 = vor.u32 %v9591_v46, %v7864_v29 }
 0x321   :  { %v9811_v40 = vld [vmem:[#allocation8 + $0xcb4] sm:$0xf0]  ;;  %v9783_v17 = vld [vmem:[#allocation8 + $0xbdc] sm:$0xf]  ;;  %v7131_v4 = vor.u32 %v9407_v34, %v7128_v27 }
 0x322   :  { %v7926_v7 = vld [vmem:[#allocation8 + $0x658] sm:$0xf]  ;;  %v8727_v56 = vor.u32 %v9811_v40, %v8726_v53  ;;  %5925 = vmatpush.bf16.msra.mxu0 %v7227_v58  ;;  %5861 = vmatpush.bf16.msra.mxu3 %v7959_v63  ;;  %v7387_v40 = vor.u32 %v9471_v39, %v7384_v44  ;;  %v7832_v61 = vld [vmem:[#allocation8 + $0x5b8] sm:$0xf0] }
 0x323   :  { %v9611_v36 = vld [vmem:[#allocation8 + $0x674] sm:$0xf0]  ;;  %v9711_v57 = vld [vmem:[#allocation8 + $0x99c] sm:$0xf]  ;;  %v7835_v41 = vor.u32 %v9583_v60, %v7832_v61 }
 0x324   :  { %v8694_v10 = vld [vmem:[#allocation8 + $0xc58] sm:$0xf]  ;;  %5938 = vmatpush.bf16.msra.mxu1 %v7483_v62  ;;  %v7927_v9 = vor.u32 %v9611_v36, %v7926_v7  ;;  %5900 = vmatpush.bf16.msrb.mxu2 %v8727_v56  ;;  %v8635_v62 = vor.u32 %v9783_v17, %v8632_v49  ;;  %v8344_v25 = vld [vmem:[#allocation8 + $0x9b8] sm:$0xf0] }
 0x325   :  { %v9803_v11 = vld [vmem:[#allocation8 + $0xc74] sm:$0xf0]  ;;  %v9775_v7 = vld [vmem:[#allocation8 + $0xb9c] sm:$0xf]  ;;  %v8347_v1 = vor.u32 %v9711_v57, %v8344_v25 }
 0x326   :  { %v7894_v18 = vld [vmem:[#allocation8 + $0x618] sm:$0xf]  ;;  %v8695_v3 = vor.u32 %v9803_v11, %v8694_v10  ;;  %5926 = vmatpush.bf16.msra.mxu0 %v7195_v5  ;;  %5862 = vmatpush.bf16.msra.mxu3 %v7927_v9  ;;  %v8600_v36 = vld [vmem:[#allocation8 + $0xbb8] sm:$0xf0] }
 0x327   :  { %v9603_v20 = vld [vmem:[#allocation8 + $0x634] sm:$0xf0]  ;;  %v9575_v5 = vld [vmem:[#allocation8 + $0x55c] sm:$0xf]  ;;  %v8603_v11 = vor.u32 %v9775_v7, %v8600_v36 }
 0x328   :  { %v9142_v21 = vld [vmem:[#allocation8 + $0xfd8] sm:$0xf]  ;;  %5939 = vmatpush.bf16.msra.mxu1 %v7451_v12  ;;  %v7895_v31 = vor.u32 %v9603_v20, %v7894_v18  ;;  %5901 = vmatpush.bf16.msrb.mxu2 %v8695_v3  ;;  %v7800_v10 = vld [vmem:[#allocation8 + $0x578] sm:$0xf0] }
 0x329   :  { %v9915_v22 = vld [vmem:[#allocation8 + $0xff4] sm:$0xf0]  ;;  %v9703_v9 = vld [vmem:[#allocation8 + $0x95c] sm:$0xf]  ;;  %v7803_v18 = vor.u32 %v9575_v5, %v7800_v10  ;;  %v10379_v49 = vpop.f32.mrf.mxu3 }
 0x32a   :  { %v8662_v24 = vld [vmem:[#allocation8 + $0xc18] sm:$0xf]  ;;  %v9143_v35 = vor.u32 %v9915_v22, %v9142_v21  ;;  %5927 = vmatpush.bf16.msra.mxu0 %v7163_v23  ;;  %5863 = vmatpush.bf16.msra.mxu3 %v7895_v31  ;;  %v8312_v14 = vld [vmem:[#allocation8 + $0x978] sm:$0xf0]  ;;  %v2622_v21 = vperm.slane %v10347_v38, 5 }
 0x32b   :  { %v9795_v26 = vld [vmem:[#allocation8 + $0xc34] sm:$0xf0]  ;;  %v9767_v16 = vld [vmem:[#allocation8 + $0xb5c] sm:$0xf]  ;;  %v8315_v20 = vor.u32 %v9703_v9, %v8312_v14  ;;  %v5722_v29 = vpop.f32.mrf.mxu0  ;;  %v5735_v34 = vpop.f32.mrf.mxu1 }
 0x32c   :  { %v8663_v45 = vor.u32 %v9795_v26, %v8662_v24  ;;  %v9110_v53 = vld [vmem:[#allocation8 + $0xf98] sm:$0xf]  ;;  %5940 = vmatpush.bf16.msra.mxu1 %v7419_v0  ;;  %v8568_v8 = vld [vmem:[#allocation8 + $0xb78] sm:$0xf0]  ;;  %v5723_v27 = vadd.f32 %v5722_v29, %v2622_v21 }
 0x32d   :  { %v9907_v58 = vld [vmem:[#allocation8 + $0xfb4] sm:$0xf0]  ;;  %5864 = vmatmul.bf16.vlgmr.msra.gmra.mxu3 %v10221_v51  ;;  %v9567_v3 = vld [vmem:[#allocation8 + $0x51c] sm:$0xf]  ;;  %v8571_v22 = vor.u32 %v9767_v16, %v8568_v8 }
 0x32e   :  { %5908 = vmatpush.bf16.msrb.mxu3 %v9143_v35  ;;  %5902 = vmatpush.bf16.msrb.mxu2 %v8663_v45  ;;  %v9111_v63 = vor.u32 %v9907_v58, %v9110_v53  ;;  %v9078_v42 = vld [vmem:[#allocation8 + $0xf58] sm:$0xf]  ;;  %v7768_v43 = vld [vmem:[#allocation8 + $0x538] sm:$0xf0]  ;;  %v10381_v60 = vpop.f32.mrf.mxu2 }
 0x32f   :  { %5928 = vmatpush.bf16.msra.mxu0 %v7131_v4  ;;  %v9899_v56 = vld [vmem:[#allocation8 + $0xf74] sm:$0xf0]  ;;  %v9695_v24 = vld [vmem:[#allocation8 + $0x91c] sm:$0xf]  ;;  %v7771_v31 = vor.u32 %v9567_v3, %v7768_v43  ;;  %v10377_v4 = vadd.f32 %v5735_v34, %v5723_v27 }
 0x330   :  { %5941 = vmatpush.bf16.msra.mxu1 %v7387_v40  ;;  %v9079_v12 = vor.u32 %v9899_v56, %v9078_v42  ;;  %v9046_v15 = vld [vmem:[#allocation8 + $0xf18] sm:$0xf]  ;;  %v8280_v26 = vld [vmem:[#allocation8 + $0x938] sm:$0xf0] }
 0x331   :  { %5903 = vmatmul.bf16.vlgmr.msrb.gmra.mxu2 %v10240_v33  ;;  %v9891_v30 = vld [vmem:[#allocation8 + $0xf34] sm:$0xf0]  ;;  %v8536_v46 = vld [vmem:[#allocation8 + $0xb38] sm:$0xf0]  ;;  %v8283_v35 = vor.u32 %v9695_v24, %v8280_v26 }
 0x332   :  { %5947 = vmatpush.bf16.msra.mxu2 %v7867_v48  ;;  %5909 = vmatpush.bf16.msrb.mxu3 %v9111_v63  ;;  %v9047_v23 = vor.u32 %v9891_v30, %v9046_v15  ;;  %v9883_v0 = vld [vmem:[#allocation8 + $0xef4] sm:$0xf0]  ;;  %v9559_v39 = vld [vmem:[#allocation8 + $0x4dc] sm:$0xf] }
 0x333   :  { %5973 = vmatpush.bf16.msrb.mxu0 %v8379_v59  ;;  %5942 = vmatmul.bf16.vlgmr.msra.gmra.mxu1 %v10217_v52  ;;  %v9014_v52 = vld [vmem:[#allocation8 + $0xed8] sm:$0xf]  ;;  %v7736_v44 = vld [vmem:[#allocation8 + $0x4f8] sm:$0xf0]  ;;  %v5724_v10 = vpop.f32.mrf.mxu0 }
 0x334   :  { %5986 = vmatpush.bf16.msrb.mxu1 %v8635_v62  ;;  %5929 = vmatmul.bf16.vlgmr.msra.gmra.mxu0 %v10215_v50  ;;  %v9759_v50 = vld [vmem:[#allocation8 + $0xb1c] sm:$0xf]  ;;  %v9015_v47 = vor.u32 %v9883_v0, %v9014_v52  ;;  %v8982_v58 = vld [vmem:[#allocation8 + $0xe98] sm:$0xf]  ;;  %v7739_v59 = vor.u32 %v9559_v39, %v7736_v44 }
 0x335   :  { %v8539_v45 = vor.u32 %v9759_v50, %v8536_v46  ;;  %v9687_v2 = vld [vmem:[#allocation8 + $0x8dc] sm:$0xf]  ;;  %v9875_v40 = vld [vmem:[#allocation8 + $0xeb4] sm:$0xf0] }
 0x336   :  { %5948 = vmatpush.bf16.msra.mxu2 %v7835_v41  ;;  %5910 = vmatpush.bf16.msrb.mxu3 %v9079_v12  ;;  %v8248_v17 = vld [vmem:[#allocation8 + $0x8f8] sm:$0xf0]  ;;  %v8983_v25 = vor.u32 %v9875_v40, %v8982_v58  ;;  %v8950_v41 = vld [vmem:[#allocation8 + $0xe58] sm:$0xf]  ;;  %v5645_v58 = vadd.f32 %v10370_v6, %v10350_v32 }
 0x337   :  { %5974 = vmatpush.bf16.msrb.mxu0 %v8347_v1  ;;  %v9751_v48 = vld [vmem:[#allocation8 + $0xadc] sm:$0xf]  ;;  %v8251_v61 = vor.u32 %v9687_v2, %v8248_v17  ;;  %v9867_v1 = vld [vmem:[#allocation8 + $0xe74] sm:$0xf0] }
 0x338   :  { %5987 = vmatpush.bf16.msrb.mxu1 %v8603_v11  ;;  %v8504_v53 = vld [vmem:[#allocation8 + $0xaf8] sm:$0xf0]  ;;  %v5737_v11 = vpop.f32.mrf.mxu1  ;;  %v8951_v8 = vor.u32 %v9867_v1, %v8950_v41  ;;  %v8918_v43 = vld [vmem:[#allocation8 + $0xe18] sm:$0xf] }
 0x339   :  { %v9551_v62 = vld [vmem:[#allocation8 + $0x49c] sm:$0xf]  ;;  %v8507_v57 = vor.u32 %v9751_v48, %v8504_v53  ;;  %v9859_v21 = vld [vmem:[#allocation8 + $0xe34] sm:$0xf0] }
 0x33a   :  { %5949 = vmatpush.bf16.msra.mxu2 %v7803_v18  ;;  %5911 = vmatpush.bf16.msrb.mxu3 %v9047_v23  ;;  %v7704_v63 = vld [vmem:[#allocation8 + $0x4b8] sm:$0xf0]  ;;  %v5698_v23 = vpop.f32.mrf.mxu2  ;;  %v8919_v29 = vor.u32 %v9859_v21, %v8918_v43 }
 0x33b   :  { %5975 = vmatpush.bf16.msrb.mxu0 %v8315_v20  ;;  %v9679_v7 = vld [vmem:[#allocation8 + $0x89c] sm:$0xf]  ;;  %v7707_v5 = vor.u32 %v9551_v62, %v7704_v63  ;;  %v5659_v20 = vpop.f32.mrf.mxu3  ;;  %v5658_v63 = vadd.f32 %v10379_v49, %v5645_v58 }
 0x33c   :  { %5988 = vmatpush.bf16.msrb.mxu1 %v8571_v22  ;;  %v8216_v36 = vld [vmem:[#allocation8 + $0x8b8] sm:$0xf0] }
 0x33d   :  { %v9743_v42 = vld [vmem:[#allocation8 + $0xa9c] sm:$0xf]  ;;  %v8219_v12 = vor.u32 %v9679_v7, %v8216_v36 }
 0x33e   :  { %5950 = vmatpush.bf16.msra.mxu2 %v7771_v31  ;;  %5912 = vmatpush.bf16.msrb.mxu3 %v9015_v47  ;;  %v8472_v56 = vld [vmem:[#allocation8 + $0xab8] sm:$0xf0] }
 0x33f   :  { %5976 = vmatpush.bf16.msrb.mxu0 %v8283_v35  ;;  %v9543_v9 = vld [vmem:[#allocation8 + $0x45c] sm:$0xf]  ;;  %v8475_v16 = vor.u32 %v9743_v42, %v8472_v56  ;;  %v5671_v42 = vadd.f32 %v10365_v28, %v5658_v63 }
 0x340   :  { %5989 = vmatpush.bf16.msrb.mxu1 %v8539_v45  ;;  %v7672_v14 = vld [vmem:[#allocation8 + $0x478] sm:$0xf0] }
 0x341   :  { %v9671_v15 = vld [vmem:[#allocation8 + $0x85c] sm:$0xf]  ;;  %v7675_v22 = vor.u32 %v9543_v9, %v7672_v14  ;;  %v5684_v11 = vadd.f32 %v10367_v37, %v5671_v42 }
 0x342   :  { %5951 = vmatpush.bf16.msra.mxu2 %v7739_v59  ;;  %5913 = vmatpush.bf16.msrb.mxu3 %v8983_v25  ;;  %v8184_v30 = vld [vmem:[#allocation8 + $0x878] sm:$0xf0] }
 0x343   :  { %5977 = vmatpush.bf16.msrb.mxu0 %v8251_v61  ;;  %v9735_v18 = vld [vmem:[#allocation8 + $0xa5c] sm:$0xf]  ;;  %v8187_v50 = vor.u32 %v9671_v15, %v8184_v30 }
 0x344   :  { %5990 = vmatpush.bf16.msrb.mxu1 %v8507_v57  ;;  %v8440_v3 = vld [vmem:[#allocation8 + $0xa78] sm:$0xf0] }
 0x345   :  { %v9655_v24 = vld [vmem:[#allocation8 + $0x7dc] sm:$0xf]  ;;  %v8443_v31 = vor.u32 %v9735_v18, %v8440_v3 }
 0x346   :  { %5952 = vmatpush.bf16.msra.mxu2 %v7707_v5  ;;  %v8120_v26 = vld [vmem:[#allocation8 + $0x7f8] sm:$0xf0]  ;;  %5914 = vmatpush.bf16.msrb.mxu3 %v8951_v8  ;;  %v5697_v8 = vadd.f32 %v10381_v60, %v5684_v11 }
 0x347   :  { %5978 = vmatpush.bf16.msrb.mxu0 %v8219_v12  ;;  %v9535_v46 = vld [vmem:[#allocation8 + $0x41c] sm:$0xf]  ;;  %v8123_v39 = vor.u32 %v9655_v24, %v8120_v26 }
 0x348   :  { %v7640_v52 = vld [vmem:[#allocation8 + $0x438] sm:$0xf0]  ;;  %5991 = vmatpush.bf16.msrb.mxu1 %v8475_v16 }
 0x349   :  { %v9847_v0 = vld [vmem:[#allocation8 + $0xddc] sm:$0xf]  ;;  %v7643_v47 = vor.u32 %v9535_v46, %v7640_v52 }
 0x34a   :  { %v8888_v34 = vld [vmem:[#allocation8 + $0xdf8] sm:$0xf0]  ;;  %5953 = vmatpush.bf16.msra.mxu2 %v7675_v22  ;;  %5915 = vmatpush.bf16.msrb.mxu3 %v8919_v29  ;;  %v5709_v20 = vpop.f32.mrf.mxu3 }
 0x34b   :  { %v9663_v27 = vld [vmem:[#allocation8 + $0x81c] sm:$0xf]  ;;  %5979 = vmatpush.bf16.msrb.mxu0 %v8187_v50  ;;  %v8891_v48 = vor.u32 %v9847_v0, %v8888_v34  ;;  %v10392_v14 = vpop.f32.mrf.mxu0  ;;  %v5710_v37 = vadd.f32 %v5709_v20, %v5697_v8 }
 0x34c   :  { %v8152_v35 = vld [vmem:[#allocation8 + $0x838] sm:$0xf0]  ;;  %5992 = vmatpush.bf16.msrb.mxu1 %v8443_v31 }
 0x34d   :  { %v9727_v44 = vld [vmem:[#allocation8 + $0xa1c] sm:$0xf]  ;;  %v8155_v53 = vor.u32 %v9663_v27, %v8152_v35  ;;  %5916 = vmatmul.bf16.vlgmr.msrb.gmra.mxu3 %v10247_v13  ;;  %v10394_v28 = vpop.f32.mrf.mxu1  ;;  %vm6029_vm12 = vcmp.gt.f32.partialorder %v5710_v37, 0.0  ;;  %v6037_v24 = vmul.f32 0.01, %v5710_v37 }
 0x34e   :  { %v8408_v45 = vld [vmem:[#allocation8 + $0xa38] sm:$0xf0]  ;;  %5960 = vmatpush.bf16.msra.mxu3 %v8123_v39  ;;  %5954 = vmatpush.bf16.msra.mxu2 %v7643_v47  ;;  %v10397_v3 = vpop.f32.mrf.mxu2 }
 0x34f   :  { %v9647_v2 = vld [vmem:[#allocation8 + $0x79c] sm:$0xf]  ;;  %v8411_v40 = vor.u32 %v9727_v44, %v8408_v45  ;;  %5980 = vmatpush.bf16.msrb.mxu0 %v8155_v53  ;;  %v6045_v46 = vsel %vm6029_vm12, %v5710_v37, %v6037_v24  ;;  %v5749_v20 = vadd.f32 %v10397_v3, %v10377_v4 }
 0x350   :  { %v8088_v17 = vld [vmem:[#allocation8 + $0x7b8] sm:$0xf0]  ;;  %6053 = vst [vmem:[#allocation11 + $0x20] sm:$0xff] %v6045_v46 }
 0x351   :  { %v9839_v59 = vld [vmem:[#allocation8 + $0xd9c] sm:$0xf]  ;;  %v8091_v62 = vor.u32 %v9647_v2, %v8088_v17  ;;  %5993 = vmatpush.bf16.msrb.mxu1 %v8411_v40  ;;  %5955 = vmatmul.bf16.vlgmr.msra.gmra.mxu2 %v10219_v55 }
 0x352   :  { %v8856_v61 = vld [vmem:[#allocation8 + $0xdb8] sm:$0xf0]  ;;  %5999 = vmatpush.bf16.msrb.mxu2 %v8891_v48  ;;  %5981 = vmatmul.bf16.vlgmr.msrb.gmra.mxu0 %v10230_v19  ;;  %v5711_v39 = vpop.f32.mrf.mxu3 }
 0x353   :  { %v9639_v57 = vld [vmem:[#allocation8 + $0x75c] sm:$0xf]  ;;  %v8859_v7 = vor.u32 %v9839_v59, %v8856_v61  ;;  %5961 = vmatpush.bf16.msra.mxu3 %v8091_v62  ;;  %v5776_v60 = vpop.f32.mrf.mxu0 }
 0x354   :  { %v8056_v25 = vld [vmem:[#allocation8 + $0x778] sm:$0xf0]  ;;  %5994 = vmatmul.bf16.vlgmr.msrb.gmra.mxu1 %v10234_v54 }
 0x355   :  { %v9831_v36 = vld [vmem:[#allocation8 + $0xd5c] sm:$0xf]  ;;  %v8059_v6 = vor.u32 %v9639_v57, %v8056_v25  ;;  %v5789_v52 = vpop.f32.mrf.mxu1 }
 0x356   :  { %v8824_v32 = vld [vmem:[#allocation8 + $0xd78] sm:$0xf0]  ;;  %6000 = vmatpush.bf16.msrb.mxu2 %v8859_v7  ;;  %v5750_v47 = vpop.f32.mrf.mxu2 }
 0x357   :  { %v9631_v49 = vld [vmem:[#allocation8 + $0x71c] sm:$0xf]  ;;  %v8827_v41 = vor.u32 %v9831_v36, %v8824_v32  ;;  %5962 = vmatpush.bf16.msra.mxu3 %v8059_v6  ;;  %v2623_v32 = vperm.slane %v10347_v38, 6 }
 0x358   :  { %v8024_v56 = vld [vmem:[#allocation8 + $0x738] sm:$0xf0] }
 0x359   :  { %v9823_v1 = vld [vmem:[#allocation8 + $0xd1c] sm:$0xf]  ;;  %v8027_v10 = vor.u32 %v9631_v49, %v8024_v56 }
 0x35a   :  { %v8792_v5 = vld [vmem:[#allocation8 + $0xd38] sm:$0xf0]  ;;  %6001 = vmatpush.bf16.msrb.mxu2 %v8827_v41 }
 0x35b   :  { %v9623_v12 = vld [vmem:[#allocation8 + $0x6dc] sm:$0xf]  ;;  %v8795_v9 = vor.u32 %v9823_v1, %v8792_v5  ;;  %5963 = vmatpush.bf16.msra.mxu3 %v8027_v10 }
 0x35c   :  { %v7992_v55 = vld [vmem:[#allocation8 + $0x6f8] sm:$0xf0] }
 0x35d   :  { %v9815_v19 = vld [vmem:[#allocation8 + $0xcdc] sm:$0xf]  ;;  %v7995_v54 = vor.u32 %v9623_v12, %v7992_v55 }
 0x35e   :  { %v8760_v16 = vld [vmem:[#allocation8 + $0xcf8] sm:$0xf0]  ;;  %6002 = vmatpush.bf16.msrb.mxu2 %v8795_v9 }
 0x35f   :  { %v9615_v15 = vld [vmem:[#allocation8 + $0x69c] sm:$0xf]  ;;  %v8763_v18 = vor.u32 %v9815_v19, %v8760_v16  ;;  %5964 = vmatpush.bf16.msra.mxu3 %v7995_v54 }
 0x360   :  { %v7960_v30 = vld [vmem:[#allocation8 + $0x6b8] sm:$0xf0] }
 0x361   :  { %v9807_v43 = vld [vmem:[#allocation8 + $0xc9c] sm:$0xf]  ;;  %v7963_v22 = vor.u32 %v9615_v15, %v7960_v30 }
 0x362   :  { %v8728_v21 = vld [vmem:[#allocation8 + $0xcb8] sm:$0xf0]  ;;  %6003 = vmatpush.bf16.msrb.mxu2 %v8763_v18 }
 0x363   :  { %v9607_v23 = vld [vmem:[#allocation8 + $0x65c] sm:$0xf]  ;;  %v8731_v50 = vor.u32 %v9807_v43, %v8728_v21  ;;  %5965 = vmatpush.bf16.msra.mxu3 %v7963_v22 }
 0x364   :  { %v7928_v26 = vld [vmem:[#allocation8 + $0x678] sm:$0xf0] }
 0x365   :  { %v9799_v0 = vld [vmem:[#allocation8 + $0xc5c] sm:$0xf]  ;;  %v7931_v29 = vor.u32 %v9607_v23, %v7928_v26 }
 0x366   :  { %v8696_v31 = vld [vmem:[#allocation8 + $0xc78] sm:$0xf0]  ;;  %6004 = vmatpush.bf16.msrb.mxu2 %v8731_v50 }
 0x367   :  { %v9599_v34 = vld [vmem:[#allocation8 + $0x61c] sm:$0xf]  ;;  %v8699_v35 = vor.u32 %v9799_v0, %v8696_v31  ;;  %5966 = vmatpush.bf16.msra.mxu3 %v7931_v29 }
 0x368   :  { %v7896_v27 = vld [vmem:[#allocation8 + $0x638] sm:$0xf0] }
 0x369   :  { %v9911_v44 = vld [vmem:[#allocation8 + $0xfdc] sm:$0xf]  ;;  %v7899_v48 = vor.u32 %v9599_v34, %v7896_v27 }
 0x36a   :  { %v9144_v45 = vld [vmem:[#allocation8 + $0xff8] sm:$0xf0]  ;;  %6005 = vmatpush.bf16.msrb.mxu2 %v8699_v35 }
 0x36b   :  { %v9791_v2 = vld [vmem:[#allocation8 + $0xc1c] sm:$0xf]  ;;  %v9147_v53 = vor.u32 %v9911_v44, %v9144_v45  ;;  %5967 = vmatpush.bf16.msra.mxu3 %v7899_v48 }
 0x36c   :  { %v8664_v17 = vld [vmem:[#allocation8 + $0xc38] sm:$0xf0] }
 0x36d   :  { %v8667_v58 = vor.u32 %v9791_v2, %v8664_v17  ;;  %v9903_v40 = vld [vmem:[#allocation8 + $0xf9c] sm:$0xf]  ;;  %v5839_v56 = vpop.f32.mrf.mxu1  ;;  %v5761_v11 = vpop.f32.mrf.mxu3 }
 0x36e   :  { %v9112_v59 = vld [vmem:[#allocation8 + $0xfb8] sm:$0xf0]  ;;  %5968 = vmatmul.bf16.vlgmr.msra.gmra.mxu3 %v10221_v51  ;;  %v5826_v49 = vpop.f32.mrf.mxu0  ;;  %v5762_v37 = vadd.f32 %v5761_v11, %v5749_v20 }
 0x36f   :  { %6012 = vmatpush.bf16.msrb.mxu3 %v9147_v53  ;;  %v9115_v61 = vor.u32 %v9903_v40, %v9112_v59  ;;  %6006 = vmatpush.bf16.msrb.mxu2 %v8667_v58  ;;  %v9895_v62 = vld [vmem:[#allocation8 + $0xf5c] sm:$0xf]  ;;  %v5827_v1 = vadd.f32 %v5826_v49, %v2623_v32 }
 0x370   :  { %v9080_v63 = vld [vmem:[#allocation8 + $0xf78] sm:$0xf0]  ;;  %v5775_v43 = vadd.f32 %v10392_v14, %v5762_v37 }
 0x371   :  { %v9083_v57 = vor.u32 %v9895_v62, %v9080_v63  ;;  %v9887_v25 = vld [vmem:[#allocation8 + $0xf1c] sm:$0xf]  ;;  %v5840_v51 = vadd.f32 %v5839_v56, %v5827_v1 }
 0x372   :  { %6007 = vmatmul.bf16.vlgmr.msrb.gmra.mxu2 %v10240_v33  ;;  %v9048_v7 = vld [vmem:[#allocation8 + $0xf38] sm:$0xf0]  ;;  %v5800_v33 = vpop.f32.mrf.mxu2  ;;  %v5788_v21 = vadd.f32 %v10394_v28, %v5775_v43 }
 0x373   :  { %6013 = vmatpush.bf16.msrb.mxu3 %v9115_v61  ;;  %v9051_v36 = vor.u32 %v9887_v25, %v9048_v7  ;;  %v9879_v6 = vld [vmem:[#allocation8 + $0xedc] sm:$0xf] }
 0x374   :  { %v9016_v42 = vld [vmem:[#allocation8 + $0xef8] sm:$0xf0]  ;;  %v5801_v24 = vadd.f32 %v5800_v33, %v5788_v21 }
 0x375   :  { %v9019_v41 = vor.u32 %v9879_v6, %v9016_v42  ;;  %v9871_v5 = vld [vmem:[#allocation8 + $0xe9c] sm:$0xf]  ;;  %v5841_v16 = vpop.f32.mrf.mxu1  ;;  %v5763_v15 = vpop.f32.mrf.mxu3 }
 0x376   :  { %v8984_v10 = vld [vmem:[#allocation8 + $0xeb8] sm:$0xf0]  ;;  %v5828_v19 = vpop.f32.mrf.mxu0 }
 0x377   :  { %6014 = vmatpush.bf16.msrb.mxu3 %v9083_v57  ;;  %v8987_v12 = vor.u32 %v9871_v5, %v8984_v10  ;;  %v9863_v55 = vld [vmem:[#allocation8 + $0xe5c] sm:$0xf] }
 0x378   :  { %v8952_v9 = vld [vmem:[#allocation8 + $0xe78] sm:$0xf0] }
 0x379   :  { %v8955_v38 = vor.u32 %v9863_v55, %v8952_v9  ;;  %v9855_v54 = vld [vmem:[#allocation8 + $0xe1c] sm:$0xf] }
 0x37a   :  { %v8920_v8 = vld [vmem:[#allocation8 + $0xe38] sm:$0xf0]  ;;  %v5802_v30 = vpop.f32.mrf.mxu2 }
 0x37b   :  { %6015 = vmatpush.bf16.msrb.mxu3 %v9051_v36  ;;  %v8923_v18 = vor.u32 %v9855_v54, %v8920_v8 }
 0x37f   :  { %6016 = vmatpush.bf16.msrb.mxu3 %v9019_v41 }
 0x383   :  { %6017 = vmatpush.bf16.msrb.mxu3 %v8987_v12 }
 0x387   :  { %6018 = vmatpush.bf16.msrb.mxu3 %v8955_v38 }
 0x38b   :  { %6019 = vmatpush.bf16.msrb.mxu3 %v8923_v18 }
 0x38d   :  { %v5813_v26 = vpop.f32.mrf.mxu3 }
 0x38e   :  { %6020 = vmatmul.bf16.vlgmr.msrb.gmra.mxu3 %v10247_v13  ;;  %v5878_v22 = vpop.f32.mrf.mxu0  ;;  %v5814_v50 = vadd.f32 %v5813_v26, %v5801_v24  ;;  %v9927_v13 = vld [vmem:[#allocation10] sm:$0xff] }
 0x38f   :  { %v2624_v29 = vperm.slane %v9927_v13, 7 }
 0x390   :  { %v5891_v23 = vpop.f32.mrf.mxu1  ;;  %vm6030_vm13 = vcmp.gt.f32.partialorder %v5814_v50, 0.0  ;;  %v6038_v60 = vmul.f32 0.01, %v5814_v50 }
 0x391   :  { %v5852_v46 = vpop.f32.mrf.mxu2 }
 0x392   :  { %v6046_v52 = vsel %vm6030_vm13, %v5814_v50, %v6038_v60  ;;  %v5853_v17 = vadd.f32 %v5852_v46, %v5840_v51 }
 0x393   :  { %6054 = vst [vmem:[#allocation11 + $0x28] sm:$0xff] %v6046_v52 }
 0x395   :  { %v5815_v4 = vpop.f32.mrf.mxu3 }
 0x396   :  { %v5880_v0 = vpop.f32.mrf.mxu0 }
 0x398   :  { %v5893_v31 = vpop.f32.mrf.mxu1 }
 0x399   :  { %v5854_v3 = vpop.f32.mrf.mxu2 }
 0x3b0   :  { %v5943_v14 = vpop.f32.mrf.mxu1  ;;  %v5865_v35 = vpop.f32.mrf.mxu3 }
 0x3b1   :  { %v5930_v34 = vpop.f32.mrf.mxu0  ;;  %v5866_v48 = vadd.f32 %v5865_v35, %v5853_v17 }
 0x3b2   :  { %v5931_v27 = vadd.f32 %v5930_v34, %v2624_v29 }
 0x3b3   :  { %v5879_v53 = vadd.f32 %v5878_v22, %v5866_v48 }
 0x3b4   :  { %v5944_v28 = vadd.f32 %v5943_v14, %v5931_v27  ;;  %v5904_v39 = vpop.f32.mrf.mxu2 }
 0x3b5   :  { %v5892_v58 = vadd.f32 %v5891_v23, %v5879_v53 }
 0x3b7   :  { %v5905_v61 = vadd.f32 %v5904_v39, %v5892_v58 }
 0x3b8   :  { %v5945_v45 = vpop.f32.mrf.mxu1  ;;  %v5867_v47 = vpop.f32.mrf.mxu3 }
 0x3b9   :  { %v5932_v44 = vpop.f32.mrf.mxu0 }
 0x3bc   :  { %v5906_v2 = vpop.f32.mrf.mxu2 }
 0x3cf   :  { %v5982_v40 = vpop.f32.mrf.mxu0 }
 0x3d0   :  { %v5917_v62 = vpop.f32.mrf.mxu3 }
 0x3d1   :  { %v5995_v59 = vpop.f32.mrf.mxu1  ;;  %v5918_v63 = vadd.f32 %v5917_v62, %v5905_v61 }
 0x3d3   :  { %vm6031_vm14 = vcmp.gt.f32.partialorder %v5918_v63, 0.0  ;;  %v6039_v25 = vmul.f32 0.01, %v5918_v63 }
 0x3d4   :  { %v5956_v57 = vpop.f32.mrf.mxu2 }
 0x3d5   :  { %v6047_v36 = vsel %vm6031_vm14, %v5918_v63, %v6039_v25  ;;  %v5957_v5 = vadd.f32 %v5956_v57, %v5944_v28 }
 0x3d6   :  { %6055 = vst [vmem:[#allocation11 + $0x30] sm:$0xff] %v6047_v36 }
 0x3d7   :  { %v5984_v7 = vpop.f32.mrf.mxu0 }
 0x3d8   :  { %v5919_v6 = vpop.f32.mrf.mxu3 }
 0x3d9   :  { %v5997_v32 = vpop.f32.mrf.mxu1 }
 0x3dc   :  { %v5958_v42 = vpop.f32.mrf.mxu2 }
 0x3f1   :  { %v5969_v49 = vpop.f32.mrf.mxu3 }
 0x3f2   :  { %v5970_v10 = vadd.f32 %v5969_v49, %v5957_v5 }
 0x3f4   :  { %v5983_v51 = vadd.f32 %v5982_v40, %v5970_v10 }
 0x3f5   :  { %v6008_v56 = vpop.f32.mrf.mxu2 }
 0x3f6   :  { %v5996_v11 = vadd.f32 %v5995_v59, %v5983_v51 }
 0x3f8   :  { %v6009_v33 = vadd.f32 %v6008_v56, %v5996_v11 }
 0x3f9   :  { %v5971_v41 = vpop.f32.mrf.mxu3 }
 0x3fd   :  { %v6010_v1 = vpop.f32.mrf.mxu2 }
 0x411   :  { %v6021_v12 = vpop.f32.mrf.mxu3 }
 0x412   :  { %v6022_v55 = vadd.f32 %v6021_v12, %v6009_v33 }
 0x414   :  { %vm6032_vm15 = vcmp.gt.f32.partialorder %v6022_v55, 0.0  ;;  %v6040_v9 = vmul.f32 0.01, %v6022_v55 }
 0x416   :  { %v6048_v19 = vsel %vm6032_vm15, %v6022_v55, %v6040_v9 }
 0x417   :  { %6056 = vst [vmem:[#allocation11 + $0x38] sm:$0xff] %v6048_v19 }
 0x418   :  { %6067 = dma.vmem_to_hbm [thread:$0]  %s6063_s4, 1024, %s6065_s19, [#allocation4]  }
 0x419   :  { %v6023_v16 = vpop.f32.mrf.mxu3 }
 0x41a   :  { %10078 = dma.done.wait [#allocation4], 1024  }
 0x41b   :  { %10079 = vsyncadd [#allocation4], 4294966272 }
 0x41c   :  { %6072 = vsyncpa [#allocation3], 1 }
 0x41d   :  { %6073 = vsyncpa [#allocation6], 1 }
 0x41e   :  { %6074 = vsyncpa [#allocation9], 1 }
 0x41f   :  { %6075 = vsyncpa [#allocation4], 1 }

</bundles_post_ra>
